<compile_context>
chip_gen: v5e
topology: v5e:2x2
jax: 0.10.0
libtpu: 0.0.40
codegen_flags: <defaults>
</compile_context>

<pallas_src>
import jax
import jax.numpy as jnp
import numpy as np
from jax.experimental import pallas as pl
from jax.experimental.pallas import tpu as pltpu

NEG_SLOPE = 0.01  # F.leaky_relu default negative_slope


def _lrelu(x):
    # For slope in [0,1]:  max(x, slope*x) == leaky_relu(x).  One VALU op
    # cheaper than where(cmp, ., .).
    return jnp.maximum(x, NEG_SLOPE * x)


# ----------------- pass 1: encode + decode + L_str + L_att -----------------
def _make_fused_kernel(eta1, eta2, has_c1, has_c2, bf16_res):
    f32, bf16 = jnp.float32, jnp.bfloat16
    rdt = bf16 if bf16_res else f32

    def kernel(*refs):
        refs = list(refs)
        a_ref = refs.pop(0)                             # bf16 (TM, adj0), 0/1 exact
        x_ref = refs.pop(0)                             # f32  (TM, att0)
        c1_ref = refs.pop(0) if has_c1 else None        # bf16 (TM, adj0)
        c2_ref = refs.pop(0) if has_c2 else None        # bf16 (TM, att0)
        (WpAe, bpAe, WpXe, bpXe, WcAe, bcAe, WcXe, bcXe,
         WcAd, bcAd, WcXd, bcXd, WpAd, bpAd, WpXd, bpXd) = refs[:16]
        enc_ref, part_ref = refs[16], refs[17]

        a = a_ref[...]
        x = x_ref[...]
        xb = x.astype(bf16)

        # --- encode half of savector (bf16 MXU matmuls, f32 accumulation) ---
        enc_a = _lrelu(jnp.dot(a, WpAe[...], preferred_element_type=f32) + bpAe[...])
        enc_x = _lrelu(jnp.dot(xb, WpXe[...], preferred_element_type=f32) + bpXe[...])
        encode = (_lrelu(jnp.dot(enc_a.astype(bf16), WcAe[...],
                                 preferred_element_type=f32) + bcAe[...])
                  + _lrelu(jnp.dot(enc_x.astype(bf16), WcXe[...],
                                   preferred_element_type=f32) + bcXe[...]))
        enc_ref[...] = encode
        eb = encode.astype(bf16)

        # --- decode half: two dots sharing LHS (avoids mid-tile lane slice) ---
        dec_a1 = _lrelu(jnp.dot(eb, WcAd[...], preferred_element_type=f32) + bcAd[...])
        dec_x1 = _lrelu(jnp.dot(eb, WcXd[...], preferred_element_type=f32) + bcXd[...])
        dec_a = _lrelu(jnp.dot(dec_a1.astype(bf16), WpAd[...],
                               preferred_element_type=f32) + bpAd[...])
        dec_x = _lrelu(jnp.dot(dec_x1.astype(bf16), WpXd[...],
                               preferred_element_type=f32) + bpXd[...])

        # --- structure loss (row-local) ---
        a_r = a if bf16_res else a.astype(f32)
        d1 = dec_a.astype(rdt) - a_r
        if has_c1:
            d1 = d1 * c1_ref[...].astype(rdt)
            t1 = (d1 * d1).astype(f32)
        else:
            # C1 = 1 + 4A with A in {0,1}:  ((d)*(1+4a))^2 == d^2 * (1 + 24a), exact.
            w1 = 1.0 + 24.0 * a_r
            t1 = (d1 * d1 * w1).astype(f32)
        l_str = jnp.sum(t1, axis=1, keepdims=True) * eta1

        # --- attribute loss (row-local) ---
        x_r = xb if bf16_res else x
        d2 = dec_x.astype(rdt) - x_r
        if has_c2:
            d2 = d2 * c2_ref[...].astype(rdt)
        t2 = (d2 * d2).astype(f32)
        l_att = jnp.sum(t2, axis=1, keepdims=True) * eta2

        part_ref[...] = l_str + l_att

    return kernel


# -------------------------- pass 2: locality only ---------------------------
def _make_loc_kernel(h0):
    def kernel(c3_ref, e_ref, z_ref, out_ref):
        e = e_ref[...]                                   # f32 (TM, h0)
        # One bf16 matmul delivers C3@E, C3@||e||^2 and rowsum(C3):
        p = jnp.dot(c3_ref[...], z_ref[...], preferred_element_type=jnp.float32)
        cross = jnp.sum(p[:, :h0] * e, axis=1, keepdims=True)
        col_term = p[:, h0:h0 + 1]
        rowsum_c3 = p[:, h0 + 1:h0 + 2]
        en = jnp.sum(e * e, axis=1, keepdims=True)
        out_ref[...] = en * rowsum_c3 - 2.0 * cross + col_term
    return kernel


# ------------------------------ config helpers ------------------------------
def _vmem_capacity_bytes():
    try:
        return int(pltpu.get_tpu_info().vmem_capacity_bytes)
    except Exception:
        return 64 << 20          # v7x per-TC capacity = safe lower bound


def _default_bf16_residuals():
    # Packed bf16 elementwise helps on v6e/v7x (bf16 VPU); v5 and older would
    # just upcast, so keep f32 residual math there.
    try:
        kind = jax.devices()[0].device_kind.lower()
        return not any(tag in kind for tag in ("v2", "v3", "v4", "v5"))
    except Exception:
        return True


def _pick_tm(n, per_row_stream_bytes, resident_bytes, vmem_cap):
    """Largest row-tile (divisor of n, multiple of 16) whose double-buffered
    streams + residents fit the budget; prefers an even grid of >= 2 steps so
    the 'parallel' axis balances across the two v7x TensorCores / megacore."""
    budget = int(0.65 * vmem_cap) - 2 * resident_bytes - (4 << 20)
    cands = [t for t in (1024, 512, 256, 128, 64, 32, 16) if 2 * t <= n]
    for prefer_even in (True, False):
        for tm in cands:
            if n % tm:
                continue
            steps = n // tm
            if prefer_even and (steps < 2 or steps % 2):
                continue
            if 2 * tm * per_row_stream_bytes <= budget:
                return tm
    return 16


def _compiler_params(stream_bytes_per_step, resident_bytes, vmem_cap):
    # double-buffered streams + (conservatively doubled) residents + headroom,
    # never requesting more than ~80% of physical VMEM.
    est = 2 * stream_bytes_per_step + 2 * resident_bytes + (6 << 20)
    limit = int(min(max(est, 32 << 20), int(0.8 * vmem_cap)))
    return pltpu.CompilerParams(dimension_semantics=("parallel",),
                                vmem_limit_bytes=limit)


# --------------------------------- wrapper ----------------------------------
def rsane_forward(A, X, C1, C2, C3, lamb, params, eta1, eta2, tm=None,
                  bf16_residuals=None):
    """Full RSANE forward (K == 1 configuration).

    C1 may be None -> C1 = 1 + 4*A is folded in-kernel (saves an N^2 stream);
    C2 may be None -> all-ones C2 (skips the multiply).  Explicit arrays keep
    the general module semantics (streamed in bf16).
    """
    n, adj0 = A.shape
    att0 = X.shape[1]
    (WpAe, bpAe, WpXe, bpXe, WcAe, bcAe, WcXe, bcXe,
     WcAd, bcAd, WcXd, bcXd, WpAd, bpAd, WpXd, bpXd) = params
    h0 = WcAe.shape[1]
    assert n % 16 == 0, "node count must be a multiple of 16 for TPU tiling"

    f32, bf16 = jnp.float32, jnp.bfloat16
    if bf16_residuals is None:
        bf16_residuals = _default_bf16_residuals()
    vmem_cap = _vmem_capacity_bytes()

    A_b = A.astype(bf16)                 # 0/1 adjacency: exact in bf16
    X_f = X.astype(f32)
    C3_b = C3.astype(bf16)
    has_c1 = C1 is not None
    has_c2 = C2 is not None

    weights = [WpAe.astype(bf16), bpAe.astype(f32), WpXe.astype(bf16), bpXe.astype(f32),
               WcAe.astype(bf16), bcAe.astype(f32), WcXe.astype(bf16), bcXe.astype(f32),
               WcAd.astype(bf16), bcAd.astype(f32), WcXd.astype(bf16), bcXd.astype(f32),
               WpAd.astype(bf16), bpAd.astype(f32), WpXd.astype(bf16), bpXd.astype(f32)]
    resident1 = sum(int(np.prod(w.shape)) * w.dtype.itemsize for w in weights)
    resident2 = n * (h0 + 2) * 2                               # Z (bf16)

    p1_row = (adj0 * 2 + att0 * 4 + (adj0 * 2 if has_c1 else 0)
              + (att0 * 2 if has_c2 else 0) + h0 * 4 + 4)      # streams incl. outputs
    p2_row = n * 2 + h0 * 4 + 4

    if tm is None:
        tm = _pick_tm(n, max(p1_row, p2_row), max(resident1, resident2), vmem_cap)
    assert n % tm == 0 and tm % 16 == 0
    grid = (n // tm,)

    def tile(shape):                                           # row-tiled operand
        return pl.BlockSpec((tm,) + tuple(shape[1:]), lambda i: (i, 0))

    def resident(shape):                                       # fetched once, VMEM-resident
        return pl.BlockSpec(tuple(shape), lambda i: (0, 0))

    # ------------------------------- pass 1 ---------------------------------
    inputs1 = [A_b, X_f]
    specs1 = [tile(A_b.shape), tile(X_f.shape)]
    if has_c1:
        C1_b = C1.astype(bf16)
        inputs1.append(C1_b)
        specs1.append(tile(C1_b.shape))
    if has_c2:
        C2_b = C2.astype(bf16)
        inputs1.append(C2_b)
        specs1.append(tile(C2_b.shape))
    inputs1 += weights
    specs1 += [resident(w.shape) for w in weights]

    encode, partial = pl.pallas_call(
        _make_fused_kernel(float(eta1), float(eta2), has_c1, has_c2, bf16_residuals),
        grid=grid,
        out_shape=(jax.ShapeDtypeStruct((n, h0), f32),
                   jax.ShapeDtypeStruct((n, 1), f32)),
        in_specs=specs1,
        out_specs=(pl.BlockSpec((tm, h0), lambda i: (i, 0)),
                   pl.BlockSpec((tm, 1), lambda i: (i, 0))),
        compiler_params=_compiler_params(tm * p1_row, resident1, vmem_cap),
    )(*inputs1)

    # ---- gram-free locality RHS  Z = [E | ||e||^2 | 1]  (tiny, bf16) ----
    Eb = encode.astype(bf16)
    en = jnp.sum(encode * encode, axis=1, keepdims=True)        # f32
    Z = jnp.concatenate([Eb, en.astype(bf16), jnp.ones_like(en, dtype=bf16)], axis=1)

    # ------------------------------- pass 2 ---------------------------------
    lloc = pl.pallas_call(
        _make_loc_kernel(h0),
        grid=grid,
        out_shape=jax.ShapeDtypeStruct((n, 1), f32),
        in_specs=[tile(C3_b.shape), tile(encode.shape), resident(Z.shape)],
        out_specs=pl.BlockSpec((tm, 1), lambda i: (i, 0)),
        compiler_params=_compiler_params(tm * p2_row, resident2, vmem_cap),
    )(C3_b, encode, Z)

    o1 = (partial[:, 0] + lloc[:, 0]) * lamb                    # tiny O(N) epilogue
    total = jnp.sum(o1)
    return total, o1


# -------------------------------- utilities ---------------------------------
def init_linear(key, fan_in, fan_out):
    """PyTorch nn.Linear default init; returns (W^T [in,out], bias [1,out])."""
    kw, kb = jax.random.split(key)
    bound = 1.0 / np.sqrt(fan_in)
    w_t = jax.random.uniform(kw, (fan_in, fan_out), jnp.float32, -bound, bound)
    b = jax.random.uniform(kb, (1, fan_out), jnp.float32, -bound, bound)
    return w_t, b


def _reference(A, X, C1, C2, C3, lamb, params, eta1, eta2):
    """Pure numpy (float64) reference mirroring the PyTorch forward."""
    def lrelu(x):
        return np.where(x >= 0, x, NEG_SLOPE * x)

    p = [np.asarray(a, np.float64) for a in params]
    (WpAe, bpAe, WpXe, bpXe, WcAe, bcAe, WcXe, bcXe,
     WcAd, bcAd, WcXd, bcXd, WpAd, bpAd, WpXd, bpXd) = p
    A64, X64 = np.asarray(A, np.float64), np.asarray(X, np.float64)
    C1_, C2_, C3_ = (np.asarray(c, np.float64) for c in (C1, C2, C3))

    enc_A = lrelu(A64 @ WpAe + bpAe)
    enc_X = lrelu(X64 @ WpXe + bpXe)
    encode = lrelu(enc_A @ WcAe + bcAe) + lrelu(enc_X @ WcXe + bcXe)
    dec_A = lrelu(encode @ WcAd + bcAd)
    dec_X = lrelu(encode @ WcXd + bcXd)
    dec_A = lrelu(dec_A @ WpAd + bpAd)
    dec_X = lrelu(dec_X @ WpXd + bpXd)

    enc_norm = np.sum(encode * encode, axis=1, keepdims=True)
    d1 = (dec_A - A64) * C1_
    L_str = np.sum(d1 * d1, axis=1) * eta1
    d2 = (dec_X - X64) * C2_
    L_att = np.sum(d2 * d2, axis=1) * eta2
    L_loc = np.sum((enc_norm - 2 * encode @ encode.T + enc_norm.T) * C3_, axis=1)
    o1 = (L_str + L_att + L_loc) * lamb
    return np.sum(o1), o1


if __name__ == "__main__":
    # Small, module-consistent shapes: A is the [N, N] adjacency, X the node
    # attributes. adj_sizes=(N, 32), att_sizes=(64, 32), hidden_sizes=[32].
    N = 256
    adj_sizes = (N, 32)
    att_sizes = (64, 32)
    hidden_sizes = [32]
    eta1, eta2, lamb = 0.5, 0.8, 0.1

    key = jax.random.PRNGKey(0)
    keys = jax.random.split(key, 20)

    # Inputs
    A = (jax.random.uniform(keys[0], (N, adj_sizes[0])) > 0.8).astype(jnp.float32)
    X = jax.random.normal(keys[1], (N, att_sizes[0]), jnp.float32)
    C1 = 1.0 + 4.0 * A                                   # reweight nonzero links
    C2 = jnp.ones((N, att_sizes[0]), jnp.float32)
    C3 = jax.random.uniform(keys[2], (N, N), jnp.float32)

    # Parameters: 8 Linear layers, stored as (W^T, b) pairs.
    layer_dims = [
        (adj_sizes[0], adj_sizes[1]),        # pre_A_encode
        (att_sizes[0], att_sizes[1]),        # pre_X_encode
        (adj_sizes[1], hidden_sizes[0]),     # con_A_encode
        (att_sizes[1], hidden_sizes[0]),     # con_X_encode
        (hidden_sizes[0], adj_sizes[1]),     # con_A_decode
        (hidden_sizes[0], att_sizes[1]),     # con_X_decode
        (adj_sizes[1], adj_sizes[0]),        # pre_A_decode
        (att_sizes[1], att_sizes[0]),        # pre_X_decode
    ]
    params = []
    for i, (fi, fo) in enumerate(layer_dims):
        w_t, b = init_linear(keys[3 + i], fi, fo)
        params.extend([w_t, b])

    # ---- fast path: C1 = 1 + 4*A folded in-kernel, all-ones C2 skipped ----
    # tm=128 forces a 2-step (even) grid at this small N to exercise tiling.
    total, o1 = rsane_forward(A, X, None, None, C3, lamb, params, eta1, eta2, tm=128)
    total = jax.block_until_ready(total)
    o1 = jax.block_until_ready(o1)

    ref_total, ref_o1 = _reference(A, X, C1, C2, C3, lamb, params, eta1, eta2)
    scale = max(1.0, float(np.max(np.abs(ref_o1))))
    assert np.all(np.isfinite(np.asarray(o1)))
    np.testing.assert_allclose(np.asarray(o1), ref_o1, rtol=1e-2, atol=1e-2 * scale)
    np.testing.assert_allclose(float(total), ref_total, rtol=1e-2,
                               atol=1e-2 * max(1.0, abs(ref_total)))

    # ---- general path: arbitrary C1 / C2 streamed in bf16 (full semantics) ----
    C1g = jax.random.uniform(keys[12], (N, adj_sizes[0]), jnp.float32, 0.5, 2.0)
    C2g = jax.random.uniform(keys[13], (N, att_sizes[0]), jnp.float32, 0.5, 2.0)
    total_g, o1_g = rsane_forward(A, X, C1g, C2g, C3, lamb, params, eta1, eta2, tm=128)
    total_g = jax.block_until_ready(total_g)
    o1_g = jax.block_until_ready(o1_g)

    ref_total_g, ref_o1_g = _reference(A, X, C1g, C2g, C3, lamb, params, eta1, eta2)
    scale_g = max(1.0, float(np.max(np.abs(ref_o1_g))))
    np.testing.assert_allclose(np.asarray(o1_g), ref_o1_g, rtol=1e-2,
                               atol=1e-2 * scale_g)
    np.testing.assert_allclose(float(total_g), ref_total_g, rtol=1e-2,
                               atol=1e-2 * max(1.0, abs(ref_total_g)))

    print("KERNEL_OK")
</pallas_src>

<mosaic_0001>
module attributes {stable_mosaic.version = 11 : i64} {
  func.func @kernel(%arg0: i32, %arg1: memref<128x256xbf16, #tpu.memory_space<vmem>>, %arg2: memref<128x64xf32, #tpu.memory_space<vmem>>, %arg3: memref<256x32xbf16, #tpu.memory_space<vmem>>, %arg4: memref<1x32xf32, #tpu.memory_space<vmem>>, %arg5: memref<64x32xbf16, #tpu.memory_space<vmem>>, %arg6: memref<1x32xf32, #tpu.memory_space<vmem>>, %arg7: memref<32x32xbf16, #tpu.memory_space<vmem>>, %arg8: memref<1x32xf32, #tpu.memory_space<vmem>>, %arg9: memref<32x32xbf16, #tpu.memory_space<vmem>>, %arg10: memref<1x32xf32, #tpu.memory_space<vmem>>, %arg11: memref<32x32xbf16, #tpu.memory_space<vmem>>, %arg12: memref<1x32xf32, #tpu.memory_space<vmem>>, %arg13: memref<32x32xbf16, #tpu.memory_space<vmem>>, %arg14: memref<1x32xf32, #tpu.memory_space<vmem>>, %arg15: memref<32x256xbf16, #tpu.memory_space<vmem>>, %arg16: memref<1x256xf32, #tpu.memory_space<vmem>>, %arg17: memref<32x64xbf16, #tpu.memory_space<vmem>>, %arg18: memref<1x64xf32, #tpu.memory_space<vmem>>, %arg19: memref<128x32xf32, #tpu.memory_space<vmem>>, %arg20: memref<128x1xf32, #tpu.memory_space<vmem>>) attributes {dimension_semantics = [#tpu.dimension_semantics<parallel>], iteration_bounds = array<i64: 2>, scalar_prefetch = 0 : i64, scratch_operands = 0 : i64, tpu.core_type = #tpu.core_type<tc>, window_params = [{transform_indices = @transform_0, window_bounds = array<i64: 128, 256>}, {transform_indices = @transform_1, window_bounds = array<i64: 128, 64>}, {pipeline_mode = #tpu.pipeline_mode<synchronous>, transform_indices = @transform_2, window_bounds = array<i64: 256, 32>}, {pipeline_mode = #tpu.pipeline_mode<synchronous>, transform_indices = @transform_3, window_bounds = array<i64: 1, 32>}, {pipeline_mode = #tpu.pipeline_mode<synchronous>, transform_indices = @transform_4, window_bounds = array<i64: 64, 32>}, {pipeline_mode = #tpu.pipeline_mode<synchronous>, transform_indices = @transform_5, window_bounds = array<i64: 1, 32>}, {pipeline_mode = #tpu.pipeline_mode<synchronous>, transform_indices = @transform_6, window_bounds = array<i64: 32, 32>}, {pipeline_mode = #tpu.pipeline_mode<synchronous>, transform_indices = @transform_7, window_bounds = array<i64: 1, 32>}, {pipeline_mode = #tpu.pipeline_mode<synchronous>, transform_indices = @transform_8, window_bounds = array<i64: 32, 32>}, {pipeline_mode = #tpu.pipeline_mode<synchronous>, transform_indices = @transform_9, window_bounds = array<i64: 1, 32>}, {pipeline_mode = #tpu.pipeline_mode<synchronous>, transform_indices = @transform_10, window_bounds = array<i64: 32, 32>}, {pipeline_mode = #tpu.pipeline_mode<synchronous>, transform_indices = @transform_11, window_bounds = array<i64: 1, 32>}, {pipeline_mode = #tpu.pipeline_mode<synchronous>, transform_indices = @transform_12, window_bounds = array<i64: 32, 32>}, {pipeline_mode = #tpu.pipeline_mode<synchronous>, transform_indices = @transform_13, window_bounds = array<i64: 1, 32>}, {pipeline_mode = #tpu.pipeline_mode<synchronous>, transform_indices = @transform_14, window_bounds = array<i64: 32, 256>}, {pipeline_mode = #tpu.pipeline_mode<synchronous>, transform_indices = @transform_15, window_bounds = array<i64: 1, 256>}, {pipeline_mode = #tpu.pipeline_mode<synchronous>, transform_indices = @transform_16, window_bounds = array<i64: 32, 64>}, {pipeline_mode = #tpu.pipeline_mode<synchronous>, transform_indices = @transform_17, window_bounds = array<i64: 1, 64>}, {transform_indices = @transform_18, window_bounds = array<i64: 128, 32>}, {transform_indices = @transform_19, window_bounds = array<i64: 128, 1>}]} {
    %c0 = arith.constant 0 : index
    %c0_0 = arith.constant 0 : index
    %0 = vector.load %arg1[%c0, %c0_0] : memref<128x256xbf16, #tpu.memory_space<vmem>>, vector<128x256xbf16>
    %c0_1 = arith.constant 0 : index
    %c0_2 = arith.constant 0 : index
    %1 = vector.load %arg2[%c0_1, %c0_2] : memref<128x64xf32, #tpu.memory_space<vmem>>, vector<128x64xf32>
    %2 = arith.truncf %1 : vector<128x64xf32> to vector<128x64xbf16>
    %c0_3 = arith.constant 0 : index
    %c0_4 = arith.constant 0 : index
    %3 = vector.load %arg3[%c0_3, %c0_4] : memref<256x32xbf16, #tpu.memory_space<vmem>>, vector<256x32xbf16>
    %cst = arith.constant dense<0.000000e+00> : vector<128x32xf32>
    %4 = tpu.matmul %0, %3, %cst {dimension_numbers = #tpu.dot_dimension_numbers<[1], [0], [0], [1], [0, 0, 1, 1], [], []>} : vector<128x256xbf16>, vector<256x32xbf16>, vector<128x32xf32> -> vector<128x32xf32>
    %c0_5 = arith.constant 0 : index
    %c0_6 = arith.constant 0 : index
    %5 = vector.load %arg4[%c0_5, %c0_6] : memref<1x32xf32, #tpu.memory_space<vmem>>, vector<1x32xf32>
    %6 = vector.broadcast %5 : vector<1x32xf32> to vector<128x32xf32>
    %7 = arith.addf %4, %6 : vector<128x32xf32>
    %cst_7 = arith.constant 0.00999999977 : f32
    %8 = vector.broadcast %cst_7 : f32 to vector<128x32xf32>
    %9 = arith.mulf %8, %7 : vector<128x32xf32>
    %10 = arith.maximumf %7, %9 : vector<128x32xf32>
    %c0_8 = arith.constant 0 : index
    %c0_9 = arith.constant 0 : index
    %11 = vector.load %arg5[%c0_8, %c0_9] : memref<64x32xbf16, #tpu.memory_space<vmem>>, vector<64x32xbf16>
    %cst_10 = arith.constant dense<0.000000e+00> : vector<128x32xf32>
    %12 = tpu.matmul %2, %11, %cst_10 {dimension_numbers = #tpu.dot_dimension_numbers<[1], [0], [0], [1], [0, 0, 1, 1], [], []>} : vector<128x64xbf16>, vector<64x32xbf16>, vector<128x32xf32> -> vector<128x32xf32>
    %c0_11 = arith.constant 0 : index
    %c0_12 = arith.constant 0 : index
    %13 = vector.load %arg6[%c0_11, %c0_12] : memref<1x32xf32, #tpu.memory_space<vmem>>, vector<1x32xf32>
    %14 = vector.broadcast %13 : vector<1x32xf32> to vector<128x32xf32>
    %15 = arith.addf %12, %14 : vector<128x32xf32>
    %cst_13 = arith.constant 0.00999999977 : f32
    %16 = vector.broadcast %cst_13 : f32 to vector<128x32xf32>
    %17 = arith.mulf %16, %15 : vector<128x32xf32>
    %18 = arith.maximumf %15, %17 : vector<128x32xf32>
    %19 = arith.truncf %10 : vector<128x32xf32> to vector<128x32xbf16>
    %c0_14 = arith.constant 0 : index
    %c0_15 = arith.constant 0 : index
    %20 = vector.load %arg7[%c0_14, %c0_15] : memref<32x32xbf16, #tpu.memory_space<vmem>>, vector<32x32xbf16>
    %cst_16 = arith.constant dense<0.000000e+00> : vector<128x32xf32>
    %21 = tpu.matmul %19, %20, %cst_16 {dimension_numbers = #tpu.dot_dimension_numbers<[1], [0], [0], [1], [0, 0, 1, 1], [], []>} : vector<128x32xbf16>, vector<32x32xbf16>, vector<128x32xf32> -> vector<128x32xf32>
    %c0_17 = arith.constant 0 : index
    %c0_18 = arith.constant 0 : index
    %22 = vector.load %arg8[%c0_17, %c0_18] : memref<1x32xf32, #tpu.memory_space<vmem>>, vector<1x32xf32>
    %23 = vector.broadcast %22 : vector<1x32xf32> to vector<128x32xf32>
    %24 = arith.addf %21, %23 : vector<128x32xf32>
    %cst_19 = arith.constant 0.00999999977 : f32
    %25 = vector.broadcast %cst_19 : f32 to vector<128x32xf32>
    %26 = arith.mulf %25, %24 : vector<128x32xf32>
    %27 = arith.maximumf %24, %26 : vector<128x32xf32>
    %28 = arith.truncf %18 : vector<128x32xf32> to vector<128x32xbf16>
    %c0_20 = arith.constant 0 : index
    %c0_21 = arith.constant 0 : index
    %29 = vector.load %arg9[%c0_20, %c0_21] : memref<32x32xbf16, #tpu.memory_space<vmem>>, vector<32x32xbf16>
    %cst_22 = arith.constant dense<0.000000e+00> : vector<128x32xf32>
    %30 = tpu.matmul %28, %29, %cst_22 {dimension_numbers = #tpu.dot_dimension_numbers<[1], [0], [0], [1], [0, 0, 1, 1], [], []>} : vector<128x32xbf16>, vector<32x32xbf16>, vector<128x32xf32> -> vector<128x32xf32>
    %c0_23 = arith.constant 0 : index
    %c0_24 = arith.constant 0 : index
    %31 = vector.load %arg10[%c0_23, %c0_24] : memref<1x32xf32, #tpu.memory_space<vmem>>, vector<1x32xf32>
    %32 = vector.broadcast %31 : vector<1x32xf32> to vector<128x32xf32>
    %33 = arith.addf %30, %32 : vector<128x32xf32>
    %cst_25 = arith.constant 0.00999999977 : f32
    %34 = vector.broadcast %cst_25 : f32 to vector<128x32xf32>
    %35 = arith.mulf %34, %33 : vector<128x32xf32>
    %36 = arith.maximumf %33, %35 : vector<128x32xf32>
    %37 = arith.addf %27, %36 : vector<128x32xf32>
    %c0_26 = arith.constant 0 : index
    %c0_27 = arith.constant 0 : index
    %38 = vector.load %arg19[%c0_26, %c0_27] : memref<128x32xf32, #tpu.memory_space<vmem>>, vector<128x32xf32>
    tpu.vector_store %arg19[%c0_26, %c0_27], %37 {strides = array<i32>} : memref<128x32xf32, #tpu.memory_space<vmem>>, vector<128x32xf32>,
    %39 = arith.truncf %37 : vector<128x32xf32> to vector<128x32xbf16>
    %c0_28 = arith.constant 0 : index
    %c0_29 = arith.constant 0 : index
    %40 = vector.load %arg11[%c0_28, %c0_29] : memref<32x32xbf16, #tpu.memory_space<vmem>>, vector<32x32xbf16>
    %cst_30 = arith.constant dense<0.000000e+00> : vector<128x32xf32>
    %41 = tpu.matmul %39, %40, %cst_30 {dimension_numbers = #tpu.dot_dimension_numbers<[1], [0], [0], [1], [0, 0, 1, 1], [], []>} : vector<128x32xbf16>, vector<32x32xbf16>, vector<128x32xf32> -> vector<128x32xf32>
    %c0_31 = arith.constant 0 : index
    %c0_32 = arith.constant 0 : index
    %42 = vector.load %arg12[%c0_31, %c0_32] : memref<1x32xf32, #tpu.memory_space<vmem>>, vector<1x32xf32>
    %43 = vector.broadcast %42 : vector<1x32xf32> to vector<128x32xf32>
    %44 = arith.addf %41, %43 : vector<128x32xf32>
    %cst_33 = arith.constant 0.00999999977 : f32
    %45 = vector.broadcast %cst_33 : f32 to vector<128x32xf32>
    %46 = arith.mulf %45, %44 : vector<128x32xf32>
    %47 = arith.maximumf %44, %46 : vector<128x32xf32>
    %c0_34 = arith.constant 0 : index
    %c0_35 = arith.constant 0 : index
    %48 = vector.load %arg13[%c0_34, %c0_35] : memref<32x32xbf16, #tpu.memory_space<vmem>>, vector<32x32xbf16>
    %cst_36 = arith.constant dense<0.000000e+00> : vector<128x32xf32>
    %49 = tpu.matmul %39, %48, %cst_36 {dimension_numbers = #tpu.dot_dimension_numbers<[1], [0], [0], [1], [0, 0, 1, 1], [], []>} : vector<128x32xbf16>, vector<32x32xbf16>, vector<128x32xf32> -> vector<128x32xf32>
    %c0_37 = arith.constant 0 : index
    %c0_38 = arith.constant 0 : index
    %50 = vector.load %arg14[%c0_37, %c0_38] : memref<1x32xf32, #tpu.memory_space<vmem>>, vector<1x32xf32>
    %51 = vector.broadcast %50 : vector<1x32xf32> to vector<128x32xf32>
    %52 = arith.addf %49, %51 : vector<128x32xf32>
    %cst_39 = arith.constant 0.00999999977 : f32
    %53 = vector.broadcast %cst_39 : f32 to vector<128x32xf32>
    %54 = arith.mulf %53, %52 : vector<128x32xf32>
    %55 = arith.maximumf %52, %54 : vector<128x32xf32>
    %56 = arith.truncf %47 : vector<128x32xf32> to vector<128x32xbf16>
    %c0_40 = arith.constant 0 : index
    %c0_41 = arith.constant 0 : index
    %57 = vector.load %arg15[%c0_40, %c0_41] : memref<32x256xbf16, #tpu.memory_space<vmem>>, vector<32x256xbf16>
    %cst_42 = arith.constant dense<0.000000e+00> : vector<128x256xf32>
    %58 = tpu.matmul %56, %57, %cst_42 {dimension_numbers = #tpu.dot_dimension_numbers<[1], [0], [0], [1], [0, 0, 1, 1], [], []>} : vector<128x32xbf16>, vector<32x256xbf16>, vector<128x256xf32> -> vector<128x256xf32>
    %c0_43 = arith.constant 0 : index
    %c0_44 = arith.constant 0 : index
    %59 = vector.load %arg16[%c0_43, %c0_44] : memref<1x256xf32, #tpu.memory_space<vmem>>, vector<1x256xf32>
    %60 = vector.broadcast %59 : vector<1x256xf32> to vector<128x256xf32>
    %61 = arith.addf %58, %60 : vector<128x256xf32>
    %cst_45 = arith.constant 0.00999999977 : f32
    %62 = vector.broadcast %cst_45 : f32 to vector<128x256xf32>
    %63 = arith.mulf %62, %61 : vector<128x256xf32>
    %64 = arith.maximumf %61, %63 : vector<128x256xf32>
    %65 = arith.truncf %55 : vector<128x32xf32> to vector<128x32xbf16>
    %c0_46 = arith.constant 0 : index
    %c0_47 = arith.constant 0 : index
    %66 = vector.load %arg17[%c0_46, %c0_47] : memref<32x64xbf16, #tpu.memory_space<vmem>>, vector<32x64xbf16>
    %cst_48 = arith.constant dense<0.000000e+00> : vector<128x64xf32>
    %67 = tpu.matmul %65, %66, %cst_48 {dimension_numbers = #tpu.dot_dimension_numbers<[1], [0], [0], [1], [0, 0, 1, 1], [], []>} : vector<128x32xbf16>, vector<32x64xbf16>, vector<128x64xf32> -> vector<128x64xf32>
    %c0_49 = arith.constant 0 : index
    %c0_50 = arith.constant 0 : index
    %68 = vector.load %arg18[%c0_49, %c0_50] : memref<1x64xf32, #tpu.memory_space<vmem>>, vector<1x64xf32>
    %69 = vector.broadcast %68 : vector<1x64xf32> to vector<128x64xf32>
    %70 = arith.addf %67, %69 : vector<128x64xf32>
    %cst_51 = arith.constant 0.00999999977 : f32
    %71 = vector.broadcast %cst_51 : f32 to vector<128x64xf32>
    %72 = arith.mulf %71, %70 : vector<128x64xf32>
    %73 = arith.maximumf %70, %72 : vector<128x64xf32>
    %74 = arith.truncf %64 : vector<128x256xf32> to vector<128x256xbf16>
    %75 = arith.subf %74, %0 : vector<128x256xbf16>
    %cst_52 = arith.constant 2.400000e+01 : bf16
    %76 = vector.broadcast %cst_52 : bf16 to vector<128x256xbf16>
    %77 = arith.mulf %76, %0 : vector<128x256xbf16>
    %cst_53 = arith.constant 1.000000e+00 : bf16
    %78 = vector.broadcast %cst_53 : bf16 to vector<128x256xbf16>
    %79 = arith.addf %78, %77 : vector<128x256xbf16>
    %80 = arith.mulf %75, %75 : vector<128x256xbf16>
    %81 = arith.mulf %80, %79 : vector<128x256xbf16>
    %82 = arith.extf %81 : vector<128x256xbf16> to vector<128x256xf32>
    %cst_54 = arith.constant dense<0.000000e+00> : vector<128xf32>
    %83 = vector.multi_reduction <add>, %82, %cst_54 [1] : vector<128x256xf32> to vector<128xf32>
    %84 = vector.shape_cast %83 : vector<128xf32> to vector<128x1xf32>
    %cst_55 = arith.constant 5.000000e-01 : f32
    %85 = vector.broadcast %cst_55 : f32 to vector<128x1xf32>
    %86 = arith.mulf %84, %85 : vector<128x1xf32>
    %87 = arith.truncf %73 : vector<128x64xf32> to vector<128x64xbf16>
    %88 = arith.subf %87, %2 : vector<128x64xbf16>
    %89 = arith.mulf %88, %88 : vector<128x64xbf16>
    %90 = arith.extf %89 : vector<128x64xbf16> to vector<128x64xf32>
    %cst_56 = arith.constant dense<0.000000e+00> : vector<128xf32>
    %91 = vector.multi_reduction <add>, %90, %cst_56 [1] : vector<128x64xf32> to vector<128xf32>
    %92 = vector.shape_cast %91 : vector<128xf32> to vector<128x1xf32>
    %cst_57 = arith.constant 8.000000e-01 : f32
    %93 = vector.broadcast %cst_57 : f32 to vector<128x1xf32>
    %94 = arith.mulf %92, %93 : vector<128x1xf32>
    %95 = arith.addf %86, %94 : vector<128x1xf32>
    %c0_58 = arith.constant 0 : index
    %c0_59 = arith.constant 0 : index
    %96 = vector.load %arg20[%c0_58, %c0_59] : memref<128x1xf32, #tpu.memory_space<vmem>>, vector<128x1xf32>
    tpu.vector_store %arg20[%c0_58, %c0_59], %95 {strides = array<i32>} : memref<128x1xf32, #tpu.memory_space<vmem>>, vector<128x1xf32>,
    return
  }
  func.func @transform_0(%arg0: i32) -> (i32, i32) {
    %c0_i32 = arith.constant 0 : i32
    %c0_i32_0 = arith.constant 0 : i32
    return %arg0, %c0_i32 : i32, i32
  }
  func.func @transform_1(%arg0: i32) -> (i32, i32) {
    %c0_i32 = arith.constant 0 : i32
    %c0_i32_0 = arith.constant 0 : i32
    return %arg0, %c0_i32 : i32, i32
  }
  func.func @transform_2(%arg0: i32) -> (i32, i32) {
    %c0_i32 = arith.constant 0 : i32
    %c0_i32_0 = arith.constant 0 : i32
    %c0_i32_1 = arith.constant 0 : i32
    return %c0_i32, %c0_i32_0 : i32, i32
  }
  func.func @transform_3(%arg0: i32) -> (i32, i32) {
    %c0_i32 = arith.constant 0 : i32
    %c0_i32_0 = arith.constant 0 : i32
    %c0_i32_1 = arith.constant 0 : i32
    return %c0_i32, %c0_i32_0 : i32, i32
  }
  func.func @transform_4(%arg0: i32) -> (i32, i32) {
    %c0_i32 = arith.constant 0 : i32
    %c0_i32_0 = arith.constant 0 : i32
    %c0_i32_1 = arith.constant 0 : i32
    return %c0_i32, %c0_i32_0 : i32, i32
  }
  func.func @transform_5(%arg0: i32) -> (i32, i32) {
    %c0_i32 = arith.constant 0 : i32
    %c0_i32_0 = arith.constant 0 : i32
    %c0_i32_1 = arith.constant 0 : i32
    return %c0_i32, %c0_i32_0 : i32, i32
  }
  func.func @transform_6(%arg0: i32) -> (i32, i32) {
    %c0_i32 = arith.constant 0 : i32
    %c0_i32_0 = arith.constant 0 : i32
    %c0_i32_1 = arith.constant 0 : i32
    return %c0_i32, %c0_i32_0 : i32, i32
  }
  func.func @transform_7(%arg0: i32) -> (i32, i32) {
    %c0_i32 = arith.constant 0 : i32
    %c0_i32_0 = arith.constant 0 : i32
    %c0_i32_1 = arith.constant 0 : i32
    return %c0_i32, %c0_i32_0 : i32, i32
  }
  func.func @transform_8(%arg0: i32) -> (i32, i32) {
    %c0_i32 = arith.constant 0 : i32
    %c0_i32_0 = arith.constant 0 : i32
    %c0_i32_1 = arith.constant 0 : i32
    return %c0_i32, %c0_i32_0 : i32, i32
  }
  func.func @transform_9(%arg0: i32) -> (i32, i32) {
    %c0_i32 = arith.constant 0 : i32
    %c0_i32_0 = arith.constant 0 : i32
    %c0_i32_1 = arith.constant 0 : i32
    return %c0_i32, %c0_i32_0 : i32, i32
  }
  func.func @transform_10(%arg0: i32) -> (i32, i32) {
    %c0_i32 = arith.constant 0 : i32
    %c0_i32_0 = arith.constant 0 : i32
    %c0_i32_1 = arith.constant 0 : i32
    return %c0_i32, %c0_i32_0 : i32, i32
  }
  func.func @transform_11(%arg0: i32) -> (i32, i32) {
    %c0_i32 = arith.constant 0 : i32
    %c0_i32_0 = arith.constant 0 : i32
    %c0_i32_1 = arith.constant 0 : i32
    return %c0_i32, %c0_i32_0 : i32, i32
  }
  func.func @transform_12(%arg0: i32) -> (i32, i32) {
    %c0_i32 = arith.constant 0 : i32
    %c0_i32_0 = arith.constant 0 : i32
    %c0_i32_1 = arith.constant 0 : i32
    return %c0_i32, %c0_i32_0 : i32, i32
  }
  func.func @transform_13(%arg0: i32) -> (i32, i32) {
    %c0_i32 = arith.constant 0 : i32
    %c0_i32_0 = arith.constant 0 : i32
    %c0_i32_1 = arith.constant 0 : i32
    return %c0_i32, %c0_i32_0 : i32, i32
  }
  func.func @transform_14(%arg0: i32) -> (i32, i32) {
    %c0_i32 = arith.constant 0 : i32
    %c0_i32_0 = arith.constant 0 : i32
    %c0_i32_1 = arith.constant 0 : i32
    return %c0_i32, %c0_i32_0 : i32, i32
  }
  func.func @transform_15(%arg0: i32) -> (i32, i32) {
    %c0_i32 = arith.constant 0 : i32
    %c0_i32_0 = arith.constant 0 : i32
    %c0_i32_1 = arith.constant 0 : i32
    return %c0_i32, %c0_i32_0 : i32, i32
  }
  func.func @transform_16(%arg0: i32) -> (i32, i32) {
    %c0_i32 = arith.constant 0 : i32
    %c0_i32_0 = arith.constant 0 : i32
    %c0_i32_1 = arith.constant 0 : i32
    return %c0_i32, %c0_i32_0 : i32, i32
  }
  func.func @transform_17(%arg0: i32) -> (i32, i32) {
    %c0_i32 = arith.constant 0 : i32
    %c0_i32_0 = arith.constant 0 : i32
    %c0_i32_1 = arith.constant 0 : i32
    return %c0_i32, %c0_i32_0 : i32, i32
  }
  func.func @transform_18(%arg0: i32) -> (i32, i32) {
    %c0_i32 = arith.constant 0 : i32
    %c0_i32_0 = arith.constant 0 : i32
    return %arg0, %c0_i32 : i32, i32
  }
  func.func @transform_19(%arg0: i32) -> (i32, i32) {
    %c0_i32 = arith.constant 0 : i32
    %c0_i32_0 = arith.constant 0 : i32
    return %arg0, %c0_i32 : i32, i32
  }
}

</mosaic_0001>

<bundles_post_ra>
// kernel: tpu_custom_call.1
= control target key start
LH: loop header
LB: loop body
LE: loop exit
PB: predicated region body
PF: predicated region fallthrough
CT: control target
= control target key end

     0   :  { %s4423_s0 = inlined_call_operand.vmem [shape: bf16[256,256], index: 0, kind: input, shape index: {}]   ;;  %s4424_s1 = inlined_call_operand.vmem [shape: f32[256,64], index: 1, kind: input, shape index: {}]   ;;  %s4425_s2 = inlined_call_operand.vmem [shape: bf16[256,32], index: 2, kind: input, shape index: {}]   ;;  %s4426_s3 = inlined_call_operand.vmem [shape: f32[1,32], index: 3, kind: input, shape index: {}]   ;;  %s4427_s4 = inlined_call_operand.vmem [shape: bf16[64,32], index: 4, kind: input, shape index: {}]   ;;  %s4428_s5 = inlined_call_operand.vmem [shape: f32[1,32], index: 5, kind: input, shape index: {}]   ;;  %s4429_s6 = inlined_call_operand.vmem [shape: bf16[32,32], index: 6, kind: input, shape index: {}]   ;;  %s4430_s7 = inlined_call_operand.vmem [shape: f32[1,32], index: 7, kind: input, shape index: {}]   ;;  %s4431_s8 = inlined_call_operand.vmem [shape: bf16[32,32], index: 8, kind: input, shape index: {}]   ;;  %s4432_s9 = inlined_call_operand.vmem [shape: f32[1,32], index: 9, kind: input, shape index: {}]   ;;  %s4433_s10 = inlined_call_operand.vmem [shape: bf16[32,32], index: 10, kind: input, shape index: {}]   ;;  %s4434_s11 = inlined_call_operand.vmem [shape: f32[1,32], index: 11, kind: input, shape index: {}]   ;;  %s4435_s12 = inlined_call_operand.vmem [shape: bf16[32,32], index: 12, kind: input, shape index: {}]   ;;  %s4436_s13 = inlined_call_operand.vmem [shape: f32[1,32], index: 13, kind: input, shape index: {}]   ;;  %s4437_s14 = inlined_call_operand.vmem [shape: bf16[32,256], index: 14, kind: input, shape index: {}]   ;;  %s4438_s15 = inlined_call_operand.vmem [shape: f32[1,256], index: 15, kind: input, shape index: {}]   ;;  %s4439_s16 = inlined_call_operand.vmem [shape: bf16[32,64], index: 16, kind: input, shape index: {}]   ;;  %s4440_s17 = inlined_call_operand.vmem [shape: f32[1,64], index: 17, kind: input, shape index: {}]   ;;  %s4441_s18 = inlined_call_operand.vmem [shape: f32[256,32], index: 18, kind: output, shape index: {0}]   ;;  %s4442_s19 = inlined_call_operand.vmem [shape: f32[256,1], index: 19, kind: output, shape index: {1}]  }
   0x1   :  { %4447 = sst [smem:[#allocation2_spill]] %s4423_s0  ;;  %s3448_s0 = smov 0  }
   0x2   :  { %4448 = sst [smem:[#allocation3_spill]] %s4424_s1 }
   0x3   :  { %4449 = sst [smem:[#allocation4_spill]] %s4425_s2 }
   0x4   :  { %4450 = sst [smem:[#allocation5_spill]] %s4426_s3 }
   0x5 LB: > { %s2987_s30 = sadd.s32 4294967295, %s3346_s0   ;;  %p2991_p0 = scmp.ge.s32.totalorder %s3346_s0, 1  ;;  %s3346_s0 = sphi %s3448_s0, %s30_s0  }
   0x6   : > { %p553_p1 = scmp.lt.s32.totalorder %s3346_s0, 3 }
   0x8   : > { %p554_p2 = pnand %p2991_p0, %p553_p1 }
   0x9   : > { %s4451_s1 = sld [smem:[#allocation4_spill]] (!%p554_p2)  ;;  %s2992_s22 = sshll.u32 (!%p554_p2), %s2987_s30, 4 }
   0xa   : > { %557 = sbr.rel (%p554_p2) target bundleno = 1078 (0x436), region = 92  ;;  %p621_p3 = scmp.lt.s32.totalorder (!%p554_p2), %s2992_s22, 31 }
   0xb   : > { %s4452_s28 = sld [smem:[#allocation2_spill]] (!%p554_p2) }
   0xc   : > { %s4453_s24 = sld [smem:[#allocation3_spill]] (!%p554_p2) }
   0xd   : > { %s4454_s27 = sld [smem:[#allocation5_spill]] (!%p554_p2) }
   0xf   : > { %v3291_v0 = vld [vmem:[%s4451_s1 + $0x38] sm:$0xff]  ;;  %v3290_v2 = vld [vmem:[%s4451_s1 + $0x30] sm:$0xff]  ;;  %v3289_v4 = vld [vmem:[%s4451_s1 + $0x28] sm:$0xff]  ;;  %s4461_s22 = smov (!%p621_p3, %s2992_s22), 31  ;;  %vm1112_vm0 = vcmask 523264   ;;  %vm1246_vm1 = vcmask 261120  }
  0x10   : > { %v3299_v1 = vld [vmem:[%s4451_s1 + $0x78] sm:$0xff]  ;;  %906 = vmatpush.bf16.msra.mxu0 %v3291_v0  ;;  %v3298_v3 = vld [vmem:[%s4451_s1 + $0x70] sm:$0xff]  ;;  %v3297_v5 = vld [vmem:[%s4451_s1 + $0x68] sm:$0xff]  ;;  %s3495_s2 = sshll.u32 %s4461_s22, 3  ;;  %vm2868_vm2 = vcmask 7168  }
  0x11   : > { %955 = vmatpush.bf16.msra.mxu1 %v3299_v1  ;;  %v3303_v6 = vld [vmem:[%s4427_s4 + $0x18] sm:$0xff]  ;;  %v3288_v7 = vld [vmem:[%s4451_s1 + $0x20] sm:$0xff]  ;;  %v3286_v11 = vld [vmem:[%s4451_s1 + $0x10] sm:$0xff]  ;;  %s3507_s30 = scalar_lea.vmem %s4452_s28, %s3495_s2  ;;  %s3753_s26 = scalar_lea.vmem %s4441_s18, %s3495_s2 }
  0x12   : > { %3318 = vmatpush.bf16.msra.mxu2 %v3303_v6  ;;  %v3296_v8 = vld [vmem:[%s4451_s1 + $0x60] sm:$0xff]  ;;  %v3287_v9 = vld [vmem:[%s4451_s1 + $0x18] sm:$0xff]  ;;  %v3294_v12 = vld [vmem:[%s4451_s1 + $0x50] sm:$0xff]  ;;  %s3566_s25 = scalar_lea.vmem %s4453_s24, %s3495_s2 }
  0x13   : > { %v3295_v10 = vld [vmem:[%s4451_s1 + $0x58] sm:$0xff]  ;;  %v3285_v13 = vld [vmem:[%s4451_s1 + $0x8] sm:$0xff]  ;;  %v3284_v15 = vld [vmem:[%s4451_s1] sm:$0xff] }
  0x14   : > { %907 = vmatpush.bf16.msra.mxu0 %v3290_v2  ;;  %v3293_v14 = vld [vmem:[%s4451_s1 + $0x48] sm:$0xff]  ;;  %v3292_v16 = vld [vmem:[%s4451_s1 + $0x40] sm:$0xff]  ;;  %v3302_v23 = vld [vmem:[%s4427_s4 + $0x10] sm:$0xff] }
  0x15   : > { %956 = vmatpush.bf16.msra.mxu1 %v3298_v3  ;;  %v3003_v17 = vld [vmem:[%s3507_s30] sm:$0xf]  ;;  %v3269_v18 = vld [vmem:[%s3507_s30 + $0x4] sm:$0xf0]  ;;  %v3268_v19 = vld [vmem:[%s3507_s30 + $0x4] sm:$0xf] }
  0x16   : > { %v3005_v20 = vld [vmem:[%s3507_s30 + $0x8] sm:$0xf0]  ;;  %v3004_v21 = vor.u32 %v3269_v18, %v3003_v17  ;;  %3319 = vmatpush.bf16.msra.mxu2 %v3302_v23  ;;  %v3011_v24 = vld [vmem:[%s3507_s30 + $0x10] sm:$0xf]  ;;  %v3271_v25 = vld [vmem:[%s3507_s30 + $0x14] sm:$0xf0] }
  0x17   : > { %v3008_v22 = vor.u32 %v3268_v19, %v3005_v20  ;;  %v3270_v26 = vld [vmem:[%s3507_s30 + $0x14] sm:$0xf]  ;;  %v3013_v27 = vld [vmem:[%s3507_s30 + $0x18] sm:$0xf0]  ;;  %v3012_v28 = vor.u32 %v3271_v25, %v3011_v24  ;;  %v3019_v30 = vld [vmem:[%s3507_s30 + $0x20] sm:$0xf] }
  0x18   : > { %908 = vmatpush.bf16.msra.mxu0 %v3289_v4  ;;  %v3016_v29 = vor.u32 %v3270_v26, %v3013_v27  ;;  %v3273_v31 = vld [vmem:[%s3507_s30 + $0x24] sm:$0xf0]  ;;  %v3272_v32 = vld [vmem:[%s3507_s30 + $0x24] sm:$0xf]  ;;  %v3021_v33 = vld [vmem:[%s3507_s30 + $0x28] sm:$0xf0] }
  0x19   : > { %957 = vmatpush.bf16.msra.mxu1 %v3297_v5  ;;  %v3020_v34 = vor.u32 %v3273_v31, %v3019_v30  ;;  %v3024_v35 = vor.u32 %v3272_v32, %v3021_v33  ;;  %v3301_v36 = vld [vmem:[%s4427_s4 + $0x8] sm:$0xff]  ;;  %v3027_v37 = vld [vmem:[%s3507_s30 + $0x30] sm:$0xf]  ;;  %v3275_v38 = vld [vmem:[%s3507_s30 + $0x34] sm:$0xf0] }
  0x1a   : > { %3320 = vmatpush.bf16.msra.mxu2 %v3301_v36  ;;  %v3274_v39 = vld [vmem:[%s3507_s30 + $0x34] sm:$0xf]  ;;  %v3029_v40 = vld [vmem:[%s3507_s30 + $0x38] sm:$0xf0]  ;;  %v3028_v41 = vor.u32 %v3275_v38, %v3027_v37  ;;  %v3035_v43 = vld [vmem:[%s3507_s30 + $0x40] sm:$0xf] }
  0x1b   : > { %v3032_v42 = vor.u32 %v3274_v39, %v3029_v40  ;;  %v3277_v44 = vld [vmem:[%s3507_s30 + $0x44] sm:$0xf0]  ;;  %v3276_v45 = vld [vmem:[%s3507_s30 + $0x44] sm:$0xf]  ;;  %v3037_v46 = vld [vmem:[%s3507_s30 + $0x48] sm:$0xf0] }
  0x1c   : > { %909 = vmatpush.bf16.msra.mxu0 %v3288_v7  ;;  %v3036_v47 = vor.u32 %v3277_v44, %v3035_v43  ;;  %v3040_v48 = vor.u32 %v3276_v45, %v3037_v46  ;;  %v3300_v49 = vld [vmem:[%s4427_s4] sm:$0xff]  ;;  %v3043_v50 = vld [vmem:[%s3507_s30 + $0x50] sm:$0xf]  ;;  %v3279_v51 = vld [vmem:[%s3507_s30 + $0x54] sm:$0xf0] }
  0x1d   : > { %958 = vmatpush.bf16.msra.mxu1 %v3296_v8  ;;  %v3278_v52 = vld [vmem:[%s3507_s30 + $0x54] sm:$0xf]  ;;  %v3045_v53 = vld [vmem:[%s3507_s30 + $0x58] sm:$0xf0]  ;;  %v3044_v54 = vor.u32 %v3279_v51, %v3043_v50  ;;  %v3051_v56 = vld [vmem:[%s3507_s30 + $0x60] sm:$0xf] }
  0x1e   : > { %3321 = vmatpush.bf16.msra.mxu2 %v3300_v49  ;;  %v3048_v55 = vor.u32 %v3278_v52, %v3045_v53  ;;  %v3281_v57 = vld [vmem:[%s3507_s30 + $0x64] sm:$0xf0]  ;;  %v3280_v58 = vld [vmem:[%s3507_s30 + $0x64] sm:$0xf]  ;;  %v3053_v59 = vld [vmem:[%s3507_s30 + $0x68] sm:$0xf0] }
  0x1f   : > { %v3052_v60 = vor.u32 %v3281_v57, %v3051_v56  ;;  %v3056_v61 = vor.u32 %v3280_v58, %v3053_v59  ;;  %v3305_v62 = vld [vmem:[%s4429_s6 + $0x8] sm:$0xff]  ;;  %v3059_v63 = vld [vmem:[%s3507_s30 + $0x70] sm:$0xf]  ;;  %v3283_v0 = vld [vmem:[%s3507_s30 + $0x74] sm:$0xf0] }
  0x20   : > { %910 = vmatpush.bf16.msra.mxu0 %v3287_v9  ;;  %v3282_v1 = vld [vmem:[%s3507_s30 + $0x74] sm:$0xf]  ;;  %v3061_v2 = vld [vmem:[%s3507_s30 + $0x78] sm:$0xf0]  ;;  %3322 = vmatpush.bf16.msra.mxu3 %v3305_v62  ;;  %v3304_v3 = vld [vmem:[%s4429_s6] sm:$0xff]  ;;  %v3060_v4 = vor.u32 %v3283_v0, %v3059_v63 }
  0x21   : > { %959 = vmatpush.bf16.msra.mxu1 %v3295_v10  ;;  %v3064_v5 = vor.u32 %v3282_v1, %v3061_v2  ;;  %v663_v7 = vld [vmem:[%s3566_s25 + $0x8] sm:$0xff]  ;;  %v665_v24 = vld [vmem:[%s3566_s25 + $0x18] sm:$0xff]  ;;  %v670_v38 = vld [vmem:[%s3566_s25 + $0x40] sm:$0xff] }
  0x22   : > { %v3572_v9 = vpack.c.bf16 %v663_v7, %v663_v7  ;;  %v3596_v27 = vpack.c.bf16 %v665_v24, %v665_v24  ;;  %v671_v39 = vld [vmem:[%s3566_s25 + $0x48] sm:$0xff]  ;;  %v666_v50 = vld [vmem:[%s3566_s25 + $0x20] sm:$0xff]  ;;  %v672_v1 = vld [vmem:[%s3566_s25 + $0x50] sm:$0xff] }
  0x23   : > { %v3605_v43 = vpack.c.bf16 %v671_v39, %v671_v39  ;;  %v667_v51 = vld [vmem:[%s3566_s25 + $0x28] sm:$0xff]  ;;  %v3615_v53 = vpack.c.bf16 %v666_v50, %v666_v50  ;;  %v673_v2 = vld [vmem:[%s3566_s25 + $0x58] sm:$0xff] }
  0x24   : > { %911 = vmatpush.bf16.msra.mxu0 %v3286_v11  ;;  %3323 = vmatpush.bf16.msra.mxu3 %v3304_v3  ;;  %v1065_v11 = vunpack.c.l.b16 %v3572_v9  ;;  %v1067_v33 = vunpack.c.l.b16 %v3596_v27 }
  0x25   : > { %960 = vmatpush.bf16.msra.mxu1 %v3294_v12  ;;  %v668_v12 = vld [vmem:[%s3566_s25 + $0x30] sm:$0xff]  ;;  %v1068_v59 = vunpack.c.l.b16 %v3615_v53 }
  0x28   : > { %912 = vmatpush.bf16.msra.mxu0 %v3285_v13  ;;  %v669_v13 = vld [vmem:[%s3566_s25 + $0x38] sm:$0xff] }
  0x29   : > { %961 = vmatpush.bf16.msra.mxu1 %v3293_v14  ;;  %v3581_v14 = vld [vmem:[%s4454_s27] ss:$0 sm:$0xff]  ;;  %v3585_v17 = vpack.c.bf16 %v669_v13, %v669_v13  ;;  %s4382_s27 = scalar_lea.vmem %s4442_s19, %s3495_s2 }
  0x2c   : > { %913 = vmatpush.bf16.msra.mxu0 %v3284_v15 }
  0x2d   : > { %962 = vmatpush.bf16.msra.mxu1 %v3292_v16  ;;  %v3583_v16 = vpack.c.bf16 %v668_v12, %v668_v12 }
  0x2f   : > { %914 = vmatmul.bf16.vlgmr.msra.gmra.mxu0 %v3004_v21  ;;  %v1070_v20 = vunpack.c.l.b16 %v3583_v16  ;;  %v1071_v21 = vunpack.c.l.b16 %v3585_v17 }
  0x30   : > { %1141 = vmatpush.bf16.msrb.mxu0 %v3303_v6  ;;  %963 = vmatmul.bf16.vlgmr.msra.gmra.mxu1 %v3008_v22  ;;  %v662_v6 = vld [vmem:[%s3566_s25] sm:$0xff] }
  0x31   : > { %1277 = vmatpush.bf16.msrb.mxu1 %v3305_v62  ;;  %v3570_v8 = vpack.c.bf16 %v662_v6, %v662_v6  ;;  %v1083_v25 = vpack.c.b16 %v1071_v21, %v1070_v20  ;;  %v3626_v6 = vpack.c.bf16 %v673_v2, %v673_v2  ;;  %v3307_v20 = vld [vmem:[%s4431_s8 + $0x8] sm:$0xff] }
  0x32   : > { %1410 = vmatpush.bf16.msrb.mxu3 %v3307_v20 }
  0x33   : > { %v1064_v10 = vunpack.c.l.b16 %v3570_v8  ;;  %3148 = vmatmul.msk.bf16.vlgmr.msra.gmra.mxu2 %vm1112_vm0, %v1083_v25  ;;  %v1075_v13 = vunpack.c.l.b16 %v3626_v6 }
  0x34   : > { %1142 = vmatpush.bf16.msrb.mxu0 %v3302_v23  ;;  %v664_v23 = vld [vmem:[%s3566_s25 + $0x10] sm:$0xff] }
  0x35   : > { %1278 = vmatpush.bf16.msrb.mxu1 %v3304_v3  ;;  %v1080_v15 = vpack.c.b16 %v1065_v11, %v1064_v10  ;;  %v3594_v26 = vpack.c.bf16 %v664_v23, %v664_v23 }
  0x37   : > { %v1066_v32 = vunpack.c.l.b16 %v3594_v26 }
  0x38   : > { %1143 = vmatpush.bf16.msrb.mxu0 %v3301_v36 }
  0x39   : > { %v1081_v37 = vpack.c.b16 %v1067_v33, %v1066_v32 }
  0x3c   : > { %1144 = vmatpush.bf16.msrb.mxu0 %v3300_v49 }
  0x3f   : > { %919 = vmatmul.bf16.gmra.mxu0 %v3012_v28 }
  0x40   : > { %968 = vmatmul.bf16.gmra.mxu1 %v3016_v29 }
  0x4f   : > { %924 = vmatmul.bf16.gmra.mxu0 %v3020_v34 }
  0x50   : > { %973 = vmatmul.bf16.gmra.mxu1 %v3024_v35 }
  0x5f   : > { %929 = vmatmul.bf16.gmra.mxu0 %v3028_v41 }
  0x60   : > { %978 = vmatmul.bf16.gmra.mxu1 %v3032_v42  ;;  %v3603_v42 = vpack.c.bf16 %v670_v38, %v670_v38 }
  0x6f   : > { %934 = vmatmul.bf16.gmra.mxu0 %v3036_v47  ;;  %v1072_v47 = vunpack.c.l.b16 %v3603_v42 }
  0x70   : > { %983 = vmatmul.bf16.gmra.mxu1 %v3040_v48  ;;  %v1073_v48 = vunpack.c.l.b16 %v3605_v43 }
  0x72   : > { %v1084_v52 = vpack.c.b16 %v1073_v48, %v1072_v47 }
  0x74   : > { %3149 = vmatmul.msk.bf16.gmra.mxu2 %vm1112_vm0, %v1084_v52  ;;  %v677_v52 = vld [vmem:[%s3566_s25 + $0x78] sm:$0xff] }
  0x7f   : > { %939 = vmatmul.bf16.gmra.mxu0 %v3044_v54  ;;  %v3617_v54 = vpack.c.bf16 %v667_v51, %v667_v51  ;;  %v676_v51 = vld [vmem:[%s3566_s25 + $0x70] sm:$0xff] }
  0x80   : > { %988 = vmatmul.bf16.gmra.mxu1 %v3048_v55 }
  0x8f   : > { %944 = vmatmul.bf16.gmra.mxu0 %v3052_v60  ;;  %v1069_v60 = vunpack.c.l.b16 %v3617_v54 }
  0x90   : > { %993 = vmatmul.bf16.gmra.mxu1 %v3056_v61 }
  0x91   : > { %v1082_v0 = vpack.c.b16 %v1069_v60, %v1068_v59 }
  0x9f   : > { %949 = vmatmul.bf16.gmra.mxu0 %v3060_v4 }
  0xa0   : > { %998 = vmatmul.bf16.gmra.mxu1 %v3064_v5  ;;  %v3624_v5 = vpack.c.bf16 %v672_v1, %v672_v1 }
  0xa2   : > { %v1074_v12 = vunpack.c.l.b16 %v3624_v5 }
  0xac   : > { %v915_v18 = vpop.f32.mrf.mxu0 }
  0xad   : > { %v964_v19 = vpop.f32.mrf.mxu1  ;;  %v916_v22 = vadd.f32 %v3581_v14, %v915_v18  ;;  %v1085_v18 = vpack.c.b16 %v1075_v13, %v1074_v12 }
  0xaf   : > { %3145 = vmatmul.msk.bf16.vlgmr.msrb.gmra.mxu0 %vm1112_vm0, %v1080_v15  ;;  %v965_v28 = vadd.f32 %v964_v19, %v916_v22  ;;  %3150 = vmatmul.msk.bf16.gmra.mxu2 %vm1112_vm0, %v1085_v18  ;;  %v3306_v18 = vld [vmem:[%s4431_s8] sm:$0xff] }
  0xb0   : > { %1411 = vmatpush.bf16.msrb.mxu3 %v3306_v18 }
  0xb1   : > { %v1004_v34 = vmul.f32 0.01, %v965_v28 }
  0xb3   : > { %v1020_v40 = vmax.f32 %v965_v28, %v1004_v34 }
  0xb4   : > { %v917_v29 = vpop.f32.mrf.mxu0 }
  0xb5   : > { %v966_v30 = vpop.f32.mrf.mxu1  ;;  %v918_v31 = vadd.f32 %v3581_v14, %v917_v29  ;;  %v674_v29 = vld [vmem:[%s3566_s25 + $0x60] sm:$0xff] }
  0xb6   : > { %v3640_v33 = vpack.c.bf16 %v674_v29, %v674_v29 }
  0xb7   : > { %v967_v35 = vadd.f32 %v966_v30, %v918_v31  ;;  %v675_v30 = vld [vmem:[%s3566_s25 + $0x68] sm:$0xff] }
  0xb8   : > { %v3642_v34 = vpack.c.bf16 %v675_v30, %v675_v30  ;;  %v1076_v38 = vunpack.c.l.b16 %v3640_v33 }
  0xb9   : > { %v1005_v36 = vmul.f32 0.01, %v967_v35 }
  0xba   : > { %v1077_v39 = vunpack.c.l.b16 %v3642_v34 }
  0xbb   : > { %v1021_v41 = vmax.f32 %v967_v35, %v1005_v36 }
  0xbc   : > { %v920_v44 = vpop.f32.mrf.mxu0 }
  0xbd   : > { %v969_v45 = vpop.f32.mrf.mxu1  ;;  %v1218_v46 = vpack.c.bf16 %v1021_v41, %v1020_v40  ;;  %v921_v49 = vadd.f32 %v3581_v14, %v920_v44  ;;  %v1086_v41 = vpack.c.b16 %v1077_v39, %v1076_v38 }
  0xbf   : > { %3146 = vmatmul.msk.bf16.gmra.mxu0 %vm1112_vm0, %v1081_v37  ;;  %3161 = vmatmul.msk.bf16.vlgmr.msrb.gmra.mxu1 %vm1246_vm1, %v1218_v46  ;;  %v970_v55 = vadd.f32 %v969_v45, %v921_v49 }
  0xc0   : > { %3151 = vmatmul.msk.bf16.gmra.mxu2 %vm1112_vm0, %v1086_v41 }
  0xc1   : > { %v1006_v61 = vmul.f32 0.01, %v970_v55 }
  0xc3   : > { %v1022_v3 = vmax.f32 %v970_v55, %v1006_v61 }
  0xc4   : > { %v922_v56 = vpop.f32.mrf.mxu0 }
  0xc5   : > { %v971_v57 = vpop.f32.mrf.mxu1  ;;  %v923_v58 = vadd.f32 %v3581_v14, %v922_v56 }
  0xc7   : > { %v972_v62 = vadd.f32 %v971_v57, %v923_v58  ;;  %v3652_v57 = vpack.c.bf16 %v676_v51, %v676_v51  ;;  %v3654_v58 = vpack.c.bf16 %v677_v52, %v677_v52 }
  0xc9   : > { %v1007_v63 = vmul.f32 0.01, %v972_v62 }
  0xcb   : > { %v1023_v4 = vmax.f32 %v972_v62, %v1007_v63  ;;  %v1078_v62 = vunpack.c.l.b16 %v3652_v57  ;;  %v1079_v63 = vunpack.c.l.b16 %v3654_v58 }
  0xcc   : > { %v925_v7 = vpop.f32.mrf.mxu0 }
  0xcd   : > { %v974_v10 = vpop.f32.mrf.mxu1  ;;  %v1219_v11 = vpack.c.bf16 %v1023_v4, %v1022_v3  ;;  %v926_v15 = vadd.f32 %v3581_v14, %v925_v7  ;;  %v1087_v1 = vpack.c.b16 %v1079_v63, %v1078_v62 }
  0xcf   : > { %3147 = vmatmul.msk.bf16.gmra.mxu0 %vm1112_vm0, %v1082_v0  ;;  %3162 = vmatmul.msk.bf16.gmra.mxu1 %vm1246_vm1, %v1219_v11  ;;  %v975_v19 = vadd.f32 %v974_v10, %v926_v15 }
  0xd0   : > { %3152 = vmatmul.msk.bf16.gmra.mxu2 %vm1112_vm0, %v1087_v1 }
  0xd1   : > { %v1008_v24 = vmul.f32 0.01, %v975_v19 }
  0xd3   : > { %v1024_v31 = vmax.f32 %v975_v19, %v1008_v24 }
  0xd4   : > { %v927_v21 = vpop.f32.mrf.mxu0 }
  0xd5   : > { %v976_v22 = vpop.f32.mrf.mxu1  ;;  %v928_v23 = vadd.f32 %v3581_v14, %v927_v21 }
  0xd7   : > { %v977_v25 = vadd.f32 %v976_v22, %v928_v23 }
  0xd9   : > { %v1009_v28 = vmul.f32 0.01, %v977_v25 }
  0xdb   : > { %v1025_v32 = vmax.f32 %v977_v25, %v1009_v28 }
  0xdc   : > { %v930_v35 = vpop.f32.mrf.mxu0 }
  0xdd   : > { %v979_v36 = vpop.f32.mrf.mxu1  ;;  %v1220_v37 = vpack.c.bf16 %v1025_v32, %v1024_v31  ;;  %v931_v40 = vadd.f32 %v3581_v14, %v930_v35 }
  0xdf   : > { %3163 = vmatmul.msk.bf16.gmra.mxu1 %vm1246_vm1, %v1220_v37  ;;  %v980_v44 = vadd.f32 %v979_v36, %v931_v40 }
  0xe1   : > { %v1010_v48 = vmul.f32 0.01, %v980_v44 }
  0xe3   : > { %v1026_v55 = vmax.f32 %v980_v44, %v1010_v48 }
  0xe4   : > { %v932_v45 = vpop.f32.mrf.mxu0 }
  0xe5   : > { %v981_v46 = vpop.f32.mrf.mxu1  ;;  %v933_v47 = vadd.f32 %v3581_v14, %v932_v45 }
  0xe7   : > { %v982_v49 = vadd.f32 %v981_v46, %v933_v47 }
  0xe9   : > { %v1011_v50 = vmul.f32 0.01, %v982_v49 }
  0xeb   : > { %v1027_v56 = vmax.f32 %v982_v49, %v1011_v50 }
  0xec   : > { %v935_v59 = vpop.f32.mrf.mxu0 }
  0xed   : > { %v984_v60 = vpop.f32.mrf.mxu1  ;;  %v1221_v61 = vpack.c.bf16 %v1027_v56, %v1026_v55  ;;  %v936_v0 = vadd.f32 %v3581_v14, %v935_v59 }
  0xef   : > { %3164 = vmatmul.msk.bf16.vlgmr.msra.gmra.mxu3 %vm1246_vm1, %v1221_v61  ;;  %v985_v2 = vadd.f32 %v984_v60, %v936_v0 }
  0xf1   : > { %v1012_v10 = vmul.f32 0.01, %v985_v2 }
  0xf3   : > { %v1028_v13 = vmax.f32 %v985_v2, %v1012_v10  ;;  %v3677_v10 = vld [vmem:[%s4428_s5] ss:$0 sm:$0xff] }
  0xf4   : > { %v937_v3 = vpop.f32.mrf.mxu0 }
  0xf5   : > { %v986_v4 = vpop.f32.mrf.mxu1  ;;  %v938_v7 = vadd.f32 %v3581_v14, %v937_v3 }
  0xf7   : > { %v987_v11 = vadd.f32 %v986_v4, %v938_v7 }
  0xf9   : > { %v1013_v12 = vmul.f32 0.01, %v987_v11 }
  0xfb   : > { %v1029_v15 = vmax.f32 %v987_v11, %v1013_v12 }
  0xfc   : > { %v940_v19 = vpop.f32.mrf.mxu0 }
  0xfd   : > { %v989_v20 = vpop.f32.mrf.mxu1  ;;  %v1222_v21 = vpack.c.bf16 %v1029_v15, %v1028_v13  ;;  %v941_v22 = vadd.f32 %v3581_v14, %v940_v19 }
  0xff   : > { %3165 = vmatmul.msk.bf16.gmra.mxu3 %vm1246_vm1, %v1222_v21  ;;  %v990_v23 = vadd.f32 %v989_v20, %v941_v22 }
 0x101   : > { %v1014_v29 = vmul.f32 0.01, %v990_v23 }
 0x103   : > { %v1030_v32 = vmax.f32 %v990_v23, %v1014_v29 }
 0x104   : > { %v942_v24 = vpop.f32.mrf.mxu0 }
 0x105   : > { %v991_v25 = vpop.f32.mrf.mxu1  ;;  %v943_v28 = vadd.f32 %v3581_v14, %v942_v24  ;;  %v1161_v24 = vpop.f32.mrf.mxu2 }
 0x107   : > { %v992_v30 = vadd.f32 %v991_v25, %v943_v28 }
 0x109   : > { %v1015_v31 = vmul.f32 0.01, %v992_v30 }
 0x10b   : > { %v1031_v35 = vmax.f32 %v992_v30, %v1015_v31 }
 0x10c   : > { %v945_v36 = vpop.f32.mrf.mxu0 }
 0x10d   : > { %v994_v37 = vpop.f32.mrf.mxu1  ;;  %v1223_v38 = vpack.c.bf16 %v1031_v35, %v1030_v32  ;;  %v946_v39 = vadd.f32 %v3581_v14, %v945_v36  ;;  %v1163_v36 = vpop.f32.mrf.mxu2 }
 0x10f   : > { %3166 = vmatmul.msk.bf16.gmra.mxu3 %vm1246_vm1, %v1223_v38  ;;  %v995_v40 = vadd.f32 %v994_v37, %v946_v39 }
 0x111   : > { %v1016_v46 = vmul.f32 0.01, %v995_v40 }
 0x113   : > { %v1032_v49 = vmax.f32 %v995_v40, %v1016_v46 }
 0x114   : > { %v947_v41 = vpop.f32.mrf.mxu0 }
 0x115   : > { %v996_v44 = vpop.f32.mrf.mxu1  ;;  %v948_v45 = vadd.f32 %v3581_v14, %v947_v41 }
 0x117   : > { %v997_v47 = vadd.f32 %v996_v44, %v948_v45  ;;  %v1166_v44 = vpop.f32.mrf.mxu2 }
 0x119   : > { %v1017_v48 = vmul.f32 0.01, %v997_v47 }
 0x11b   : > { %v1033_v50 = vmax.f32 %v997_v47, %v1017_v48  ;;  %v1162_v48 = vadd.f32 %v3677_v10, %v1161_v24 }
 0x11c   : > { %v950_v51 = vpop.f32.mrf.mxu0 }
 0x11d   : > { %v999_v52 = vpop.f32.mrf.mxu1  ;;  %v1224_v55 = vpack.c.bf16 %v1033_v50, %v1032_v49  ;;  %v951_v56 = vadd.f32 %v3581_v14, %v950_v51  ;;  %v1164_v49 = vadd.f32 %v3677_v10, %v1163_v36  ;;  %v1192_v51 = vmul.f32 0.01, %v1162_v48 }
 0x11f   : > { %3167 = vmatmul.msk.bf16.gmra.mxu3 %vm1246_vm1, %v1224_v55  ;;  %v1000_v59 = vadd.f32 %v999_v52, %v951_v56  ;;  %v1168_v50 = vpop.f32.mrf.mxu2  ;;  %v1193_v52 = vmul.f32 0.01, %v1164_v49  ;;  %v3309_v55 = vld [vmem:[%s4433_s10 + $0x8] sm:$0xff]  ;;  %v1208_v56 = vmax.f32 %v1162_v48, %v1192_v51 }
 0x120   : > { %1575 = vmatpush.bf16.msrb.mxu2 %v3309_v55 }
 0x121   : > { %v1018_v63 = vmul.f32 0.01, %v1000_v59 }
 0x123   : > { %v1034_v2 = vmax.f32 %v1000_v59, %v1018_v63  ;;  %v1209_v59 = vmax.f32 %v1164_v49, %v1193_v52  ;;  %v1169_v63 = vadd.f32 %v3677_v10, %v1168_v50 }
 0x124   : > { %v952_v60 = vpop.f32.mrf.mxu0 }
 0x125   : > { %v953_v61 = vadd.f32 %v3581_v14, %v952_v60  ;;  %v1001_v62 = vpop.f32.mrf.mxu1 }
 0x127   : > { %v1002_v0 = vadd.f32 %v1001_v62, %v953_v61  ;;  %v1355_v61 = vpack.c.bf16 %v1209_v59, %v1208_v56  ;;  %v1167_v62 = vadd.f32 %v3677_v10, %v1166_v44  ;;  %v3311_v44 = vld [vmem:[%s4435_s12 + $0x8] sm:$0xff]  ;;  %v3310_v56 = vld [vmem:[%s4435_s12] sm:$0xff] }
 0x128   : > { %1676 = vmatpush.bf16.msra.mxu0 %v3311_v44 }
 0x129   : > { %v1019_v1 = vmul.f32 0.01, %v1002_v0 }
 0x12b   : > { %v1035_v3 = vmax.f32 %v1002_v0, %v1019_v1  ;;  %v1194_v1 = vmul.f32 0.01, %v1167_v62 }
 0x12c   : > { %v1146_v4 = vpop.f32.mrf.mxu0  ;;  %1677 = vmatpush.bf16.msra.mxu0 %v3310_v56 }
 0x12d   : > { %v1225_v7 = vpack.c.bf16 %v1035_v3, %v1034_v2  ;;  %v1147_v11 = vadd.f32 %v3677_v10, %v1146_v4  ;;  %v1195_v2 = vmul.f32 0.01, %v1169_v63  ;;  %v1210_v4 = vmax.f32 %v1167_v62, %v1194_v1  ;;  %v3745_v1 = vld [vmem:[%s4432_s9] ss:$0 sm:$0xff] }
 0x12f   : > { %3168 = vmatmul.msk.bf16.gmra.mxu3 %vm1246_vm1, %v1225_v7  ;;  %v1186_v13 = vmul.f32 0.01, %v1147_v11  ;;  %v1211_v7 = vmax.f32 %v1169_v63, %v1195_v2 }
 0x131   : > { %v1202_v19 = vmax.f32 %v1147_v11, %v1186_v13 }
 0x132   : > { %v1171_v60 = vpop.f32.mrf.mxu2 }
 0x133   : > { %v1172_v13 = vadd.f32 %v3677_v10, %v1171_v60 }
 0x134   : > { %v1148_v12 = vpop.f32.mrf.mxu0 }
 0x135   : > { %v1149_v14 = vadd.f32 %v3677_v10, %v1148_v12  ;;  %v1356_v12 = vpack.c.bf16 %v1211_v7, %v1210_v4 }
 0x137   : > { %v1187_v15 = vmul.f32 0.01, %v1149_v14 }
 0x139   : > { %v1203_v18 = vmax.f32 %v1149_v14, %v1187_v15 }
 0x13a   : > { %v1173_v3 = vpop.f32.mrf.mxu2 }
 0x13b   : > { %v1352_v21 = vpack.c.bf16 %v1203_v18, %v1202_v19  ;;  %v1174_v15 = vadd.f32 %v3677_v10, %v1173_v3  ;;  %v1196_v19 = vmul.f32 0.01, %v1172_v13 }
 0x13c   : > { %v1151_v20 = vpop.f32.mrf.mxu0  ;;  %v1280_v59 = vpop.f32.mrf.mxu1 }
 0x13d   : > { %v1152_v22 = vadd.f32 %v3677_v10, %v1151_v20  ;;  %v1197_v20 = vmul.f32 0.01, %v1174_v15 }
 0x13f   : > { %3177 = vmatmul.msk.bf16.vlgmr.msrb.gmra.mxu3 %vm1246_vm1, %v1352_v21  ;;  %v1188_v28 = vmul.f32 0.01, %v1152_v22  ;;  %v1212_v21 = vmax.f32 %v1172_v13, %v1196_v19 }
 0x141   : > { %v1204_v31 = vmax.f32 %v1152_v22, %v1188_v28  ;;  %v1213_v22 = vmax.f32 %v1174_v15, %v1197_v20  ;;  %v3308_v28 = vld [vmem:[%s4433_s10] sm:$0xff] }
 0x142   : > { %1576 = vmatpush.bf16.msrb.mxu2 %v3308_v28 }
 0x143   : > { %v1176_v14 = vpop.f32.mrf.mxu2 }
 0x144   : > { %v1153_v23 = vpop.f32.mrf.mxu0  ;;  %v1282_v62 = vpop.f32.mrf.mxu1 }
 0x145   : > { %v1154_v25 = vadd.f32 %v3677_v10, %v1153_v23 }
 0x147   : > { %v1189_v29 = vmul.f32 0.01, %v1154_v25 }
 0x149   : > { %v1205_v30 = vmax.f32 %v1154_v25, %v1189_v29  ;;  %v1357_v25 = vpack.c.bf16 %v1213_v22, %v1212_v21  ;;  %v1177_v29 = vadd.f32 %v3677_v10, %v1176_v14 }
 0x14b   : > { %v1353_v35 = vpack.c.bf16 %v1205_v30, %v1204_v31  ;;  %v1178_v24 = vpop.f32.mrf.mxu2 }
 0x14c   : > { %v1156_v32 = vpop.f32.mrf.mxu0  ;;  %v1179_v30 = vadd.f32 %v3677_v10, %v1178_v24  ;;  %v1285_v14 = vpop.f32.mrf.mxu1  ;;  %v3314_v24 = vld [vmem:[%s4437_s14 + $0x14] sm:$0xf] }
 0x14d   : > { %v1157_v37 = vadd.f32 %v3677_v10, %v1156_v32 }
 0x14e   : > { %v1199_v36 = vmul.f32 0.01, %v1179_v30 }
 0x14f   : > { %3178 = vmatmul.msk.bf16.gmra.mxu3 %vm1246_vm1, %v1353_v35  ;;  %v1190_v40 = vmul.f32 0.01, %v1157_v37  ;;  %v1198_v35 = vmul.f32 0.01, %v1177_v29 }
 0x151   : > { %v1206_v46 = vmax.f32 %v1157_v37, %v1190_v40  ;;  %v1214_v37 = vmax.f32 %v1177_v29, %v1198_v35 }
 0x153   : > { %v1181_v32 = vpop.f32.mrf.mxu2 }
 0x154   : > { %v1158_v38 = vpop.f32.mrf.mxu0 }
 0x155   : > { %v1159_v39 = vadd.f32 %v3677_v10, %v1158_v38  ;;  %v1215_v38 = vmax.f32 %v1179_v30, %v1199_v36  ;;  %v1287_v36 = vpop.f32.mrf.mxu1 }
 0x157   : > { %v1191_v41 = vmul.f32 0.01, %v1159_v39  ;;  %v1358_v40 = vpack.c.bf16 %v1215_v38, %v1214_v37 }
 0x159   : > { %v1207_v45 = vmax.f32 %v1159_v39, %v1191_v41 }
 0x15b   : > { %v1354_v47 = vpack.c.bf16 %v1207_v45, %v1206_v46  ;;  %v1183_v41 = vpop.f32.mrf.mxu2  ;;  %v1182_v45 = vadd.f32 %v3677_v10, %v1181_v32 }
 0x15c   : > { %v1184_v46 = vadd.f32 %v3677_v10, %v1183_v41 }
 0x15d   : > { %v1200_v48 = vmul.f32 0.01, %v1182_v45 }
 0x15e   : > { %v1201_v49 = vmul.f32 0.01, %v1184_v46 }
 0x15f   : > { %3179 = vmatmul.msk.bf16.gmra.mxu3 %vm1246_vm1, %v1354_v47  ;;  %v1216_v50 = vmax.f32 %v1182_v45, %v1200_v48 }
 0x160   : > { %v1217_v51 = vmax.f32 %v1184_v46, %v1201_v49 }
 0x162   : > { %v1359_v55 = vpack.c.bf16 %v1217_v51, %v1216_v50  ;;  %v1290_v51 = vpop.f32.mrf.mxu1 }
 0x16f   : > { %3180 = vmatmul.msk.bf16.gmra.mxu3 %vm1246_vm1, %v1355_v61  ;;  %v3739_v61 = vld [vmem:[%s4430_s7] ss:$0 sm:$0xff] }
 0x170   : > { %v1281_v63 = vadd.f32 %v3739_v61, %v1280_v59  ;;  %v1286_v32 = vadd.f32 %v3739_v61, %v1285_v14  ;;  %v1288_v48 = vadd.f32 %v3739_v61, %v1287_v36 }
 0x172   : > { %v3697_v0 = vpop.f32.mrf.mxu3  ;;  %v1320_v3 = vmul.f32 0.01, %v1281_v63  ;;  %v1323_v56 = vmul.f32 0.01, %v1288_v48 }
 0x173   : > { %v1296_v36 = vadd.f32 %v3739_v61, %v3697_v0 }
 0x174   : > { %v1336_v13 = vmax.f32 %v1281_v63, %v1320_v3  ;;  %v1291_v3 = vadd.f32 %v3739_v61, %v1290_v51 }
 0x176   : > { %v1324_v14 = vmul.f32 0.01, %v1291_v3 }
 0x17a   : > { %v3699_v11 = vpop.f32.mrf.mxu3 }
 0x17b   : > { %v1298_v0 = vadd.f32 %v3739_v61, %v3699_v11 }
 0x17f   : > { %3181 = vmatmul.msk.bf16.gmra.mxu3 %vm1246_vm1, %v1356_v12  ;;  %v1283_v12 = vadd.f32 %v3739_v61, %v1282_v62  ;;  %v3317_v62 = vld [vmem:[%s4439_s16 + $0x8] sm:$0xff] }
 0x180   : > { %2033 = vmatpush.bf16.msra.mxu2 %v3317_v62 }
 0x181   : > { %v1321_v20 = vmul.f32 0.01, %v1283_v12 }
 0x182   : > { %v3704_v18 = vpop.f32.mrf.mxu3 }
 0x183   : > { %v1337_v30 = vmax.f32 %v1283_v12, %v1321_v20 }
 0x18a   : > { %v3706_v23 = vpop.f32.mrf.mxu3 }
 0x18f   : > { %3182 = vmatmul.msk.bf16.gmra.mxu3 %vm1246_vm1, %v1357_v25  ;;  %v3229_v25 = vld [vmem:[%s4437_s14 + $0x18] sm:$0xf0] }
 0x190   : > { %v3232_v28 = vor.u32 %v3314_v24, %v3229_v25 }
 0x192   : > { %v3714_v31 = vpop.f32.mrf.mxu3  ;;  %1868 = vmatpush.bf16.msra.mxu3 %v3232_v28 }
 0x19a   : > { %v3716_v39 = vpop.f32.mrf.mxu3 }
 0x19f   : > { %3183 = vmatmul.msk.bf16.gmra.mxu3 %vm1246_vm1, %v1358_v40  ;;  %v1322_v40 = vmul.f32 0.01, %v1286_v32 }
 0x1a1   : > { %v1338_v46 = vmax.f32 %v1286_v32, %v1322_v40 }
 0x1a2   : > { %v3724_v47 = vpop.f32.mrf.mxu3 }
 0x1aa   : > { %v3726_v52 = vpop.f32.mrf.mxu3 }
 0x1af   : > { %3184 = vmatmul.msk.bf16.gmra.mxu3 %vm1246_vm1, %v1359_v55 }
 0x1b2   : > { %v3732_v60 = vpop.f32.mrf.mxu3 }
 0x1ba   : > { %v3734_v10 = vpop.f32.mrf.mxu3 }
 0x1c2   : > { %v1413_v2 = vpop.f32.mrf.mxu3 }
 0x1c3   : > { %v1414_v4 = vadd.f32 %v3745_v1, %v1413_v2  ;;  %v1339_v2 = vmax.f32 %v1288_v48, %v1323_v56 }
 0x1c5   : > { %v1453_v7 = vmul.f32 0.01, %v1414_v4 }
 0x1c7   : > { %v1469_v15 = vmax.f32 %v1414_v4, %v1453_v7 }
 0x1c9   : > { %v1485_v19 = vadd.f32 %v1469_v15, %v1336_v13 }
 0x1ca   : > { %v1415_v21 = vpop.f32.mrf.mxu3 }
 0x1cb   : > { %1501 = vst.msk [vmem:[%s3753_s26] sm:$0xff] %vm1246_vm1, %v1485_v19  ;;  %v1416_v22 = vadd.f32 %v3745_v1, %v1415_v21  ;;  %v1340_v21 = vmax.f32 %v1291_v3, %v1324_v14 }
 0x1cd   : > { %v1454_v29 = vmul.f32 0.01, %v1416_v22 }
 0x1cf   : > { %v1470_v35 = vmax.f32 %v1416_v22, %v1454_v29 }
 0x1d1   : > { %v1486_v37 = vadd.f32 %v1470_v35, %v1337_v30 }
 0x1d2   : > { %v1418_v38 = vpop.f32.mrf.mxu3 }
 0x1d3   : > { %1502 = vst.msk [vmem:[%s3753_s26 + $0x8] sm:$0xff] %vm1246_vm1, %v1486_v37  ;;  %v1419_v41 = vadd.f32 %v3745_v1, %v1418_v38  ;;  %v1517_v44 = vpack.c.bf16 %v1486_v37, %v1485_v19  ;;  %v1292_v19 = vpop.f32.mrf.mxu1 }
 0x1d4   : > { %v1293_v22 = vadd.f32 %v3739_v61, %v1292_v19 }
 0x1d5   : > { %v1455_v45 = vmul.f32 0.01, %v1419_v41  ;;  %3193 = vmatmul.msk.bf16.vlgmr.msrb.gmra.mxu2 %vm1246_vm1, %v1517_v44  ;;  %3209 = vmatmul.msk.bf16.vlgmr.msra.gmra.mxu0 %vm1246_vm1, %v1517_v44 }
 0x1d6   : > { %v1325_v29 = vmul.f32 0.01, %v1293_v22 }
 0x1d7   : > { %v1471_v49 = vmax.f32 %v1419_v41, %v1455_v45  ;;  %v1326_v41 = vmul.f32 0.01, %v1296_v36 }
 0x1d8   : > { %v1341_v35 = vmax.f32 %v1293_v22, %v1325_v29 }
 0x1d9   : > { %v1487_v50 = vadd.f32 %v1471_v49, %v1338_v46  ;;  %v1342_v48 = vmax.f32 %v1296_v36, %v1326_v41 }
 0x1da   : > { %v1420_v55 = vpop.f32.mrf.mxu3 }
 0x1db   : > { %1503 = vst.msk [vmem:[%s3753_s26 + $0x10] sm:$0xff] %vm1246_vm1, %v1487_v50  ;;  %v1421_v59 = vadd.f32 %v3745_v1, %v1420_v55  ;;  %v1327_v55 = vmul.f32 0.01, %v1298_v0 }
 0x1dd   : > { %v1456_v63 = vmul.f32 0.01, %v1421_v59  ;;  %v1343_v62 = vmax.f32 %v1298_v0, %v1327_v55  ;;  %v1311_v55 = vadd.f32 %v3739_v61, %v3724_v47 }
 0x1df   : > { %v1472_v4 = vmax.f32 %v1421_v59, %v1456_v63  ;;  %v1301_v63 = vadd.f32 %v3739_v61, %v3704_v18 }
 0x1e1   : > { %v1488_v7 = vadd.f32 %v1472_v4, %v1339_v2 }
 0x1e2   : > { %v1423_v12 = vpop.f32.mrf.mxu3 }
 0x1e3   : > { %1504 = vst.msk [vmem:[%s3753_s26 + $0x18] sm:$0xff] %vm1246_vm1, %v1488_v7  ;;  %v1424_v13 = vadd.f32 %v3745_v1, %v1423_v12  ;;  %v1518_v15 = vpack.c.bf16 %v1488_v7, %v1487_v50  ;;  %v1328_v7 = vmul.f32 0.01, %v1301_v63 }
 0x1e5   : > { %v1457_v20 = vmul.f32 0.01, %v1424_v13  ;;  %3194 = vmatmul.msk.bf16.gmra.mxu2 %vm1246_vm1, %v1518_v15  ;;  %3210 = vmatmul.msk.bf16.gmra.mxu0 %vm1246_vm1, %v1518_v15  ;;  %v1344_v15 = vmax.f32 %v1301_v63, %v1328_v7  ;;  %v3315_v7 = vld [vmem:[%s4437_s14 + $0x14] sm:$0xf0] }
 0x1e7   : > { %v1473_v24 = vmax.f32 %v1424_v13, %v1457_v20  ;;  %v1303_v13 = vadd.f32 %v3739_v61, %v3706_v23 }
 0x1e9   : > { %v1489_v25 = vadd.f32 %v1473_v24, %v1340_v21  ;;  %v1329_v20 = vmul.f32 0.01, %v1303_v13  ;;  %v3312_v24 = vld [vmem:[%s4437_s14 + $0x4] sm:$0xf] }
 0x1ea   : > { %v1425_v28 = vpop.f32.mrf.mxu3 }
 0x1eb   : > { %1505 = vst.msk [vmem:[%s3753_s26 + $0x20] sm:$0xff] %vm1246_vm1, %v1489_v25  ;;  %v1426_v30 = vadd.f32 %v3745_v1, %v1425_v28  ;;  %v1345_v29 = vmax.f32 %v1303_v13, %v1329_v20 }
 0x1ed   : > { %v1458_v32 = vmul.f32 0.01, %v1426_v30 }
 0x1ef   : > { %v1474_v37 = vmax.f32 %v1426_v30, %v1458_v32  ;;  %v1306_v30 = vadd.f32 %v3739_v61, %v3714_v31 }
 0x1f1   : > { %v1490_v38 = vadd.f32 %v1474_v37, %v1341_v35  ;;  %v1330_v37 = vmul.f32 0.01, %v1306_v30 }
 0x1f2   : > { %v1428_v40 = vpop.f32.mrf.mxu3 }
 0x1f3   : > { %1506 = vst.msk [vmem:[%s3753_s26 + $0x28] sm:$0xff] %vm1246_vm1, %v1490_v38  ;;  %v1429_v44 = vadd.f32 %v3745_v1, %v1428_v40  ;;  %v1519_v45 = vpack.c.bf16 %v1490_v38, %v1489_v25  ;;  %v3221_v25 = vld [vmem:[%s4437_s14 + $0x8] sm:$0xf0] }
 0x1f4   : > { %v3224_v28 = vor.u32 %v3312_v24, %v3221_v25  ;;  %v1316_v24 = vadd.f32 %v3739_v61, %v3732_v60  ;;  %v1318_v60 = vadd.f32 %v3739_v61, %v3734_v10 }
 0x1f5   : > { %v1459_v46 = vmul.f32 0.01, %v1429_v44  ;;  %3195 = vmatmul.msk.bf16.gmra.mxu2 %vm1246_vm1, %v1519_v45  ;;  %3211 = vmatmul.msk.bf16.gmra.mxu0 %vm1246_vm1, %v1519_v45  ;;  %v1308_v45 = vadd.f32 %v3739_v61, %v3716_v39 }
 0x1f6   : > { %1869 = vmatpush.bf16.msra.mxu3 %v3224_v28 }
 0x1f7   : > { %v1475_v49 = vmax.f32 %v1429_v44, %v1459_v46  ;;  %v1346_v44 = vmax.f32 %v1306_v30, %v1330_v37  ;;  %v1331_v0 = vmul.f32 0.01, %v1308_v45  ;;  %v3219_v37 = vld [vmem:[%s4437_s14] sm:$0xf] }
 0x1f9   : > { %v1491_v50 = vadd.f32 %v1475_v49, %v1342_v48 }
 0x1fa   : > { %v1430_v51 = vpop.f32.mrf.mxu3 }
 0x1fb   : > { %1507 = vst.msk [vmem:[%s3753_s26 + $0x30] sm:$0xff] %vm1246_vm1, %v1491_v50  ;;  %v1431_v56 = vadd.f32 %v3745_v1, %v1430_v51 }
 0x1fd   : > { %v1460_v59 = vmul.f32 0.01, %v1431_v56 }
 0x1ff   : > { %v1476_v2 = vmax.f32 %v1431_v56, %v1460_v59  ;;  %v1347_v56 = vmax.f32 %v1308_v45, %v1331_v0  ;;  %v1335_v45 = vmul.f32 0.01, %v1318_v60 }
 0x201   : > { %v1492_v3 = vadd.f32 %v1476_v2, %v1343_v62  ;;  %v1332_v62 = vmul.f32 0.01, %v1311_v55  ;;  %v1351_v10 = vmax.f32 %v1318_v60, %v1335_v45 }
 0x202   : > { %v1433_v4 = vpop.f32.mrf.mxu3 }
 0x203   : > { %1508 = vst.msk [vmem:[%s3753_s26 + $0x38] sm:$0xff] %vm1246_vm1, %v1492_v3  ;;  %v1434_v11 = vadd.f32 %v3745_v1, %v1433_v4  ;;  %v1520_v12 = vpack.c.bf16 %v1492_v3, %v1491_v50  ;;  %v3316_v50 = vld [vmem:[%s4439_s16] sm:$0xff]  ;;  %v3227_v4 = vld [vmem:[%s4437_s14 + $0x10] sm:$0xf] }
 0x204   : > { %2034 = vmatpush.bf16.msra.mxu2 %v3316_v50  ;;  %v3228_v47 = vor.u32 %v3315_v7, %v3227_v4  ;;  %v3875_v50 = vld [vmem:[%s4436_s13] ss:$0 sm:$0xff] }
 0x205   : > { %v1461_v14 = vmul.f32 0.01, %v1434_v11  ;;  %3196 = vmatmul.msk.bf16.gmra.mxu2 %vm1246_vm1, %v1520_v12  ;;  %3212 = vmatmul.msk.bf16.gmra.mxu0 %vm1246_vm1, %v1520_v12  ;;  %v1348_v12 = vmax.f32 %v1311_v55, %v1332_v62  ;;  %v3881_v55 = vld [vmem:[%s4434_s11] ss:$0 sm:$0xff] }
 0x206   : > { %1819 = vmatpush.bf16.msra.mxu1 %v3228_v47 }
 0x207   : > { %v1477_v18 = vmax.f32 %v1434_v11, %v1461_v14  ;;  %v1313_v14 = vadd.f32 %v3739_v61, %v3726_v52 }
 0x209   : > { %v1493_v19 = vadd.f32 %v1477_v18, %v1344_v15 }
 0x20a   : > { %v1435_v21 = vpop.f32.mrf.mxu3 }
 0x20b   : > { %1509 = vst.msk [vmem:[%s3753_s26 + $0x40] sm:$0xff] %vm1246_vm1, %v1493_v19  ;;  %v1436_v22 = vadd.f32 %v3745_v1, %v1435_v21 }
 0x20d   : > { %v1462_v23 = vmul.f32 0.01, %v1436_v22 }
 0x20f   : > { %v1478_v32 = vmax.f32 %v1436_v22, %v1462_v23 }
 0x211   : > { %v1494_v35 = vadd.f32 %v1478_v32, %v1345_v29  ;;  %v1334_v29 = vmul.f32 0.01, %v1316_v24 }
 0x212   : > { %v1438_v36 = vpop.f32.mrf.mxu3 }
 0x213   : > { %1510 = vst.msk [vmem:[%s3753_s26 + $0x48] sm:$0xff] %vm1246_vm1, %v1494_v35  ;;  %v1439_v38 = vadd.f32 %v3745_v1, %v1438_v36  ;;  %v1521_v40 = vpack.c.bf16 %v1494_v35, %v1493_v19  ;;  %v1333_v19 = vmul.f32 0.01, %v1313_v14  ;;  %v1350_v35 = vmax.f32 %v1316_v24, %v1334_v29 }
 0x215   : > { %v1463_v41 = vmul.f32 0.01, %v1439_v38  ;;  %3197 = vmatmul.msk.bf16.gmra.mxu2 %vm1246_vm1, %v1521_v40  ;;  %3213 = vmatmul.msk.bf16.gmra.mxu0 %vm1246_vm1, %v1521_v40  ;;  %v1349_v22 = vmax.f32 %v1313_v14, %v1333_v19 }
 0x217   : > { %v1479_v31 = vmax.f32 %v1439_v38, %v1463_v41  ;;  %v3313_v38 = vld [vmem:[%s4437_s14 + $0x4] sm:$0xf0] }
 0x218   : > { %v3220_v40 = vor.u32 %v3313_v38, %v3219_v37 }
 0x219   : > { %v1495_v46 = vadd.f32 %v1479_v31, %v1346_v44 }
 0x21a   : > { %v1440_v48 = vpop.f32.mrf.mxu3  ;;  %1820 = vmatpush.bf16.msra.mxu1 %v3220_v40 }
 0x21b   : > { %1511 = vst.msk [vmem:[%s3753_s26 + $0x50] sm:$0xff] %vm1246_vm1, %v1495_v46  ;;  %v1441_v49 = vadd.f32 %v3745_v1, %v1440_v48 }
 0x21d   : > { %v1464_v51 = vmul.f32 0.01, %v1441_v49 }
 0x21f   : > { %v1480_v39 = vmax.f32 %v1441_v49, %v1464_v51 }
 0x221   : > { %v1496_v59 = vadd.f32 %v1480_v39, %v1347_v56 }
 0x222   : > { %v1443_v63 = vpop.f32.mrf.mxu3 }
 0x223   : > { %1512 = vst.msk [vmem:[%s3753_s26 + $0x58] sm:$0xff] %vm1246_vm1, %v1496_v59  ;;  %v1444_v2 = vadd.f32 %v3745_v1, %v1443_v63  ;;  %v1522_v3 = vpack.c.bf16 %v1496_v59, %v1495_v46 }
 0x225   : > { %v1465_v11 = vmul.f32 0.01, %v1444_v2  ;;  %3198 = vmatmul.msk.bf16.gmra.mxu2 %vm1246_vm1, %v1522_v3  ;;  %3214 = vmatmul.msk.bf16.gmra.mxu0 %vm1246_vm1, %v1522_v3 }
 0x227   : > { %v1481_v13 = vmax.f32 %v1444_v2, %v1465_v11 }
 0x229   : > { %v1497_v15 = vadd.f32 %v1481_v13, %v1348_v12 }
 0x22a   : > { %v1445_v18 = vpop.f32.mrf.mxu3 }
 0x22b   : > { %1513 = vst.msk [vmem:[%s3753_s26 + $0x60] sm:$0xff] %vm1246_vm1, %v1497_v15  ;;  %v1446_v20 = vadd.f32 %v3745_v1, %v1445_v18 }
 0x22d   : > { %v1466_v21 = vmul.f32 0.01, %v1446_v20 }
 0x22f   : > { %v1482_v25 = vmax.f32 %v1446_v20, %v1466_v21 }
 0x231   : > { %v1498_v28 = vadd.f32 %v1482_v25, %v1349_v22 }
 0x232   : > { %v1448_v23 = vpop.f32.mrf.mxu3 }
 0x233   : > { %1514 = vst.msk [vmem:[%s3753_s26 + $0x68] sm:$0xff] %vm1246_vm1, %v1498_v28  ;;  %v1449_v52 = vadd.f32 %v3745_v1, %v1448_v23  ;;  %v1523_v30 = vpack.c.bf16 %v1498_v28, %v1497_v15 }
 0x235   : > { %v1467_v32 = vmul.f32 0.01, %v1449_v52  ;;  %3199 = vmatmul.msk.bf16.gmra.mxu2 %vm1246_vm1, %v1523_v30  ;;  %3215 = vmatmul.msk.bf16.gmra.mxu0 %vm1246_vm1, %v1523_v30 }
 0x237   : > { %v1483_v36 = vmax.f32 %v1449_v52, %v1467_v32 }
 0x239   : > { %v1499_v41 = vadd.f32 %v1483_v36, %v1350_v35 }
 0x23a   : > { %v1450_v44 = vpop.f32.mrf.mxu3 }
 0x23b   : > { %1515 = vst.msk [vmem:[%s3753_s26 + $0x70] sm:$0xff] %vm1246_vm1, %v1499_v41  ;;  %v1451_v31 = vadd.f32 %v3745_v1, %v1450_v44 }
 0x23d   : > { %v1468_v46 = vmul.f32 0.01, %v1451_v31 }
 0x23f   : > { %v1484_v61 = vmax.f32 %v1451_v31, %v1468_v46 }
 0x241   : > { %v1500_v48 = vadd.f32 %v1484_v61, %v1351_v10 }
 0x243   : > { %1516 = vst.msk [vmem:[%s3753_s26 + $0x78] sm:$0xff] %vm1246_vm1, %v1500_v48  ;;  %v1524_v0 = vpack.c.bf16 %v1500_v48, %v1499_v41 }
 0x245   : > { %3200 = vmatmul.msk.bf16.gmra.mxu2 %vm1246_vm1, %v1524_v0  ;;  %3216 = vmatmul.msk.bf16.gmra.mxu0 %vm1246_vm1, %v1524_v0 }
 0x252   : > { %v1679_v49 = vpop.f32.mrf.mxu0 }
 0x253   : > { %v1680_v51 = vadd.f32 %v3875_v50, %v1679_v49 }
 0x255   : > { %v1719_v39 = vmul.f32 0.01, %v1680_v51 }
 0x257   : > { %v1735_v2 = vmax.f32 %v1680_v51, %v1719_v39 }
 0x258   : > { %v1578_v1 = vpop.f32.mrf.mxu2 }
 0x259   : > { %v1579_v62 = vadd.f32 %v3881_v55, %v1578_v1 }
 0x25a   : > { %v1681_v56 = vpop.f32.mrf.mxu0 }
 0x25b   : > { %v1682_v59 = vadd.f32 %v3875_v50, %v1681_v56  ;;  %v1618_v7 = vmul.f32 0.01, %v1579_v62 }
 0x25d   : > { %v1720_v63 = vmul.f32 0.01, %v1682_v59  ;;  %v1634_v13 = vmax.f32 %v1579_v62, %v1618_v7 }
 0x25f   : > { %v1736_v3 = vmax.f32 %v1682_v59, %v1720_v63 }
 0x260   : > { %v1580_v4 = vpop.f32.mrf.mxu2 }
 0x261   : > { %v1975_v47 = vpack.c.bf16 %v1736_v3, %v1735_v2  ;;  %v1581_v11 = vadd.f32 %v3881_v55, %v1580_v4 }
 0x262   : > { %v1684_v12 = vpop.f32.mrf.mxu0 }
 0x263   : > { %v1619_v14 = vmul.f32 0.01, %v1581_v11  ;;  %3257 = vmatmul.msk.bf16.vlgmr.msra.gmra.mxu2 %vm1246_vm1, %v1975_v47  ;;  %v1685_v19 = vadd.f32 %v3875_v50, %v1684_v12 }
 0x265   : > { %v1635_v15 = vmax.f32 %v1581_v11, %v1619_v14  ;;  %v1721_v22 = vmul.f32 0.01, %v1685_v19 }
 0x267   : > { %v1751_v18 = vpack.c.bf16 %v1635_v15, %v1634_v13  ;;  %v1737_v23 = vmax.f32 %v1685_v19, %v1721_v22 }
 0x268   : > { %v1583_v20 = vpop.f32.mrf.mxu2 }
 0x269   : > { %3233 = vmatmul.msk.bf16.vlgmr.msra.gmra.mxu1 %vm1246_vm1, %v1751_v18  ;;  %3241 = vmatmul.msk.bf16.vlgmr.msra.gmra.mxu3 %vm1246_vm1, %v1751_v18  ;;  %v1584_v25 = vadd.f32 %v3881_v55, %v1583_v20 }
 0x26a   : > { %v1686_v21 = vpop.f32.mrf.mxu0 }
 0x26b   : > { %v1687_v24 = vadd.f32 %v3875_v50, %v1686_v21  ;;  %v1620_v30 = vmul.f32 0.01, %v1584_v25 }
 0x26d   : > { %v1722_v28 = vmul.f32 0.01, %v1687_v24  ;;  %v1636_v37 = vmax.f32 %v1584_v25, %v1620_v30 }
 0x26f   : > { %v1738_v29 = vmax.f32 %v1687_v24, %v1722_v28 }
 0x270   : > { %v1585_v52 = vpop.f32.mrf.mxu2 }
 0x271   : > { %v1976_v32 = vpack.c.bf16 %v1738_v29, %v1737_v23  ;;  %v1586_v35 = vadd.f32 %v3881_v55, %v1585_v52 }
 0x272   : > { %v1689_v60 = vpop.f32.mrf.mxu0 }
 0x273   : > { %v1621_v36 = vmul.f32 0.01, %v1586_v35  ;;  %3258 = vmatmul.msk.bf16.gmra.mxu2 %vm1246_vm1, %v1976_v32  ;;  %v1690_v41 = vadd.f32 %v3875_v50, %v1689_v60 }
 0x275   : > { %v1637_v38 = vmax.f32 %v1586_v35, %v1621_v36  ;;  %v1723_v31 = vmul.f32 0.01, %v1690_v41 }
 0x277   : > { %v1752_v40 = vpack.c.bf16 %v1637_v38, %v1636_v37  ;;  %v1739_v48 = vmax.f32 %v1690_v41, %v1723_v31 }
 0x278   : > { %v1588_v44 = vpop.f32.mrf.mxu2 }
 0x279   : > { %3234 = vmatmul.msk.bf16.gmra.mxu1 %vm1246_vm1, %v1752_v40  ;;  %3242 = vmatmul.msk.bf16.gmra.mxu3 %vm1246_vm1, %v1752_v40  ;;  %v1589_v10 = vadd.f32 %v3881_v55, %v1588_v44 }
 0x27a   : > { %v1691_v45 = vpop.f32.mrf.mxu0 }
 0x27b   : > { %v1692_v46 = vadd.f32 %v3875_v50, %v1691_v45  ;;  %v1622_v51 = vmul.f32 0.01, %v1589_v10 }
 0x27d   : > { %v1724_v61 = vmul.f32 0.01, %v1692_v46  ;;  %v1638_v62 = vmax.f32 %v1589_v10, %v1622_v51 }
 0x27f   : > { %v1740_v0 = vmax.f32 %v1692_v46, %v1724_v61 }
 0x280   : > { %v1590_v49 = vpop.f32.mrf.mxu2 }
 0x281   : > { %v1977_v1 = vpack.c.bf16 %v1740_v0, %v1739_v48  ;;  %v1591_v56 = vadd.f32 %v3881_v55, %v1590_v49 }
 0x282   : > { %v1694_v39 = vpop.f32.mrf.mxu0 }
 0x283   : > { %v1623_v59 = vmul.f32 0.01, %v1591_v56  ;;  %3259 = vmatmul.msk.bf16.gmra.mxu2 %vm1246_vm1, %v1977_v1  ;;  %v1695_v3 = vadd.f32 %v3875_v50, %v1694_v39 }
 0x285   : > { %v1639_v63 = vmax.f32 %v1591_v56, %v1623_v59  ;;  %v1725_v47 = vmul.f32 0.01, %v1695_v3 }
 0x287   : > { %v1753_v2 = vpack.c.bf16 %v1639_v63, %v1638_v62  ;;  %v1741_v13 = vmax.f32 %v1695_v3, %v1725_v47 }
 0x288   : > { %v1593_v4 = vpop.f32.mrf.mxu2 }
 0x289   : > { %3235 = vmatmul.msk.bf16.gmra.mxu1 %vm1246_vm1, %v1753_v2  ;;  %3243 = vmatmul.msk.bf16.gmra.mxu3 %vm1246_vm1, %v1753_v2  ;;  %v1594_v12 = vadd.f32 %v3881_v55, %v1593_v4 }
 0x28a   : > { %v1696_v7 = vpop.f32.mrf.mxu0 }
 0x28b   : > { %v1697_v11 = vadd.f32 %v3875_v50, %v1696_v7  ;;  %v1624_v19 = vmul.f32 0.01, %v1594_v12 }
 0x28d   : > { %v1726_v14 = vmul.f32 0.01, %v1697_v11  ;;  %v1640_v25 = vmax.f32 %v1594_v12, %v1624_v19 }
 0x28f   : > { %v1742_v15 = vmax.f32 %v1697_v11, %v1726_v14 }
 0x290   : > { %v1595_v18 = vpop.f32.mrf.mxu2 }
 0x291   : > { %v1978_v20 = vpack.c.bf16 %v1742_v15, %v1741_v13  ;;  %v1596_v21 = vadd.f32 %v3881_v55, %v1595_v18 }
 0x292   : > { %v1699_v22 = vpop.f32.mrf.mxu0 }
 0x293   : > { %v1625_v24 = vmul.f32 0.01, %v1596_v21  ;;  %3260 = vmatmul.msk.bf16.gmra.mxu2 %vm1246_vm1, %v1978_v20  ;;  %v1700_v29 = vadd.f32 %v3875_v50, %v1699_v22 }
 0x295   : > { %v1641_v28 = vmax.f32 %v1596_v21, %v1625_v24  ;;  %v1727_v32 = vmul.f32 0.01, %v1700_v29 }
 0x297   : > { %v1754_v23 = vpack.c.bf16 %v1641_v28, %v1640_v25  ;;  %v1743_v37 = vmax.f32 %v1700_v29, %v1727_v32 }
 0x298   : > { %v1598_v52 = vpop.f32.mrf.mxu2 }
 0x299   : > { %3236 = vmatmul.msk.bf16.gmra.mxu1 %vm1246_vm1, %v1754_v23  ;;  %3244 = vmatmul.msk.bf16.gmra.mxu3 %vm1246_vm1, %v1754_v23  ;;  %v1599_v60 = vadd.f32 %v3881_v55, %v1598_v52 }
 0x29a   : > { %v1701_v30 = vpop.f32.mrf.mxu0 }
 0x29b   : > { %v1702_v35 = vadd.f32 %v3875_v50, %v1701_v30  ;;  %v1626_v41 = vmul.f32 0.01, %v1599_v60 }
 0x29d   : > { %v1728_v36 = vmul.f32 0.01, %v1702_v35  ;;  %v1642_v10 = vmax.f32 %v1599_v60, %v1626_v41 }
 0x29f   : > { %v1744_v38 = vmax.f32 %v1702_v35, %v1728_v36 }
 0x2a0   : > { %v1600_v40 = vpop.f32.mrf.mxu2 }
 0x2a1   : > { %v1979_v44 = vpack.c.bf16 %v1744_v38, %v1743_v37  ;;  %v1601_v45 = vadd.f32 %v3881_v55, %v1600_v40 }
 0x2a2   : > { %v1704_v31 = vpop.f32.mrf.mxu0 }
 0x2a3   : > { %v1627_v46 = vmul.f32 0.01, %v1601_v45  ;;  %3261 = vmatmul.msk.bf16.gmra.mxu2 %vm1246_vm1, %v1979_v44  ;;  %v1705_v0 = vadd.f32 %v3875_v50, %v1704_v31 }
 0x2a5   : > { %v1643_v61 = vmax.f32 %v1601_v45, %v1627_v46  ;;  %v1729_v1 = vmul.f32 0.01, %v1705_v0 }
 0x2a7   : > { %v1755_v48 = vpack.c.bf16 %v1643_v61, %v1642_v10  ;;  %v1745_v62 = vmax.f32 %v1705_v0, %v1729_v1 }
 0x2a8   : > { %v1603_v49 = vpop.f32.mrf.mxu2 }
 0x2a9   : > { %3237 = vmatmul.msk.bf16.gmra.mxu1 %vm1246_vm1, %v1755_v48  ;;  %3245 = vmatmul.msk.bf16.gmra.mxu3 %vm1246_vm1, %v1755_v48  ;;  %v1604_v39 = vadd.f32 %v3881_v55, %v1603_v49 }
 0x2aa   : > { %v1706_v51 = vpop.f32.mrf.mxu0 }
 0x2ab   : > { %v1707_v56 = vadd.f32 %v3875_v50, %v1706_v51  ;;  %v1628_v3 = vmul.f32 0.01, %v1604_v39 }
 0x2ad   : > { %v1730_v59 = vmul.f32 0.01, %v1707_v56  ;;  %v1644_v12 = vmax.f32 %v1604_v39, %v1628_v3 }
 0x2af   : > { %v1746_v63 = vmax.f32 %v1707_v56, %v1730_v59 }
 0x2b0   : > { %v1605_v2 = vpop.f32.mrf.mxu2 }
 0x2b1   : > { %v1980_v4 = vpack.c.bf16 %v1746_v63, %v1745_v62  ;;  %v1606_v7 = vadd.f32 %v3881_v55, %v1605_v2  ;;  %v3937_v62 = vld [vmem:[%s3507_s30] sm:$0xff]  ;;  %v3944_v2 = vld [vmem:[%s3507_s30 + $0x8] sm:$0xff] }
 0x2b2   : > { %v1709_v47 = vpop.f32.mrf.mxu0  ;;  %v2157_v63 = vunpack.c.h.bf16 %v3937_v62  ;;  %v2159_v3 = vunpack.c.h.bf16 %v3944_v2 }
 0x2b3   : > { %v1629_v11 = vmul.f32 0.01, %v1606_v7  ;;  %3262 = vmatmul.msk.bf16.gmra.mxu2 %vm1246_vm1, %v1980_v4  ;;  %v1710_v15 = vadd.f32 %v3875_v50, %v1709_v47  ;;  %v1763_v47 = vld [vmem:[%s4438_s15] sm:$0x3] }
 0x2b5   : > { %v1645_v14 = vmax.f32 %v1606_v7, %v1629_v11  ;;  %v1731_v20 = vmul.f32 0.01, %v1710_v15  ;;  %v2237_v7 = vmul.f32 24.0, %v2157_v63 }
 0x2b7   : > { %v1756_v13 = vpack.c.bf16 %v1645_v14, %v1644_v12  ;;  %v1747_v25 = vmax.f32 %v1710_v15, %v1731_v20  ;;  %v2239_v12 = vmul.f32 24.0, %v2159_v3  ;;  %v3962_v14 = vld [vmem:[%s4440_s17] ss:$0 sm:$0xff]  ;;  %v3964_v15 = vperm.slane %v1763_v47, 0 }
 0x2b8   : > { %v1608_v18 = vpop.f32.mrf.mxu2 }
 0x2b9   : > { %3238 = vmatmul.msk.bf16.gmra.mxu1 %vm1246_vm1, %v1756_v13  ;;  %3246 = vmatmul.msk.bf16.gmra.mxu3 %vm1246_vm1, %v1756_v13  ;;  %v1609_v22 = vadd.f32 %v3881_v55, %v1608_v18 }
 0x2ba   : > { %v1711_v19 = vpop.f32.mrf.mxu0 }
 0x2bb   : > { %v1712_v21 = vadd.f32 %v3875_v50, %v1711_v19  ;;  %v1630_v29 = vmul.f32 0.01, %v1609_v22 }
 0x2bd   : > { %v1732_v24 = vmul.f32 0.01, %v1712_v21  ;;  %v1646_v60 = vmax.f32 %v1609_v22, %v1630_v29  ;;  %v3971_v29 = vld [vmem:[%s3507_s30 + $0x10] sm:$0xff] }
 0x2bf   : > { %v1748_v28 = vmax.f32 %v1712_v21, %v1732_v24 }
 0x2c0   : > { %v1610_v23 = vpop.f32.mrf.mxu2 }
 0x2c1   : > { %v1981_v52 = vpack.c.bf16 %v1748_v28, %v1747_v25  ;;  %v1611_v30 = vadd.f32 %v3881_v55, %v1610_v23  ;;  %v3968_v23 = vperm.slane %v1763_v47, 1 }
 0x2c2   : > { %v1714_v32 = vpop.f32.mrf.mxu0 }
 0x2c3   : > { %v1631_v35 = vmul.f32 0.01, %v1611_v30  ;;  %3263 = vmatmul.msk.bf16.gmra.mxu2 %vm1246_vm1, %v1981_v52  ;;  %v1715_v38 = vadd.f32 %v3875_v50, %v1714_v32 }
 0x2c5   : > { %v1647_v36 = vmax.f32 %v1611_v30, %v1631_v35  ;;  %v1733_v44 = vmul.f32 0.01, %v1715_v38 }
 0x2c7   : > { %v1757_v37 = vpack.c.bf16 %v1647_v36, %v1646_v60  ;;  %v1749_v10 = vmax.f32 %v1715_v38, %v1733_v44  ;;  %v2161_v38 = vunpack.c.h.bf16 %v3971_v29  ;;  %v2684_v44 = vunpack.c.l.bf16 %v3570_v8 }
 0x2c8   : > { %v1613_v40 = vpop.f32.mrf.mxu2 }
 0x2c9   : > { %3239 = vmatmul.msk.bf16.gmra.mxu1 %vm1246_vm1, %v1757_v37  ;;  %3247 = vmatmul.msk.bf16.gmra.mxu3 %vm1246_vm1, %v1757_v37  ;;  %v1614_v31 = vadd.f32 %v3881_v55, %v1613_v40  ;;  %v2160_v37 = vunpack.c.l.bf16 %v3971_v29 }
 0x2ca   : > { %v1716_v41 = vpop.f32.mrf.mxu0 }
 0x2cb   : > { %v1717_v45 = vadd.f32 %v3875_v50, %v1716_v41  ;;  %v1632_v0 = vmul.f32 0.01, %v1614_v31  ;;  %v2156_v50 = vunpack.c.l.bf16 %v3937_v62  ;;  %v2240_v8 = vmul.f32 24.0, %v2160_v37 }
 0x2cd   : > { %v1734_v46 = vmul.f32 0.01, %v1717_v45  ;;  %v1648_v56 = vmax.f32 %v1614_v31, %v1632_v0  ;;  %v2236_v4 = vmul.f32 24.0, %v2156_v50  ;;  %v3978_v31 = vld [vmem:[%s3507_s30 + $0x18] sm:$0xff] }
 0x2cf   : > { %v1750_v61 = vmax.f32 %v1717_v45, %v1734_v46  ;;  %v2268_v13 = vpack.c.bf16 %v2237_v7, %v2236_v4  ;;  %v2162_v4 = vunpack.c.l.bf16 %v3978_v31 }
 0x2d0   : > { %v1615_v48 = vpop.f32.mrf.mxu2 }
 0x2d1   : > { %v1982_v49 = vpack.c.bf16 %v1750_v61, %v1749_v10  ;;  %v1616_v51 = vadd.f32 %v3881_v55, %v1615_v48  ;;  %v2158_v55 = vunpack.c.l.bf16 %v3944_v2  ;;  %v2284_v22 = vunpack.c.l.bf16 %v2268_v13 }
 0x2d2   : > { %v2285_v24 = vunpack.c.h.bf16 %v2268_v13  ;;  %v2685_v61 = vunpack.c.l.bf16 %v3572_v9  ;;  %v2687_v13 = vunpack.c.l.bf16 %v3596_v27 }
 0x2d3   : > { %v1633_v1 = vmul.f32 0.01, %v1616_v51  ;;  %3264 = vmatmul.msk.bf16.gmra.mxu2 %vm1246_vm1, %v1982_v49  ;;  %v2238_v11 = vmul.f32 24.0, %v2158_v55  ;;  %v2316_v35 = vadd.f32 1.0, %v2284_v22 }
 0x2d4   : > { %v2317_v60 = vadd.f32 1.0, %v2285_v24 }
 0x2d5   : > { %v1649_v39 = vmax.f32 %v1616_v51, %v1633_v1  ;;  %v2269_v20 = vpack.c.bf16 %v2239_v12, %v2238_v11  ;;  %v2686_v12 = vunpack.c.l.bf16 %v3594_v26 }
 0x2d7   : > { %v1758_v59 = vpack.c.bf16 %v1649_v39, %v1648_v56  ;;  %v2286_v52 = vunpack.c.l.bf16 %v2269_v20  ;;  %v2287_v30 = vunpack.c.h.bf16 %v2269_v20  ;;  %v3982_v56 = vpack.c.bf16 %v2317_v60, %v2316_v35 }
 0x2d9   : > { %3240 = vmatmul.msk.bf16.gmra.mxu1 %vm1246_vm1, %v1758_v59  ;;  %3248 = vmatmul.msk.bf16.gmra.mxu3 %vm1246_vm1, %v1758_v59  ;;  %v2318_v48 = vadd.f32 1.0, %v2286_v52  ;;  %v2319_v0 = vadd.f32 1.0, %v2287_v30  ;;  %v2241_v59 = vmul.f32 24.0, %v2161_v38  ;;  %v2476_v24 = vunpack.c.l.bf16 %v3982_v56 }
 0x2da   : > { %v2242_v30 = vmul.f32 24.0, %v2162_v4 }
 0x2e6   : > { %v1822_v18 = vpop.f32.mrf.mxu1  ;;  %v2036_v19 = vpop.f32.mrf.mxu2 }
 0x2e7   : > { %v2037_v21 = vadd.f32 %v3962_v14, %v2036_v19  ;;  %v1823_v25 = vadd.f32 %v1822_v18, %v3964_v15  ;;  %v4444_v18 = vunpack.c.h.bf16 %v3978_v31  ;;  %v3993_v19 = vpack.c.bf16 %v2319_v0, %v2318_v48 }
 0x2e9   : > { %v2076_v28 = vmul.f32 0.01, %v2037_v21  ;;  %v1911_v40 = vmul.f32 0.01, %v1823_v25  ;;  %v2479_v62 = vunpack.c.h.bf16 %v3993_v19 }
 0x2eb   : > { %v2092_v32 = vmax.f32 %v2037_v21, %v2076_v28  ;;  %v1943_v7 = vmax.f32 %v1823_v25, %v1911_v40  ;;  %v3996_v25 = vpack.c.bf16 %v2241_v59, %v2240_v8 }
 0x2ec   : > { %v1871_v36 = vpop.f32.mrf.mxu3 }
 0x2ed   : > { %v2652_v41 = vpack.c.bf16 %v2092_v32, %v2092_v32  ;;  %v1872_v45 = vadd.f32 %v1871_v36, %v3968_v23  ;;  %v2477_v32 = vunpack.c.h.bf16 %v3982_v56  ;;  %v2288_v2 = vunpack.c.l.bf16 %v3996_v25 }
 0x2ee   : > { %v1824_v46 = vpop.f32.mrf.mxu1  ;;  %v2038_v10 = vpop.f32.mrf.mxu2 }
 0x2ef   : > { %v2668_v49 = vunpack.c.l.bf16 %v2652_v41  ;;  %v1912_v51 = vmul.f32 0.01, %v1872_v45  ;;  %v2039_v1 = vadd.f32 %v3962_v14, %v2038_v10  ;;  %v1825_v39 = vadd.f32 %v1824_v46, %v3964_v15  ;;  %v4003_v41 = vld [vmem:[%s3507_s30 + $0x20] sm:$0xff] }
 0x2f0   : > { %v2243_v46 = vmul.f32 24.0, %v4444_v18  ;;  %v4446_v0 = vunpack.c.l.bf16 %v4003_v41 }
 0x2f1   : > { %v2700_v9 = vsub.f32 %v2668_v49, %v2684_v44  ;;  %v1944_v47 = vmax.f32 %v1872_v45, %v1912_v51  ;;  %v2077_v11 = vmul.f32 0.01, %v2039_v1  ;;  %v1913_v28 = vmul.f32 0.01, %v1825_v39 }
 0x2f2   : > { %v4017_v10 = vpack.c.bf16 %v2243_v46, %v2242_v30 }
 0x2f3   : > { %v2716_v20 = vpack.c.bf16 %v2700_v9, %v2700_v9  ;;  %v2108_v21 = vpack.c.bf16 %v1944_v47, %v1943_v7  ;;  %v2093_v22 = vmax.f32 %v2039_v1, %v2077_v11  ;;  %v4445_v9 = vunpack.c.h.bf16 %v4003_v41 }
 0x2f4   : > { %v1873_v52 = vpop.f32.mrf.mxu3  ;;  %v2478_v47 = vunpack.c.l.bf16 %v3993_v19 }
 0x2f5   : > { %v2124_v35 = vunpack.c.l.bf16 %v2108_v21  ;;  %v2125_v60 = vunpack.c.h.bf16 %v2108_v21  ;;  %v2653_v36 = vpack.c.bf16 %v2093_v22, %v2093_v22  ;;  %v1874_v40 = vadd.f32 %v1873_v52, %v3968_v23 }
 0x2f6   : > { %v1827_v44 = vpop.f32.mrf.mxu1  ;;  %v2041_v45 = vpop.f32.mrf.mxu2  ;;  %v2732_v48 = vunpack.c.l.bf16 %v2716_v20  ;;  %v1945_v20 = vmax.f32 %v1825_v39, %v1913_v28  ;;  %v2245_v39 = vmul.f32 24.0, %v4445_v9 }
 0x2f7   : > { %v2188_v49 = vsub.f32 %v2124_v35, %v2156_v50  ;;  %v2189_v51 = vsub.f32 %v2125_v60, %v2157_v63  ;;  %v2669_v1 = vunpack.c.l.bf16 %v2653_v36  ;;  %v1914_v8 = vmul.f32 0.01, %v1874_v40 }
 0x2f8   : > { %v1828_v59 = vadd.f32 %v1827_v44, %v3964_v15  ;;  %v2042_v7 = vadd.f32 %v3962_v14, %v2041_v45  ;;  %v2748_v50 = vmul.f32 %v2732_v48, %v2732_v48  ;;  %v2244_v60 = vmul.f32 24.0, %v4446_v0 }
 0x2f9   : > { %v2220_v11 = vpack.c.bf16 %v2189_v51, %v2188_v49  ;;  %v2701_v21 = vsub.f32 %v2669_v1, %v2685_v61  ;;  %v1946_v22 = vmax.f32 %v1874_v40, %v1914_v8 }
 0x2fa   : > { %v2078_v52 = vmul.f32 0.01, %v2042_v7  ;;  %v1915_v44 = vmul.f32 0.01, %v1828_v59  ;;  %v4032_v1 = vpack.c.bf16 %v2245_v39, %v2244_v60 }
 0x2fb   : > { %v2717_v63 = vpack.c.bf16 %v2701_v21, %v2701_v21  ;;  %v2109_v35 = vpack.c.bf16 %v1946_v22, %v1945_v20  ;;  %v2364_v36 = vunpack.c.l.bf16 %v2220_v11  ;;  %v2365_v61 = vunpack.c.h.bf16 %v2220_v11 }
 0x2fc   : > { %v2094_v45 = vmax.f32 %v2042_v7, %v2078_v52  ;;  %v1876_v18 = vpop.f32.mrf.mxu3  ;;  %v1947_v9 = vmax.f32 %v1828_v59, %v1915_v44 }
 0x2fd   : > { %v2126_v28 = vunpack.c.l.bf16 %v2109_v35  ;;  %v2127_v40 = vunpack.c.h.bf16 %v2109_v35  ;;  %v1877_v30 = vadd.f32 %v1876_v18, %v3968_v23  ;;  %v2733_v46 = vunpack.c.l.bf16 %v2717_v63 }
 0x2fe   : > { %v2654_v48 = vpack.c.bf16 %v2094_v45, %v2094_v45  ;;  %v1829_v49 = vpop.f32.mrf.mxu1  ;;  %v2043_v51 = vpop.f32.mrf.mxu2  ;;  %v2396_v8 = vmul.f32 %v2364_v36, %v2364_v36  ;;  %v2397_v20 = vmul.f32 %v2365_v61, %v2365_v61 }
 0x2ff   : > { %v2190_v7 = vsub.f32 %v2126_v28, %v2158_v55  ;;  %v2191_v21 = vsub.f32 %v2127_v40, %v2159_v3  ;;  %v1916_v22 = vmul.f32 0.01, %v1877_v30  ;;  %v1830_v11 = vadd.f32 %v1829_v49, %v3964_v15 }
 0x300   : > { %v2670_v52 = vunpack.c.l.bf16 %v2654_v48  ;;  %v2044_v18 = vadd.f32 %v3962_v14, %v2043_v51  ;;  %v2749_v63 = vmul.f32 %v2733_v46, %v2733_v46  ;;  %v2428_v35 = vpack.c.bf16 %v2397_v20, %v2396_v8 }
 0x301   : > { %v2221_v45 = vpack.c.bf16 %v2191_v21, %v2190_v7  ;;  %v1948_v0 = vmax.f32 %v1877_v30, %v1916_v22  ;;  %v1917_v28 = vmul.f32 0.01, %v1830_v11 }
 0x302   : > { %v2702_v36 = vsub.f32 %v2670_v52, %v2686_v12  ;;  %v2079_v55 = vmul.f32 0.01, %v2044_v18  ;;  %v2764_v61 = vpack.c.bf16 %v2749_v63, %v2748_v50  ;;  %v2444_v48 = vunpack.c.l.bf16 %v2428_v35 }
 0x303   : > { %v2110_v3 = vpack.c.bf16 %v1948_v0, %v1947_v9  ;;  %v2366_v40 = vunpack.c.l.bf16 %v2221_v45  ;;  %v2367_v20 = vunpack.c.h.bf16 %v2221_v45 }
 0x304   : > { %v2095_v49 = vmax.f32 %v2044_v18, %v2079_v55  ;;  %v1878_v51 = vpop.f32.mrf.mxu3  ;;  %v2773_v46 = vunpack.c.h.bf16 %v2764_v61  ;;  %v2772_v8 = vunpack.c.l.bf16 %v2764_v61  ;;  %v2718_v59 = vpack.c.bf16 %v2702_v36, %v2702_v36  ;;  %v4046_v18 = vld [vmem:[%s3507_s30 + $0x28] sm:$0xff] }
 0x305   : > { %v2128_v60 = vunpack.c.l.bf16 %v2110_v3  ;;  %v2129_v44 = vunpack.c.h.bf16 %v2110_v3  ;;  %v1879_v26 = vadd.f32 %v1878_v51, %v3968_v23  ;;  %v2398_v30 = vmul.f32 %v2366_v40, %v2366_v40 }
 0x306   : > { %v2655_v12 = vpack.c.bf16 %v2095_v49, %v2095_v49  ;;  %v2046_v39 = vpop.f32.mrf.mxu2  ;;  %v2791_v50 = vsel %vm1112_vm0, %v2773_v46, 0.0  ;;  %v2788_v0 = vsel %vm1112_vm0, %v2772_v8, 0.0  ;;  %v1832_v9 = vpop.f32.mrf.mxu1  ;;  %v2399_v36 = vmul.f32 %v2367_v20, %v2367_v20 }
 0x307   : > { %v2192_v7 = vsub.f32 %v2128_v60, %v2160_v37  ;;  %v2193_v21 = vsub.f32 %v2129_v44, %v2161_v38  ;;  %v1918_v22 = vmul.f32 0.01, %v1879_v26  ;;  %v2047_v52 = vadd.f32 %v3962_v14, %v2046_v39  ;;  %2792 = vadd.xlane.f32.xlu2 %v2791_v50  ;;  %2789 = vadd.xlane.f32.xlu1 %v2788_v0 }
 0x308   : > { %v2671_v63 = vunpack.c.l.bf16 %v2655_v12  ;;  %v1833_v45 = vadd.f32 %v1832_v9, %v3964_v15  ;;  %v2445_v55 = vunpack.c.h.bf16 %v2428_v35  ;;  %v1949_v3 = vmax.f32 %v1830_v11, %v1917_v28 }
 0x309   : > { %v2222_v61 = vpack.c.bf16 %v2193_v21, %v2192_v7  ;;  %v1950_v40 = vmax.f32 %v1879_v26, %v1918_v22  ;;  %v2080_v49 = vmul.f32 0.01, %v2047_v52  ;;  %v2429_v37 = vpack.c.bf16 %v2399_v36, %v2398_v30 }
 0x30a   : > { %v2703_v29 = vsub.f32 %v2671_v63, %v2687_v13  ;;  %v2166_v38 = vunpack.c.l.bf16 %v4046_v18  ;;  %v2289_v51 = vunpack.c.h.bf16 %v3996_v25  ;;  %v4053_v46 = vunpack.c.l.bf16 %v2718_v59 }
 0x30b   : > { %v2111_v8 = vpack.c.bf16 %v1950_v40, %v1949_v3  ;;  %v2096_v60 = vmax.f32 %v2047_v52, %v2080_v49  ;;  %v2508_v20 = vmul.f32 %v2476_v24, %v2444_v48  ;;  %v1919_v35 = vmul.f32 0.01, %v1833_v45 }
 0x30c   : > { %v1881_v44 = vpop.f32.mrf.mxu3  ;;  %v2446_v11 = vunpack.c.l.bf16 %v2429_v37  ;;  %v2447_v28 = vunpack.c.h.bf16 %v2429_v37  ;;  %v2509_v27 = vmul.f32 %v2477_v32, %v2445_v55  ;;  %v2368_v13 = vunpack.c.l.bf16 %v2222_v61 }
 0x30d   : > { %v2369_v26 = vunpack.c.h.bf16 %v2222_v61  ;;  %v2130_v12 = vunpack.c.l.bf16 %v2111_v8  ;;  %v2131_v39 = vunpack.c.h.bf16 %v2111_v8  ;;  %v2719_v50 = vpack.c.bf16 %v2703_v29, %v2703_v29 }
 0x30e   : > { %v2656_v0 = vpack.c.bf16 %v2096_v60, %v2096_v60  ;;  %v1882_v59 = vadd.f32 %v1881_v44, %v3968_v23  ;;  %v1834_v9 = vpop.f32.mrf.mxu1  ;;  %v2048_v30 = vpop.f32.mrf.mxu2  ;;  %v2510_v24 = vmul.f32 %v2478_v47, %v2446_v11  ;;  %v4455_v7 = vunpack.c.h.bf16 %v3978_v31 }
 0x30f   : > { %v2194_v48 = vsub.f32 %v2130_v12, %v2162_v4  ;;  %v1835_v32 = vadd.f32 %v1834_v9, %v3964_v15  ;;  %v2049_v21 = vadd.f32 %v3962_v14, %v2048_v30  ;;  %v2511_v63 = vmul.f32 %v2479_v62, %v2447_v28 }
 0x310   : > { %v2195_v56 = vsub.f32 %v2131_v39, %v4455_v7  ;;  %v2672_v22 = vunpack.c.l.bf16 %v2656_v0  ;;  %v1920_v52 = vmul.f32 0.01, %v1882_v59  ;;  %v4070_v36 = vpack.c.bf16 %v2510_v24, %v2508_v20 }
 0x311   : > { %v1951_v61 = vmax.f32 %v1833_v45, %v1919_v35  ;;  %v1921_v47 = vmul.f32 0.01, %v1835_v32  ;;  %v2081_v3 = vmul.f32 0.01, %v2049_v21  ;;  %v4456_v4 = vunpack.c.l.bf16 %v3615_v53 }
 0x312   : > { %v2223_v55 = vpack.c.bf16 %v2195_v56, %v2194_v48  ;;  %v1952_v31 = vmax.f32 %v1882_v59, %v1920_v52  ;;  %v2541_v49 = vpack.c.bf16 %v2511_v63, %v2509_v27  ;;  %v2556_v29 = vunpack.c.l.bf16 %v4070_v36 }
 0x313   : > { %v2704_v40 = vsub.f32 %v2672_v22, %v4456_v4  ;;  %v4075_v37 = vmul.f32 %v2368_v13, %v2368_v13  ;;  %v4077_v8 = vmul.f32 %v2369_v26, %v2369_v26  ;;  %v2735_v60 = vunpack.c.l.bf16 %v2719_v50 }
 0x314   : > { %v2097_v19 = vmax.f32 %v2049_v21, %v2081_v3  ;;  %v2370_v62 = vunpack.c.l.bf16 %v2223_v55  ;;  %v2112_v20 = vpack.c.bf16 %v1952_v31, %v1951_v61  ;;  %v2557_v44 = vunpack.c.l.bf16 %v2541_v49  ;;  %v1883_v11 = vpop.f32.mrf.mxu3 }
 0x315   : > { %v2167_v45 = vunpack.c.h.bf16 %v4046_v18  ;;  %v2371_v35 = vunpack.c.h.bf16 %v2223_v55  ;;  %v1953_v28 = vmax.f32 %v1835_v32, %v1921_v47  ;;  %v1884_v12 = vadd.f32 %v1883_v11, %v3968_v23 }
 0x316   : > { %v2657_v53 = vpack.c.bf16 %v2097_v19, %v2097_v19  ;;  %v2720_v27 = vpack.c.bf16 %v2704_v40, %v2704_v40  ;;  %v2132_v39 = vunpack.c.l.bf16 %v2112_v20  ;;  %v2133_v0 = vunpack.c.h.bf16 %v2112_v20  ;;  %v2051_v59 = vpop.f32.mrf.mxu2  ;;  %v1837_v26 = vpop.f32.mrf.mxu1 }
 0x317   : > { %v2588_v13 = vadd.f32 %v2557_v44, %v2556_v29  ;;  %v1922_v50 = vmul.f32 0.01, %v1884_v12  ;;  %v2246_v30 = vmul.f32 24.0, %v2166_v38  ;;  %v2052_v24 = vadd.f32 %v3962_v14, %v2051_v59 }
 0x318   : > { %v2673_v9 = vunpack.c.l.bf16 %v2657_v53  ;;  %v4084_v48 = vmul.f32 %v2370_v62, %v2370_v62  ;;  %v4457_v7 = vunpack.c.l.bf16 %v4003_v41  ;;  %v4458_v32 = vunpack.c.h.bf16 %v4003_v41 }
 0x319   : > { %2589 = vadd.xlane.f32.xlu0 %v2588_v13  ;;  %v2247_v22 = vmul.f32 24.0, %v2167_v45  ;;  %v4090_v52 = vmul.f32 %v2371_v35, %v2371_v35  ;;  %v4459_v63 = vunpack.c.l.bf16 %v3617_v54  ;;  %v1954_v61 = vmax.f32 %v1884_v12, %v1922_v50 }
 0x31a   : > { %v2196_v56 = vsub.f32 %v2132_v39, %v4457_v7  ;;  %v2197_v21 = vsub.f32 %v2133_v0, %v4458_v32  ;;  %v2082_v47 = vmul.f32 0.01, %v2052_v24  ;;  %v2750_v4 = vmul.f32 %v4053_v46, %v4053_v46 }
 0x31b   : > { %v2705_v55 = vsub.f32 %v2673_v9, %v4459_v63  ;;  %v2751_v40 = vmul.f32 %v2735_v60, %v2735_v60  ;;  %v1838_v31 = vadd.f32 %v1837_v26, %v3964_v15  ;;  %v2113_v29 = vpack.c.bf16 %v1954_v61, %v1953_v28  ;;  %v652_v60 = vld [vmem:[%s3507_s30 + $0x30] sm:$0xff] }
 0x31c   : > { %v2224_v3 = vpack.c.bf16 %v2197_v21, %v2196_v56  ;;  %v2098_v41 = vmax.f32 %v2052_v24, %v2082_v47  ;;  %v2558_v19 = vunpack.c.h.bf16 %v4070_v36  ;;  %v2559_v62 = vunpack.c.h.bf16 %v2541_v49  ;;  %v1886_v39 = vpop.f32.mrf.mxu3 }
 0x31d   : > { %v4098_v20 = vunpack.c.l.bf16 %v2720_v27  ;;  %v4100_v44 = vpack.c.bf16 %v2247_v22, %v2246_v30  ;;  %v2690_v54 = vunpack.c.l.bf16 %v3583_v16  ;;  %v4103_v11 = vpack.c.bf16 %v2751_v40, %v2750_v4 }
 0x31e   : > { %v2721_v35 = vpack.c.bf16 %v2705_v55, %v2705_v55  ;;  %v2134_v53 = vunpack.c.l.bf16 %v2113_v29  ;;  %v2135_v12 = vunpack.c.h.bf16 %v2113_v29  ;;  %v2658_v46 = vpack.c.bf16 %v2098_v41, %v2098_v41  ;;  %v1839_v49 = vpop.f32.mrf.mxu1  ;;  %v2053_v9 = vpop.f32.mrf.mxu2 }
 0x31f   : > { %v2372_v0 = vunpack.c.l.bf16 %v2224_v3  ;;  %v2373_v28 = vunpack.c.h.bf16 %v2224_v3  ;;  %v2775_v13 = vunpack.c.h.bf16 %v4103_v11  ;;  %v1923_v36 = vmul.f32 0.01, %v1838_v31 }
 0x320   : > { %v2198_v27 = vsub.f32 %v2134_v53, %v2166_v38  ;;  %v2199_v59 = vsub.f32 %v2135_v12, %v2167_v45  ;;  %v2674_v26 = vunpack.c.l.bf16 %v2658_v46  ;;  %v2591_v16 = vadd.f32 %v2559_v62, %v2558_v19 }
 0x321   : > { %v2797_v50 = vsel %vm1112_vm0, %v2775_v13, 0.0  ;;  %v1887_v30 = vadd.f32 %v1886_v39, %v3968_v23  ;;  %v2168_v24 = vunpack.c.l.bf16 %v652_v60  ;;  %v2169_v7 = vunpack.c.h.bf16 %v652_v60 }
 0x322   : > { %v4111_v56 = vunpack.c.l.bf16 %v2721_v35  ;;  %v2225_v32 = vpack.c.bf16 %v2199_v59, %v2198_v27  ;;  %v4113_v21 = vsub.f32 %v2674_v26, %v2690_v54  ;;  %2798 = vadd.xlane.f32.xlu1 %v2797_v50  ;;  %2592 = vadd.xlane.f32.xlu0 %v2591_v16  ;;  %v4116_v18 = vadd.f32 %v1839_v49, %v3964_v15 }
 0x323   : > { %v1924_v38 = vmul.f32 0.01, %v1887_v30  ;;  %v2248_v45 = vmul.f32 24.0, %v2168_v24  ;;  %v2249_v22 = vmul.f32 24.0, %v2169_v7  ;;  %v2054_v63 = vadd.f32 %v3962_v14, %v2053_v9 }
 0x324   : > { %v4119_v55 = vmul.f32 %v2372_v0, %v2372_v0  ;;  %v4121_v61 = vmul.f32 %v2373_v28, %v2373_v28  ;;  %v1955_v47 = vmax.f32 %v1838_v31, %v1923_v36  ;;  %v2691_v3 = vunpack.c.l.bf16 %v3585_v17 }
 0x325   : > { %v2374_v4 = vunpack.c.l.bf16 %v2225_v32  ;;  %v1956_v40 = vmax.f32 %v1887_v30, %v1924_v38  ;;  %v2083_v29 = vmul.f32 0.01, %v2054_v63  ;;  %v2290_v41 = vunpack.c.l.bf16 %v4017_v10  ;;  %v653_v38 = vld [vmem:[%s3507_s30 + $0x38] sm:$0xff] }
 0x326   : > { %v2375_v19 = vunpack.c.h.bf16 %v2225_v32  ;;  %v2722_v62 = vpack.c.bf16 %v4113_v21, %v4113_v21  ;;  %v4127_v54 = vpack.c.bf16 %v2249_v22, %v2248_v45  ;;  %v1925_v35 = vmul.f32 0.01, %v4116_v18 }
 0x327   : > { %v2114_v53 = vpack.c.bf16 %v1956_v40, %v1955_v47  ;;  %v2099_v12 = vmax.f32 %v2054_v63, %v2083_v29  ;;  %v2291_v46 = vunpack.c.h.bf16 %v4017_v10  ;;  %v2320_v17 = vadd.f32 1.0, %v2288_v2  ;;  %v1888_v2 = vpop.f32.mrf.mxu3  ;;  %v1842_v63 = vpop.f32.mrf.mxu1 }
 0x328   : > { %v2321_v31 = vadd.f32 1.0, %v2289_v51  ;;  %v2322_v60 = vadd.f32 1.0, %v2290_v41  ;;  %v2430_v39 = vpack.c.bf16 %v4077_v8, %v4075_v37  ;;  %v2431_v0 = vpack.c.bf16 %v4090_v52, %v4084_v48 }
 0x329   : > { %v2136_v28 = vunpack.c.l.bf16 %v2114_v53  ;;  %v2137_v13 = vunpack.c.h.bf16 %v2114_v53  ;;  %v2659_v36 = vpack.c.bf16 %v2099_v12, %v2099_v12  ;;  %v2323_v49 = vadd.f32 1.0, %v2291_v46 }
 0x32a   : > { %v2350_v27 = vpack.c.bf16 %v2321_v31, %v2320_v17  ;;  %v2448_v59 = vunpack.c.l.bf16 %v2430_v39  ;;  %v2449_v10 = vunpack.c.h.bf16 %v2430_v39  ;;  %v2450_v26 = vunpack.c.l.bf16 %v2431_v0 }
 0x32b   : > { %v2200_v16 = vsub.f32 %v2136_v28, %v2168_v24  ;;  %v2201_v25 = vsub.f32 %v2137_v13, %v2169_v7  ;;  %v2675_v51 = vunpack.c.l.bf16 %v2659_v36  ;;  %v2351_v9 = vpack.c.bf16 %v2323_v49, %v2322_v60 }
 0x32c   : > { %v2451_v50 = vunpack.c.h.bf16 %v2431_v0  ;;  %v2480_v30 = vunpack.c.l.bf16 %v2350_v27  ;;  %v2481_v37 = vunpack.c.h.bf16 %v2350_v27  ;;  %v2774_v8 = vunpack.c.l.bf16 %v4103_v11  ;;  %v2056_v11 = vpop.f32.mrf.mxu2 }
 0x32d   : > { %v4140_v48 = vmul.f32 %v2374_v4, %v2374_v4  ;;  %v2226_v52 = vpack.c.bf16 %v2201_v25, %v2200_v16  ;;  %v2482_v32 = vunpack.c.l.bf16 %v2351_v9  ;;  %v2483_v21 = vunpack.c.h.bf16 %v2351_v9 }
 0x32e   : > { %v4143_v45 = vmul.f32 %v2375_v19, %v2375_v19  ;;  %v4145_v22 = vsub.f32 %v2675_v51, %v2691_v3  ;;  %v2794_v24 = vsel %vm1112_vm0, %v2774_v8, 0.0  ;;  %v1889_v7 = vadd.f32 %v1888_v2, %v3968_v23 }
 0x32f   : > { %v2376_v47 = vunpack.c.l.bf16 %v2226_v52  ;;  %v2377_v40 = vunpack.c.h.bf16 %v2226_v52  ;;  %v2512_v29 = vmul.f32 %v2480_v30, %v2448_v59  ;;  %v2514_v41 = vmul.f32 %v2482_v32, %v2450_v26  ;;  %2795 = vadd.xlane.f32.xlu0 %v2794_v24  ;;  %v1844_v24 = vpop.f32.mrf.mxu1 }
 0x330   : > { %v2513_v4 = vmul.f32 %v2481_v37, %v2449_v10  ;;  %v2515_v53 = vmul.f32 %v2483_v21, %v2451_v50  ;;  %v1926_v12 = vmul.f32 0.01, %v1889_v7  ;;  %v2170_v46 = vunpack.c.l.bf16 %v653_v38  ;;  %v1891_v10 = vpop.f32.mrf.mxu3  ;;  %v654_v37 = vld [vmem:[%s3507_s30 + $0x40] sm:$0xff] }
 0x331   : > { %v4149_v17 = vunpack.c.l.bf16 %v2722_v62  ;;  %v1957_v3 = vmax.f32 %v4116_v18, %v1925_v35  ;;  %v2542_v19 = vpack.c.bf16 %v2514_v41, %v2512_v29  ;;  %v2171_v31 = vunpack.c.h.bf16 %v653_v38 }
 0x332   : > { %v4152_v60 = vmul.f32 %v2376_v47, %v2376_v47  ;;  %v2723_v39 = vpack.c.bf16 %v4145_v22, %v4145_v22  ;;  %v2543_v0 = vpack.c.bf16 %v2515_v53, %v2513_v4  ;;  %v1958_v28 = vmax.f32 %v1889_v7, %v1926_v12 }
 0x333   : > { %v4156_v13 = vmul.f32 %v2377_v40, %v2377_v40  ;;  %v2560_v36 = vunpack.c.l.bf16 %v2542_v19  ;;  %v2250_v49 = vmul.f32 24.0, %v2170_v46  ;;  %v2057_v27 = vadd.f32 %v3962_v14, %v2056_v11 }
 0x334   : > { %v2561_v62 = vunpack.c.l.bf16 %v2543_v0  ;;  %v2115_v59 = vpack.c.bf16 %v1958_v28, %v1957_v3  ;;  %v2752_v18 = vmul.f32 %v4098_v20, %v4098_v20  ;;  %v2753_v35 = vmul.f32 %v4111_v56, %v4111_v56  ;;  %v2058_v40 = vpop.f32.mrf.mxu2 }
 0x335   : > { %v2251_v26 = vmul.f32 24.0, %v2171_v31  ;;  %v2084_v2 = vmul.f32 0.01, %v2057_v27  ;;  %v2692_v16 = vunpack.c.l.bf16 %v3603_v42  ;;  %v1843_v25 = vadd.f32 %v1842_v63, %v3964_v15 }
 0x336   : > { %v2594_v51 = vadd.f32 %v2561_v62, %v2560_v36  ;;  %v2138_v9 = vunpack.c.l.bf16 %v2115_v59  ;;  %v2139_v50 = vunpack.c.h.bf16 %v2115_v59  ;;  %v2766_v30 = vpack.c.bf16 %v2753_v35, %v2752_v18 }
 0x337   : > { %v2100_v8 = vmax.f32 %v2057_v27, %v2084_v2  ;;  %v1927_v52 = vmul.f32 0.01, %v1843_v25  ;;  %v2562_v32 = vunpack.c.h.bf16 %v2542_v19  ;;  %v1892_v20 = vadd.f32 %v1891_v10, %v3968_v23 }
 0x338   : > { %2595 = vadd.xlane.f32.xlu1 %v2594_v51  ;;  %v2202_v21 = vsub.f32 %v2138_v9, %v2170_v46  ;;  %v2203_v56 = vsub.f32 %v2139_v50, %v2171_v31  ;;  %v2776_v38 = vunpack.c.l.bf16 %v2766_v30  ;;  %v2777_v22 = vunpack.c.h.bf16 %v2766_v30 }
 0x339   : > { %v2660_v7 = vpack.c.bf16 %v2100_v8, %v2100_v8  ;;  %v2563_v42 = vunpack.c.h.bf16 %v2543_v0  ;;  %v1928_v47 = vmul.f32 0.01, %v1892_v20  ;;  %v2172_v63 = vunpack.c.l.bf16 %v654_v37 }
 0x33a   : > { %v2227_v29 = vpack.c.bf16 %v2203_v56, %v2202_v21  ;;  %v2800_v41 = vsel %vm1112_vm0, %v2776_v38, 0.0  ;;  %v2803_v11 = vsel %vm1112_vm0, %v2777_v22, 0.0  ;;  %v2173_v4 = vunpack.c.h.bf16 %v654_v37 }
 0x33b   : > { %v2676_v53 = vunpack.c.l.bf16 %v2660_v7  ;;  %2801 = vadd.xlane.f32.xlu2 %v2800_v41  ;;  %v1959_v12 = vmax.f32 %v1843_v25, %v1927_v52  ;;  %2804 = vadd.xlane.f32.xlu0 %v2803_v11  ;;  %v1960_v46 = vmax.f32 %v1892_v20, %v1928_v47  ;;  %v4170_v3 = vadd.f32 %v1844_v24, %v3964_v15  ;;  %v655_v11 = vld [vmem:[%s3507_s30 + $0x48] sm:$0xff] }
 0x33c   : > { %v4172_v19 = vunpack.c.l.bf16 %v2723_v39  ;;  %v4174_v31 = vpack.c.bf16 %v2251_v26, %v2250_v49  ;;  %v2378_v0 = vunpack.c.l.bf16 %v2227_v29  ;;  %v2059_v28 = vadd.f32 %v3962_v14, %v2058_v40 }
 0x33d   : > { %v2379_v36 = vunpack.c.h.bf16 %v2227_v29  ;;  %v2597_v27 = vadd.f32 %v2563_v42, %v2562_v32  ;;  %v2116_v62 = vpack.c.bf16 %v1960_v46, %v1959_v12  ;;  %v2252_v59 = vmul.f32 24.0, %v2172_v63  ;;  %v1893_v32 = vpop.f32.mrf.mxu3 }
 0x33e   : > { %v2708_v18 = vsub.f32 %v2676_v53, %v2692_v16  ;;  %v2253_v35 = vmul.f32 24.0, %v2173_v4  ;;  %v1929_v10 = vmul.f32 0.01, %v4170_v3  ;;  %v2085_v2 = vmul.f32 0.01, %v2059_v28 }
 0x33f   : > { %v4178_v25 = vmul.f32 %v2378_v0, %v2378_v0  ;;  %v2140_v51 = vunpack.c.l.bf16 %v2116_v62  ;;  %v2141_v9 = vunpack.c.h.bf16 %v2116_v62  ;;  %v2693_v39 = vunpack.c.l.bf16 %v3605_v43 }
 0x340   : > { %2598 = vadd.xlane.f32.xlu1 %v2597_v27  ;;  %v2101_v49 = vmax.f32 %v2059_v28, %v2085_v2  ;;  %v2292_v26 = vunpack.c.l.bf16 %v4032_v1  ;;  %v2293_v50 = vunpack.c.h.bf16 %v4032_v1  ;;  %v2294_v30 = vunpack.c.l.bf16 %v4100_v44 }
 0x341   : > { %v4184_v37 = vmul.f32 %v2379_v36, %v2379_v36  ;;  %v2204_v16 = vsub.f32 %v2140_v51, %v2172_v63  ;;  %v2205_v8 = vsub.f32 %v2141_v9, %v2173_v4  ;;  %v2295_v52 = vunpack.c.h.bf16 %v4100_v44  ;;  %v1847_v4 = vpop.f32.mrf.mxu1 }
 0x342   : > { %v2661_v20 = vpack.c.bf16 %v2101_v49, %v2101_v49  ;;  %v2324_v21 = vadd.f32 1.0, %v2292_v26  ;;  %v2325_v56 = vadd.f32 1.0, %v2293_v50  ;;  %v2326_v43 = vadd.f32 1.0, %v2294_v30 }
 0x343   : > { %v2228_v38 = vpack.c.bf16 %v2205_v8, %v2204_v16  ;;  %v2327_v22 = vadd.f32 1.0, %v2295_v52  ;;  %v2432_v24 = vpack.c.bf16 %v4121_v61, %v4119_v55  ;;  %v2433_v1 = vpack.c.bf16 %v4143_v45, %v4140_v48 }
 0x344   : > { %v4191_v7 = vpack.c.bf16 %v2253_v35, %v2252_v59  ;;  %v2677_v42 = vunpack.c.l.bf16 %v2661_v20  ;;  %v2352_v47 = vpack.c.bf16 %v2325_v56, %v2324_v21  ;;  %v1894_v44 = vadd.f32 %v1893_v32, %v3968_v23  ;;  %v2061_v59 = vpop.f32.mrf.mxu2 }
 0x345   : > { %v2724_v63 = vpack.c.bf16 %v2708_v18, %v2708_v18  ;;  %v2380_v40 = vunpack.c.l.bf16 %v2228_v38  ;;  %v2353_v29 = vpack.c.bf16 %v2327_v22, %v2326_v43  ;;  %v2452_v41 = vunpack.c.l.bf16 %v2432_v24 }
 0x346   : > { %v1961_v53 = vmax.f32 %v4170_v3, %v1929_v10  ;;  %v2453_v12 = vunpack.c.h.bf16 %v2432_v24  ;;  %v2454_v46 = vunpack.c.l.bf16 %v2433_v1  ;;  %v2455_v55 = vunpack.c.h.bf16 %v2433_v1 }
 0x347   : > { %v2381_v61 = vunpack.c.h.bf16 %v2228_v38  ;;  %v2709_v0 = vsub.f32 %v2677_v42, %v2693_v39  ;;  %v2484_v48 = vunpack.c.l.bf16 %v2352_v47  ;;  %v2485_v45 = vunpack.c.h.bf16 %v2352_v47  ;;  %v656_v42 = vld [vmem:[%s3507_s30 + $0x50] sm:$0xff]  ;;  %v1896_v47 = vpop.f32.mrf.mxu3 }
 0x348   : > { %v2486_v28 = vunpack.c.l.bf16 %v2353_v29  ;;  %v2487_v36 = vunpack.c.h.bf16 %v2353_v29  ;;  %v1930_v27 = vmul.f32 0.01, %v1894_v44  ;;  %v2174_v62 = vunpack.c.l.bf16 %v655_v11 }
 0x349   : > { %v4196_v18 = vunpack.c.l.bf16 %v2724_v63  ;;  %v4198_v35 = vmul.f32 %v2380_v40, %v2380_v40  ;;  %v2516_v2 = vmul.f32 %v2484_v48, %v2452_v41  ;;  %v2175_v51 = vunpack.c.h.bf16 %v655_v11  ;;  %v1849_v41 = vpop.f32.mrf.mxu1 }
 0x34a   : > { %v2517_v9 = vmul.f32 %v2485_v45, %v2453_v12  ;;  %v2518_v3 = vmul.f32 %v2486_v28, %v2454_v46  ;;  %v2519_v10 = vmul.f32 %v2487_v36, %v2455_v55  ;;  %v1962_v49 = vmax.f32 %v1894_v44, %v1930_v27 }
 0x34b   : > { %v4200_v26 = vmul.f32 %v2381_v61, %v2381_v61  ;;  %v2725_v39 = vpack.c.bf16 %v2709_v0, %v2709_v0  ;;  %v1848_v50 = vadd.f32 %v1847_v4, %v3964_v15  ;;  %v2062_v30 = vadd.f32 %v3962_v14, %v2061_v59 }
 0x34c   : > { %v2544_v16 = vpack.c.bf16 %v2518_v3, %v2516_v2  ;;  %v2545_v8 = vpack.c.bf16 %v2519_v10, %v2517_v9  ;;  %v2117_v52 = vpack.c.bf16 %v1962_v49, %v1961_v53  ;;  %v2254_v32 = vmul.f32 24.0, %v2174_v62 }
 0x34d   : > { %v2255_v20 = vmul.f32 24.0, %v2175_v51  ;;  %v2086_v21 = vmul.f32 0.01, %v2062_v30  ;;  %v2754_v56 = vmul.f32 %v4149_v17, %v4149_v17  ;;  %v2755_v43 = vmul.f32 %v4172_v19, %v4172_v19 }
 0x34e   : > { %v2564_v38 = vunpack.c.l.bf16 %v2544_v16  ;;  %v2565_v22 = vunpack.c.l.bf16 %v2545_v8  ;;  %v2142_v24 = vunpack.c.l.bf16 %v2117_v52  ;;  %v2143_v1 = vunpack.c.h.bf16 %v2117_v52 }
 0x34f   : > { %v1931_v44 = vmul.f32 0.01, %v1848_v50  ;;  %v2102_v63 = vmax.f32 %v2062_v30, %v2086_v21  ;;  %v2694_v40 = vunpack.c.l.bf16 %v3624_v5  ;;  %v4210_v29 = vpack.c.bf16 %v2755_v43, %v2754_v56  ;;  %v2063_v5 = vpop.f32.mrf.mxu2 }
 0x350   : > { %v2600_v11 = vadd.f32 %v2565_v22, %v2564_v38  ;;  %v2206_v4 = vsub.f32 %v2142_v24, %v2174_v62  ;;  %v2207_v53 = vsub.f32 %v2143_v1, %v2175_v51  ;;  %v2566_v17 = vunpack.c.h.bf16 %v2544_v16 }
 0x351   : > { %v2662_v12 = vpack.c.bf16 %v2102_v63, %v2102_v63  ;;  %v2778_v19 = vunpack.c.l.bf16 %v4210_v29  ;;  %v1897_v46 = vadd.f32 %v1896_v47, %v3968_v23  ;;  %v2176_v55 = vunpack.c.l.bf16 %v656_v42 }
 0x352   : > { %2601 = vadd.xlane.f32.xlu2 %v2600_v11  ;;  %v2229_v61 = vpack.c.bf16 %v2207_v53, %v2206_v4  ;;  %v2567_v0 = vunpack.c.h.bf16 %v2545_v8  ;;  %v2177_v48 = vunpack.c.h.bf16 %v656_v42  ;;  %v4215_v45 = vadd.f32 %v1849_v41, %v3964_v15 }
 0x353   : > { %v4217_v28 = vunpack.c.l.bf16 %v2725_v39  ;;  %v2678_v36 = vunpack.c.l.bf16 %v2662_v12  ;;  %v2806_v27 = vsel %vm1112_vm0, %v2778_v19, 0.0  ;;  %v1932_v62 = vmul.f32 0.01, %v1897_v46 }
 0x354   : > { %v4220_v59 = vpack.c.bf16 %v2255_v20, %v2254_v32  ;;  %v2382_v2 = vunpack.c.l.bf16 %v2229_v61  ;;  %v2383_v51 = vunpack.c.h.bf16 %v2229_v61  ;;  %v1963_v9 = vmax.f32 %v1848_v50, %v1931_v44  ;;  %2807 = vadd.xlane.f32.xlu1 %v2806_v27  ;;  %v657_v27 = vld [vmem:[%s3507_s30 + $0x58] sm:$0xff] }
 0x355   : > { %v1964_v3 = vmax.f32 %v1897_v46, %v1932_v62  ;;  %v2256_v10 = vmul.f32 24.0, %v2176_v55  ;;  %v2257_v49 = vmul.f32 24.0, %v2177_v48  ;;  %v2064_v30 = vadd.f32 %v3962_v14, %v2063_v5 }
 0x356   : > { %v2710_v16 = vsub.f32 %v2678_v36, %v2694_v40  ;;  %v2603_v8 = vadd.f32 %v2567_v0, %v2566_v17  ;;  %v4224_v39 = vmul.f32 0.01, %v4215_v45  ;;  %v2695_v52 = vunpack.c.l.bf16 %v3626_v6  ;;  %v1898_v6 = vpop.f32.mrf.mxu3 }
 0x357   : > { %v4227_v21 = vmul.f32 %v2382_v2, %v2382_v2  ;;  %v4229_v32 = vmul.f32 %v2383_v51, %v2383_v51  ;;  %v2118_v20 = vpack.c.bf16 %v1964_v3, %v1963_v9  ;;  %v2087_v56 = vmul.f32 0.01, %v2064_v30  ;;  %v2066_v62 = vpop.f32.mrf.mxu2 }
 0x358   : > { %v2296_v50 = vunpack.c.l.bf16 %v4127_v54  ;;  %v2297_v43 = vunpack.c.h.bf16 %v4127_v54  ;;  %v2298_v38 = vunpack.c.l.bf16 %v4174_v31  ;;  %v2299_v14 = vunpack.c.h.bf16 %v4174_v31 }
 0x359   : > { %v2144_v22 = vunpack.c.l.bf16 %v2118_v20  ;;  %v2145_v24 = vunpack.c.h.bf16 %v2118_v20  ;;  %v4235_v1 = vpack.c.bf16 %v2257_v49, %v2256_v10  ;;  %v2103_v42 = vmax.f32 %v2064_v30, %v2087_v56 }
 0x35a   : > { %2604 = vadd.xlane.f32.xlu2 %v2603_v8  ;;  %v2779_v47 = vunpack.c.h.bf16 %v4210_v29  ;;  %v2328_v44 = vadd.f32 1.0, %v2296_v50  ;;  %v2329_v63 = vadd.f32 1.0, %v2297_v43  ;;  %v2330_v40 = vadd.f32 1.0, %v2298_v38 }
 0x35b   : > { %v2208_v41 = vsub.f32 %v2144_v22, %v2176_v55  ;;  %v2209_v11 = vsub.f32 %v2145_v24, %v2177_v48  ;;  %v2663_v54 = vpack.c.bf16 %v2103_v42, %v2103_v42  ;;  %v2331_v4 = vadd.f32 1.0, %v2299_v14  ;;  %v1852_v55 = vpop.f32.mrf.mxu1 }
 0x35c   : > { %v2354_v53 = vpack.c.bf16 %v2329_v63, %v2328_v44  ;;  %v2434_v31 = vpack.c.bf16 %v4156_v13, %v4152_v60  ;;  %v2435_v17 = vpack.c.bf16 %v4184_v37, %v4178_v25  ;;  %v1899_v12 = vadd.f32 %v1898_v6, %v3968_v23 }
 0x35d   : > { %v2230_v19 = vpack.c.bf16 %v2209_v11, %v2208_v41  ;;  %v1965_v29 = vmax.f32 %v4215_v45, %v4224_v39  ;;  %v2679_v46 = vunpack.c.l.bf16 %v2663_v54  ;;  %v2355_v61 = vpack.c.bf16 %v2331_v4, %v2330_v40  ;;  %v658_v4 = vld [vmem:[%s3507_s30 + $0x60] sm:$0xff] }
 0x35e   : > { %v2456_v0 = vunpack.c.l.bf16 %v2434_v31  ;;  %v2457_v48 = vunpack.c.h.bf16 %v2434_v31  ;;  %v2458_v5 = vunpack.c.l.bf16 %v2435_v17  ;;  %v2459_v36 = vunpack.c.h.bf16 %v2435_v17 }
 0x35f   : > { %v2726_v2 = vpack.c.bf16 %v2710_v16, %v2710_v16  ;;  %v2384_v60 = vunpack.c.l.bf16 %v2230_v19  ;;  %v2809_v13 = vsel %vm1112_vm0, %v2779_v47, 0.0  ;;  %v2488_v25 = vunpack.c.l.bf16 %v2354_v53 }
 0x360   : > { %v2489_v37 = vunpack.c.h.bf16 %v2354_v53  ;;  %v2490_v51 = vunpack.c.l.bf16 %v2355_v61  ;;  %v2491_v9 = vunpack.c.h.bf16 %v2355_v61  ;;  %v1934_v3 = vmul.f32 0.01, %v1899_v12  ;;  %v1901_v53 = vpop.f32.mrf.mxu3 }
 0x361   : > { %v2385_v10 = vunpack.c.h.bf16 %v2230_v19  ;;  %v2711_v45 = vsub.f32 %v2679_v46, %v2695_v52  ;;  %v2520_v49 = vmul.f32 %v2488_v25, %v2456_v0  ;;  %v2178_v30 = vunpack.c.l.bf16 %v657_v27  ;;  %v4255_v52 = vld [vmem:[%s4440_s17] ss:$0 sm:$0xff] }
 0x362   : > { %2810 = vadd.xlane.f32.xlu2 %v2809_v13  ;;  %v2521_v8 = vmul.f32 %v2489_v37, %v2457_v48  ;;  %v2522_v39 = vmul.f32 %v2490_v51, %v2458_v5  ;;  %v2523_v20 = vmul.f32 %v2491_v9, %v2459_v36  ;;  %v1966_v56 = vmax.f32 %v1899_v12, %v1934_v3  ;;  %v2068_v48 = vpop.f32.mrf.mxu2 }
 0x363   : > { %v4247_v50 = vunpack.c.l.bf16 %v2726_v2  ;;  %v4249_v16 = vmul.f32 %v2384_v60, %v2384_v60  ;;  %v2179_v43 = vunpack.c.h.bf16 %v657_v27  ;;  %v1853_v38 = vadd.f32 %v1852_v55, %v3964_v15 }
 0x364   : > { %v2546_v14 = vpack.c.bf16 %v2522_v39, %v2520_v49  ;;  %v2547_v22 = vpack.c.bf16 %v2523_v20, %v2521_v8  ;;  %v2119_v24 = vpack.c.bf16 %v1966_v56, %v1965_v29  ;;  %v2067_v42 = vadd.f32 %v4255_v52, %v2066_v62  ;;  %v1854_v29 = vpop.f32.mrf.mxu1 }
 0x365   : > { %v4258_v6 = vmul.f32 %v2385_v10, %v2385_v10  ;;  %v2727_v47 = vpack.c.bf16 %v2711_v45, %v2711_v45  ;;  %v2258_v44 = vmul.f32 24.0, %v2178_v30  ;;  %v2259_v63 = vmul.f32 24.0, %v2179_v43 }
 0x366   : > { %v2570_v40 = vunpack.c.h.bf16 %v2546_v14  ;;  %v2571_v41 = vunpack.c.h.bf16 %v2547_v22  ;;  %v2568_v11 = vunpack.c.l.bf16 %v2546_v14  ;;  %v2569_v54 = vunpack.c.l.bf16 %v2547_v22 }
 0x367   : > { %v2146_v31 = vunpack.c.l.bf16 %v2119_v24  ;;  %v2147_v17 = vunpack.c.h.bf16 %v2119_v24  ;;  %v1935_v12 = vmul.f32 0.01, %v1853_v38  ;;  %v2756_v19 = vmul.f32 %v4196_v18, %v4196_v18 }
 0x368   : > { %v2609_v46 = vadd.f32 %v2571_v41, %v2570_v40  ;;  %v2606_v61 = vadd.f32 %v2569_v54, %v2568_v11  ;;  %v2088_v55 = vmul.f32 0.01, %v2067_v42  ;;  %v2757_v0 = vmul.f32 %v4217_v28, %v4217_v28 }
 0x369   : > { %v2210_v5 = vsub.f32 %v2146_v31, %v2178_v30  ;;  %v2211_v36 = vsub.f32 %v2147_v17, %v2179_v43  ;;  %v1902_v27 = vadd.f32 %v1901_v53, %v3968_v23  ;;  %v2180_v62 = vunpack.c.l.bf16 %v658_v4 }
 0x36a   : > { %2610 = vadd.xlane.f32.xlu1 %v2609_v46  ;;  %2607 = vadd.xlane.f32.xlu0 %v2606_v61  ;;  %v2104_v2 = vmax.f32 %v2067_v42, %v2088_v55  ;;  %v2768_v60 = vpack.c.bf16 %v2757_v0, %v2756_v19  ;;  %v2181_v13 = vunpack.c.h.bf16 %v658_v4  ;;  %v4267_v18 = vadd.f32 %v1854_v29, %v3964_v15 }
 0x36b   : > { %v2231_v25 = vpack.c.bf16 %v2211_v36, %v2210_v5  ;;  %v1936_v37 = vmul.f32 0.01, %v1902_v27  ;;  %v2260_v51 = vmul.f32 24.0, %v2180_v62  ;;  %v2069_v9 = vadd.f32 %v4255_v52, %v2068_v48 }
 0x36c   : > { %v2664_v28 = vpack.c.bf16 %v2104_v2, %v2104_v2  ;;  %v2781_v3 = vunpack.c.h.bf16 %v2768_v60  ;;  %v2780_v10 = vunpack.c.l.bf16 %v2768_v60  ;;  %v2261_v45 = vmul.f32 24.0, %v2181_v13 }
 0x36d   : > { %v4270_v49 = vunpack.c.l.bf16 %v2727_v47  ;;  %v2386_v30 = vunpack.c.l.bf16 %v2231_v25  ;;  %v1967_v8 = vmax.f32 %v1853_v38, %v1935_v12  ;;  %v1968_v39 = vmax.f32 %v1902_v27, %v1936_v37  ;;  %v1903_v12 = vpop.f32.mrf.mxu3 }
 0x36e   : > { %v4272_v20 = vpack.c.bf16 %v2259_v63, %v2258_v44  ;;  %v2387_v56 = vunpack.c.h.bf16 %v2231_v25  ;;  %v2680_v43 = vunpack.c.l.bf16 %v2664_v28  ;;  %v2696_v14 = vunpack.c.l.bf16 %v3640_v33 }
 0x36f   : > { %v2815_v22 = vsel %vm1112_vm0, %v2781_v3, 0.0  ;;  %v2812_v24 = vsel %vm1112_vm0, %v2780_v10, 0.0  ;;  %v2120_v42 = vpack.c.bf16 %v1968_v39, %v1967_v8  ;;  %v4278_v40 = vmul.f32 0.01, %v4267_v18  ;;  %v659_v10 = vld [vmem:[%s3507_s30 + $0x68] sm:$0xff] }
 0x370   : > { %v4280_v41 = vmul.f32 %v2386_v30, %v2386_v30  ;;  %v4282_v47 = vpack.c.bf16 %v2261_v45, %v2260_v51  ;;  %v2089_v38 = vmul.f32 0.01, %v2069_v9  ;;  %v2300_v44 = vunpack.c.l.bf16 %v4191_v7 }
 0x371   : > { %v2148_v63 = vunpack.c.l.bf16 %v2120_v42  ;;  %v2149_v11 = vunpack.c.h.bf16 %v2120_v42  ;;  %v2301_v54 = vunpack.c.h.bf16 %v4191_v7  ;;  %v2302_v33 = vunpack.c.l.bf16 %v4220_v59 }
 0x372   : > { %v2712_v4 = vsub.f32 %v2680_v43, %v2696_v14  ;;  %2816 = vadd.xlane.f32.xlu1 %v2815_v22  ;;  %2813 = vadd.xlane.f32.xlu0 %v2812_v24  ;;  %v2105_v53 = vmax.f32 %v2069_v9, %v2089_v38  ;;  %v2303_v31 = vunpack.c.h.bf16 %v4220_v59  ;;  %v2332_v17 = vadd.f32 1.0, %v2300_v44  ;;  %v1857_v9 = vpop.f32.mrf.mxu1 }
 0x373   : > { %v2212_v19 = vsub.f32 %v2148_v63, %v2180_v62  ;;  %v2213_v29 = vsub.f32 %v2149_v11, %v2181_v13  ;;  %v2333_v46 = vadd.f32 1.0, %v2301_v54  ;;  %v2334_v61 = vadd.f32 1.0, %v2302_v33 }
 0x374   : > { %v2665_v55 = vpack.c.bf16 %v2105_v53, %v2105_v53  ;;  %v2697_v0 = vunpack.c.l.bf16 %v3642_v34  ;;  %v2335_v48 = vadd.f32 1.0, %v2303_v31  ;;  %v2436_v7 = vpack.c.bf16 %v4200_v26, %v4198_v35 }
 0x375   : > { %v2232_v5 = vpack.c.bf16 %v2213_v29, %v2212_v19  ;;  %v2356_v36 = vpack.c.bf16 %v2333_v46, %v2332_v17  ;;  %v2437_v27 = vpack.c.bf16 %v4229_v32, %v4227_v21  ;;  %v1904_v59 = vadd.f32 %v1903_v12, %v3968_v23  ;;  %v2071_v21 = vpop.f32.mrf.mxu2 }
 0x376   : > { %v2728_v2 = vpack.c.bf16 %v2712_v4, %v2712_v4  ;;  %v2681_v62 = vunpack.c.l.bf16 %v2665_v55  ;;  %v2357_v60 = vpack.c.bf16 %v2335_v48, %v2334_v61  ;;  %v2460_v13 = vunpack.c.l.bf16 %v2436_v7  ;;  %v1906_v55 = vpop.f32.mrf.mxu3 }
 0x377   : > { %v4294_v25 = vmul.f32 %v2387_v56, %v2387_v56  ;;  %v2461_v37 = vunpack.c.h.bf16 %v2436_v7  ;;  %v2462_v34 = vunpack.c.l.bf16 %v2437_v27  ;;  %v2463_v51 = vunpack.c.h.bf16 %v2437_v27 }
 0x378   : > { %v1969_v35 = vmax.f32 %v4267_v18, %v4278_v40  ;;  %v2492_v26 = vunpack.c.l.bf16 %v2356_v36  ;;  %v2493_v28 = vunpack.c.h.bf16 %v2356_v36  ;;  %v2494_v3 = vunpack.c.l.bf16 %v2357_v60  ;;  %v660_v36 = vld [vmem:[%s3507_s30 + $0x70] sm:$0xff] }
 0x379   : > { %v2388_v32 = vunpack.c.l.bf16 %v2232_v5  ;;  %v2389_v45 = vunpack.c.h.bf16 %v2232_v5  ;;  %v2495_v30 = vunpack.c.h.bf16 %v2357_v60  ;;  %v1938_v8 = vmul.f32 0.01, %v1904_v59 }
 0x37a   : > { %v4299_v39 = vunpack.c.l.bf16 %v2728_v2  ;;  %v2713_v56 = vsub.f32 %v2681_v62, %v2697_v0  ;;  %v2524_v43 = vmul.f32 %v2492_v26, %v2460_v13  ;;  %v2526_v14 = vmul.f32 %v2494_v3, %v2462_v34  ;;  %v1859_v60 = vpop.f32.mrf.mxu1 }
 0x37b   : > { %v2525_v22 = vmul.f32 %v2493_v28, %v2461_v37  ;;  %v2527_v24 = vmul.f32 %v2495_v30, %v2463_v51  ;;  %v1970_v42 = vmax.f32 %v1904_v59, %v1938_v8  ;;  %v2182_v38 = vunpack.c.l.bf16 %v659_v10 }
 0x37c   : > { %v2548_v44 = vpack.c.bf16 %v2526_v14, %v2524_v43  ;;  %v2183_v18 = vunpack.c.h.bf16 %v659_v10  ;;  %v1858_v40 = vadd.f32 %v1857_v9, %v3964_v15  ;;  %v2072_v63 = vadd.f32 %v4255_v52, %v2071_v21 }
 0x37d   : > { %v4303_v11 = vmul.f32 %v2388_v32, %v2388_v32  ;;  %v4305_v54 = vmul.f32 %v2389_v45, %v2389_v45  ;;  %v2549_v33 = vpack.c.bf16 %v2527_v24, %v2525_v22  ;;  %v2121_v4 = vpack.c.bf16 %v1970_v42, %v1969_v35  ;;  %v2073_v9 = vpop.f32.mrf.mxu2 }
 0x37e   : > { %v2729_v53 = vpack.c.bf16 %v2713_v56, %v2713_v56  ;;  %v2572_v31 = vunpack.c.l.bf16 %v2548_v44  ;;  %v2574_v17 = vunpack.c.h.bf16 %v2548_v44  ;;  %v2090_v12 = vmul.f32 0.01, %v2072_v63 }
 0x37f   : > { %v2573_v19 = vunpack.c.l.bf16 %v2549_v33  ;;  %v2575_v29 = vunpack.c.h.bf16 %v2549_v33  ;;  %v2150_v46 = vunpack.c.l.bf16 %v2121_v4  ;;  %v2151_v61 = vunpack.c.h.bf16 %v2121_v4 }
 0x380   : > { %v2262_v0 = vmul.f32 24.0, %v2182_v38  ;;  %v2263_v48 = vmul.f32 24.0, %v2183_v18  ;;  %v1939_v7 = vmul.f32 0.01, %v1858_v40  ;;  %v2106_v5 = vmax.f32 %v2072_v63, %v2090_v12 }
 0x381   : > { %v2612_v27 = vadd.f32 %v2573_v19, %v2572_v31  ;;  %v2615_v59 = vadd.f32 %v2575_v29, %v2574_v17  ;;  %v2214_v2 = vsub.f32 %v2150_v46, %v2182_v38  ;;  %v2215_v62 = vsub.f32 %v2151_v61, %v2183_v18 }
 0x382   : > { %v2666_v13 = vpack.c.bf16 %v2106_v5, %v2106_v5  ;;  %v2758_v37 = vmul.f32 %v4247_v50, %v4247_v50  ;;  %v2759_v34 = vmul.f32 %v4270_v49, %v4270_v49  ;;  %v1907_v51 = vadd.f32 %v1906_v55, %v3968_v23 }
 0x383   : > { %2613 = vadd.xlane.f32.xlu2 %v2612_v27  ;;  %2616 = vadd.xlane.f32.xlu0 %v2615_v59  ;;  %v2233_v35 = vpack.c.bf16 %v2215_v62, %v2214_v2  ;;  %v2698_v26 = vunpack.c.l.bf16 %v3652_v57  ;;  %v2184_v28 = vunpack.c.l.bf16 %v660_v36  ;;  %v2185_v3 = vunpack.c.h.bf16 %v660_v36 }
 0x384   : > { %v2682_v10 = vunpack.c.l.bf16 %v2666_v13  ;;  %v2769_v21 = vpack.c.bf16 %v2759_v34, %v2758_v37  ;;  %v1940_v32 = vmul.f32 0.01, %v1907_v51  ;;  %v4315_v45 = vadd.f32 %v1859_v60, %v3964_v15 }
 0x385   : > { %v4317_v50 = vunpack.c.l.bf16 %v2729_v53  ;;  %v2390_v30 = vunpack.c.l.bf16 %v2233_v35  ;;  %v2391_v49 = vunpack.c.h.bf16 %v2233_v35  ;;  %v2074_v8 = vadd.f32 %v4255_v52, %v2073_v9 }
 0x386   : > { %v1971_v56 = vmax.f32 %v1858_v40, %v1939_v7  ;;  %v2782_v43 = vunpack.c.l.bf16 %v2769_v21  ;;  %v2783_v14 = vunpack.c.h.bf16 %v2769_v21  ;;  %v1972_v22 = vmax.f32 %v1907_v51, %v1940_v32 }
 0x387   : > { %v4320_v24 = vpack.c.bf16 %v2263_v48, %v2262_v0  ;;  %v2714_v57 = vsub.f32 %v2682_v10, %v2698_v26  ;;  %v2264_v42 = vmul.f32 24.0, %v2184_v28  ;;  %v2265_v38 = vmul.f32 24.0, %v2185_v3 }
 0x388   : > { %v4322_v44 = vmul.f32 %v2390_v30, %v2390_v30  ;;  %v4324_v18 = vmul.f32 %v2391_v49, %v2391_v49  ;;  %v2122_v15 = vpack.c.bf16 %v1972_v22, %v1971_v56  ;;  %v4327_v63 = vmul.f32 0.01, %v4315_v45 }
 0x389   : > { %v2818_v33 = vsel %vm1112_vm0, %v2782_v43, 0.0  ;;  %v2821_v52 = vsel %vm1112_vm0, %v2783_v14, 0.0  ;;  %v2091_v40 = vmul.f32 0.01, %v2074_v8  ;;  %v2304_v4 = vunpack.c.l.bf16 %v4235_v1 }
 0x38a   : > { %v2152_v53 = vunpack.c.l.bf16 %v2122_v15  ;;  %v2153_v31 = vunpack.c.h.bf16 %v2122_v15  ;;  %v2699_v17 = vunpack.c.l.bf16 %v3654_v58  ;;  %v2305_v12 = vunpack.c.h.bf16 %v4235_v1 }
 0x38b   : > { %2819 = vadd.xlane.f32.xlu2 %v2818_v33  ;;  %2822 = vadd.xlane.f32.xlu0 %v2821_v52  ;;  %v2107_v19 = vmax.f32 %v2074_v8, %v2091_v40  ;;  %v2306_v29 = vunpack.c.l.bf16 %v4272_v20  ;;  %v2307_v46 = vunpack.c.h.bf16 %v4272_v20  ;;  %v2336_v61 = vadd.f32 1.0, %v2304_v4  ;;  %v1908_v20 = vpop.f32.mrf.mxu3 }
 0x38c   : > { %v2216_v55 = vsub.f32 %v2152_v53, %v2184_v28  ;;  %v2217_v0 = vsub.f32 %v2153_v31, %v2185_v3  ;;  %v2337_v48 = vadd.f32 1.0, %v2305_v12  ;;  %v2438_v7 = vpack.c.bf16 %v4258_v6, %v4249_v16 }
 0x38d   : > { %v2667_v5 = vpack.c.bf16 %v2107_v19, %v2107_v19  ;;  %v2338_v36 = vadd.f32 1.0, %v2306_v29  ;;  %v2339_v27 = vadd.f32 1.0, %v2307_v46  ;;  %v2439_v58 = vpack.c.bf16 %v4294_v25, %v4280_v41  ;;  %v661_v41 = vld [vmem:[%s3507_s30 + $0x78] sm:$0xff] }
 0x38e   : > { %v4340_v1 = vpack.c.bf16 %v2217_v0, %v2216_v55  ;;  %v2358_v59 = vpack.c.bf16 %v2337_v48, %v2336_v61  ;;  %v2464_v2 = vunpack.c.l.bf16 %v2438_v7  ;;  %v2465_v62 = vunpack.c.h.bf16 %v2438_v7 }
 0x38f   : > { %v2683_v60 = vunpack.c.l.bf16 %v2667_v5  ;;  %v2359_v13 = vpack.c.bf16 %v2339_v27, %v2338_v36  ;;  %v2466_v37 = vunpack.c.l.bf16 %v2439_v58  ;;  %v2467_v34 = vunpack.c.h.bf16 %v2439_v58 }
 0x390   : > { %v2730_v51 = vpack.c.bf16 %v2714_v57, %v2714_v57  ;;  %v2392_v16 = vunpack.c.l.bf16 %v4340_v1  ;;  %v2496_v6 = vunpack.c.l.bf16 %v2358_v59  ;;  %v2497_v9 = vunpack.c.h.bf16 %v2358_v59  ;;  %v2790_v59 = vpop.xlane.xlu1 %2789 }
 0x391   : > { %v2715_v35 = vsub.f32 %v2683_v60, %v2699_v17  ;;  %v2498_v26 = vunpack.c.l.bf16 %v2359_v13  ;;  %v2499_v28 = vunpack.c.h.bf16 %v2359_v13  ;;  %v1909_v25 = vadd.f32 %v1908_v20, %v3968_v23  ;;  %v4359_v17 = vpop.xlane.xlu0 %2589 }
 0x392   : > { %v4345_v3 = vpack.c.bf16 %v2265_v38, %v2264_v42  ;;  %v1973_v10 = vmax.f32 %v4315_v45, %v4327_v63  ;;  %v2528_v21 = vmul.f32 %v2496_v6, %v2464_v2  ;;  %v2529_v32 = vmul.f32 %v2497_v9, %v2465_v62 }
 0x393   : > { %v2731_v30 = vpack.c.bf16 %v2715_v35, %v2715_v35  ;;  %v2530_v49 = vmul.f32 %v2498_v26, %v2466_v37  ;;  %v2531_v8 = vmul.f32 %v2499_v28, %v2467_v34  ;;  %v1942_v56 = vmul.f32 0.01, %v1909_v25 }
 0x394   : > { %v4349_v43 = vunpack.c.l.bf16 %v2730_v51  ;;  %v2393_v14 = vunpack.c.h.bf16 %v4340_v1  ;;  %v2186_v22 = vunpack.c.l.bf16 %v661_v41  ;;  %v2761_v57 = vmul.f32 %v4317_v50, %v4317_v50 }
 0x395   : > { %v4354_v23 = vmul.f32 %v2392_v16, %v2392_v16  ;;  %v2550_v42 = vpack.c.bf16 %v2530_v49, %v2528_v21  ;;  %v2551_v38 = vpack.c.bf16 %v2531_v8, %v2529_v32  ;;  %v1974_v15 = vmax.f32 %v1909_v25, %v1942_v56 }
 0x396   : > { %v2747_v45 = vunpack.c.l.bf16 %v2731_v30  ;;  %v2187_v63 = vunpack.c.h.bf16 %v661_v41  ;;  %v2760_v33 = vmul.f32 %v4299_v39, %v4299_v39  ;;  %v2308_v52 = vunpack.c.l.bf16 %v4282_v47 }
 0x397   : > { %v2578_v40 = vunpack.c.h.bf16 %v2550_v42  ;;  %v2579_v4 = vunpack.c.h.bf16 %v2551_v38  ;;  %v2576_v53 = vunpack.c.l.bf16 %v2550_v42  ;;  %v2577_v31 = vunpack.c.l.bf16 %v2551_v38 }
 0x398   : > { %v2123_v12 = vpack.c.bf16 %v1974_v15, %v1973_v10  ;;  %v2266_v50 = vmul.f32 24.0, %v2186_v22  ;;  %v4361_v19 = vpack.c.bf16 %v2761_v57, %v2760_v33  ;;  %v2309_v29 = vunpack.c.h.bf16 %v4282_v47  ;;  %v2799_v38 = vpop.xlane.xlu1 %2798 }
 0x399   : > { %v2621_v46 = vadd.f32 %v2579_v4, %v2578_v40  ;;  %v2618_v61 = vadd.f32 %v2577_v31, %v2576_v53  ;;  %v2310_v55 = vunpack.c.l.bf16 %v4320_v24  ;;  %v2311_v39 = vunpack.c.h.bf16 %v4320_v24  ;;  %v2593_v32 = vpop.xlane.xlu0 %2592 }
 0x39a   : > { %v2154_v0 = vunpack.c.l.bf16 %v2123_v12  ;;  %v2155_v48 = vunpack.c.h.bf16 %v2123_v12  ;;  %v2267_v7 = vmul.f32 24.0, %v2187_v63  ;;  %v2340_v5 = vadd.f32 1.0, %v2308_v52 }
 0x39b   : > { %2622 = vadd.xlane.f32.xlu2 %v2621_v46  ;;  %2619 = vadd.xlane.f32.xlu1 %v2618_v61  ;;  %v2341_v36 = vadd.f32 1.0, %v2309_v29  ;;  %v2342_v27 = vadd.f32 1.0, %v2310_v55  ;;  %v2343_v58 = vadd.f32 1.0, %v2311_v39  ;;  %v2440_v1 = vpack.c.bf16 %v4305_v54, %v4303_v11  ;;  %v2793_v39 = vpop.xlane.xlu2 %2792 }
 0x39c   : > { %v2218_v47 = vsub.f32 %v2154_v0, %v2186_v22  ;;  %v2219_v2 = vsub.f32 %v2155_v48, %v2187_v63  ;;  %v2784_v62 = vunpack.c.l.bf16 %v4361_v19  ;;  %v2441_v24 = vpack.c.bf16 %v4324_v18, %v4322_v44 }
 0x39d   : > { %v2360_v20 = vpack.c.bf16 %v2341_v36, %v2340_v5  ;;  %v2361_v60 = vpack.c.bf16 %v2343_v58, %v2342_v27  ;;  %v2468_v13 = vunpack.c.l.bf16 %v2440_v1  ;;  %v2469_v37 = vunpack.c.h.bf16 %v2440_v1 }
 0x39e   : > { %v2235_v34 = vpack.c.bf16 %v2219_v2, %v2218_v47  ;;  %v2283_v51 = vpack.c.bf16 %v2267_v7, %v2266_v50  ;;  %v2470_v16 = vunpack.c.l.bf16 %v2441_v24  ;;  %v2471_v6 = vunpack.c.h.bf16 %v2441_v24 }
 0x39f   : > { %v2500_v9 = vunpack.c.l.bf16 %v2360_v20  ;;  %v2501_v35 = vunpack.c.h.bf16 %v2360_v20  ;;  %v2502_v26 = vunpack.c.l.bf16 %v2361_v60  ;;  %v2503_v11 = vunpack.c.h.bf16 %v2361_v60 }
 0x3a0   : > { %v2425_v54 = vmul.f32 %v2393_v14, %v2393_v14  ;;  %v2394_v28 = vunpack.c.l.bf16 %v2235_v34  ;;  %v2395_v41 = vunpack.c.h.bf16 %v2235_v34  ;;  %v2824_v25 = vsel %vm1112_vm0, %v2784_v62, 0.0 }
 0x3a1   : > { %v2532_v10 = vmul.f32 %v2500_v9, %v2468_v13  ;;  %v2533_v21 = vmul.f32 %v2501_v35, %v2469_v37  ;;  %v2534_v44 = vmul.f32 %v2502_v26, %v2470_v16  ;;  %v2535_v18 = vmul.f32 %v2503_v11, %v2471_v6 }
 0x3a2   : > { %v2426_v30 = vmul.f32 %v2394_v28, %v2394_v28  ;;  %v2427_v49 = vmul.f32 %v2395_v41, %v2395_v41  ;;  %v2763_v8 = vmul.f32 %v2747_v45, %v2747_v45  ;;  %v2312_v56 = vunpack.c.l.bf16 %v4345_v3  ;;  %v2796_v20 = vpop.xlane.xlu0 %2795 }
 0x3a3   : > { %2825 = vadd.xlane.f32.xlu1 %v2824_v25  ;;  %v2552_v22 = vpack.c.bf16 %v2534_v44, %v2532_v10  ;;  %v2553_v57 = vpack.c.bf16 %v2535_v18, %v2533_v21  ;;  %v2313_v42 = vunpack.c.h.bf16 %v4345_v3  ;;  %v2314_v14 = vunpack.c.l.bf16 %v2283_v51 }
 0x3a4   : > { %v2762_v15 = vmul.f32 %v4349_v43, %v4349_v43  ;;  %v2315_v63 = vunpack.c.h.bf16 %v2283_v51  ;;  %v2344_v33 = vadd.f32 1.0, %v2312_v56  ;;  %v2442_v52 = vpack.c.bf16 %v2425_v54, %v4354_v23 }
 0x3a5   : > { %v2582_v40 = vunpack.c.h.bf16 %v2552_v22  ;;  %v2583_v4 = vunpack.c.h.bf16 %v2553_v57  ;;  %v2580_v53 = vunpack.c.l.bf16 %v2552_v22  ;;  %v2581_v45 = vunpack.c.l.bf16 %v2553_v57 }
 0x3a6   : > { %v2836_v31 = vmul.f32 0.8, %v2790_v59  ;;  %v2345_v12 = vadd.f32 1.0, %v2313_v42  ;;  %v2346_v50 = vadd.f32 1.0, %v2314_v14  ;;  %v2347_v29 = vadd.f32 1.0, %v2315_v63 }
 0x3a7   : > { %v2627_v46 = vadd.f32 %v2583_v4, %v2582_v40  ;;  %v2624_v61 = vadd.f32 %v2581_v45, %v2580_v53  ;;  %v2771_v3 = vpack.c.bf16 %v2763_v8, %v2762_v15  ;;  %v2443_v55 = vpack.c.bf16 %v2427_v49, %v2426_v30 }
 0x3a8   : > { %v2362_v0 = vpack.c.bf16 %v2345_v12, %v2344_v33  ;;  %v2363_v43 = vpack.c.bf16 %v2347_v29, %v2346_v50  ;;  %v2472_v48 = vunpack.c.l.bf16 %v2442_v52  ;;  %v2473_v7 = vunpack.c.h.bf16 %v2442_v52 }
 0x3a9   : > { %2625 = vadd.xlane.f32.xlu0 %v2624_v61  ;;  %v2474_v23 = vunpack.c.l.bf16 %v2443_v55  ;;  %v2475_v5 = vunpack.c.h.bf16 %v2443_v55  ;;  %v2636_v36 = vmul.f32 0.5, %v4359_v17  ;;  %v2837_v47 = vmul.f32 0.8, %v2793_v39 }
 0x3aa   : > { %v2504_v27 = vunpack.c.l.bf16 %v2362_v0  ;;  %v2505_v58 = vunpack.c.h.bf16 %v2362_v0  ;;  %v2506_v1 = vunpack.c.l.bf16 %v2363_v43  ;;  %v2507_v59 = vunpack.c.h.bf16 %v2363_v43 }
 0x3ab   : > { %2628 = vadd.xlane.f32.xlu1 %v2627_v46  ;;  %v2852_v2 = vadd.f32 %v2836_v31, %v2636_v36  ;;  %v2637_v62 = vmul.f32 0.5, %v2593_v32  ;;  %v2596_v24 = vpop.xlane.xlu1 %2595  ;;  %v2787_v16 = vunpack.c.h.bf16 %v2771_v3  ;;  %v2838_v35 = vmul.f32 0.8, %v2796_v20 }
 0x3ac   : > { %v2536_v60 = vmul.f32 %v2504_v27, %v2472_v48  ;;  %v2537_v13 = vmul.f32 %v2505_v58, %v2473_v7  ;;  %v2538_v17 = vmul.f32 %v2506_v1, %v2474_v23  ;;  %v2539_v37 = vmul.f32 %v2507_v59, %v2475_v5 }
 0x3ad   : > { %2869 = vst.msk [vmem:[%s4382_s27] sm:$0xff] %vm2868_vm2, %v2852_v2  ;;  %v2853_v34 = vadd.f32 %v2837_v47, %v2637_v62  ;;  %v2638_v51 = vmul.f32 0.5, %v2596_v24  ;;  %v2833_v25 = vsel %vm1112_vm0, %v2787_v16, 0.0  ;;  %v2839_v18 = vmul.f32 0.8, %v2799_v38 }
 0x3ae   : > { %v2554_v6 = vpack.c.bf16 %v2538_v17, %v2536_v60  ;;  %v2555_v9 = vpack.c.bf16 %v2539_v37, %v2537_v13  ;;  %v2785_v49 = vunpack.c.h.bf16 %v4361_v19  ;;  %v2786_v8 = vunpack.c.l.bf16 %v2771_v3  ;;  %v2802_v57 = vpop.xlane.xlu2 %2801  ;;  %v2805_v38 = vpop.xlane.xlu0 %2804 }
 0x3af   : > { %2870 = vst.msk [vmem:[%s4382_s27 + $0x8] sm:$0xff] %vm2868_vm2, %v2853_v34  ;;  %v2854_v41 = vadd.f32 %v2838_v35, %v2638_v51  ;;  %v2840_v14 = vmul.f32 0.8, %v2802_v57  ;;  %v2841_v33 = vmul.f32 0.8, %v2805_v38 }
 0x3b0   : > { %v2584_v26 = vunpack.c.l.bf16 %v2554_v6  ;;  %v2585_v11 = vunpack.c.l.bf16 %v2555_v9  ;;  %v2586_v54 = vunpack.c.h.bf16 %v2554_v6  ;;  %v2587_v28 = vunpack.c.h.bf16 %v2555_v9 }
 0x3b1   : > { %2871 = vst.msk [vmem:[%s4382_s27 + $0x10] sm:$0xff] %vm2868_vm2, %v2854_v41  ;;  %v2827_v56 = vsel %vm1112_vm0, %v2785_v49, 0.0  ;;  %v2830_v22 = vsel %vm1112_vm0, %v2786_v8, 0.0 }
 0x3b2   : > { %v2630_v10 = vadd.f32 %v2585_v11, %v2584_v26  ;;  %v2633_v21 = vadd.f32 %v2587_v28, %v2586_v54 }
 0x3b3   : > { %2834 = vadd.xlane.f32.xlu1 %v2833_v25  ;;  %v2599_v44 = vpop.xlane.xlu1 %2598 }
 0x3b4   : > { %2631 = vadd.xlane.f32.xlu2 %v2630_v10  ;;  %2634 = vadd.xlane.f32.xlu0 %v2633_v21  ;;  %v2639_v32 = vmul.f32 0.5, %v2599_v44 }
 0x3b6   : > { %v2855_v30 = vadd.f32 %v2839_v18, %v2639_v32 }
 0x3b8   : > { %2872 = vst.msk [vmem:[%s4382_s27 + $0x18] sm:$0xff] %vm2868_vm2, %v2855_v30 }
 0x3bc   : > { %2828 = vadd.xlane.f32.xlu2 %v2827_v56  ;;  %2831 = vadd.xlane.f32.xlu0 %v2830_v22 }
 0x3c5   : > { %v2602_v42 = vpop.xlane.xlu2 %2601 }
 0x3c6   : > { %v2640_v15 = vmul.f32 0.5, %v2602_v42 }
 0x3c7   : > { %v2808_v4 = vpop.xlane.xlu1 %2807 }
 0x3c8   : > { %v2856_v63 = vadd.f32 %v2840_v14, %v2640_v15  ;;  %v2842_v50 = vmul.f32 0.8, %v2808_v4 }
 0x3ca   : > { %2873 = vst.msk [vmem:[%s4382_s27 + $0x20] sm:$0xff] %vm2868_vm2, %v2856_v63 }
 0x3cd   : > { %v2605_v19 = vpop.xlane.xlu2 %2604 }
 0x3ce   : > { %v2641_v52 = vmul.f32 0.5, %v2605_v19 }
 0x3d0   : > { %v2857_v40 = vadd.f32 %v2841_v33, %v2641_v52 }
 0x3d2   : > { %2874 = vst.msk [vmem:[%s4382_s27 + $0x28] sm:$0xff] %vm2868_vm2, %v2857_v40 }
 0x3d5   : > { %v2811_v53 = vpop.xlane.xlu2 %2810 }
 0x3d6   : > { %v2843_v45 = vmul.f32 0.8, %v2811_v53 }
 0x3dd   : > { %v2611_v31 = vpop.xlane.xlu1 %2610  ;;  %v2608_v12 = vpop.xlane.xlu0 %2607 }
 0x3de   : > { %v2643_v29 = vmul.f32 0.5, %v2611_v31  ;;  %v2642_v46 = vmul.f32 0.5, %v2608_v12 }
 0x3e0   : > { %v2859_v61 = vadd.f32 %v2843_v45, %v2643_v29  ;;  %v2858_v3 = vadd.f32 %v2842_v50, %v2642_v46 }
 0x3e2   : > { %2876 = vst.msk [vmem:[%s4382_s27 + $0x38] sm:$0xff] %vm2868_vm2, %v2859_v61 }
 0x3e3   : > { %2875 = vst.msk [vmem:[%s4382_s27 + $0x30] sm:$0xff] %vm2868_vm2, %v2858_v3 }
 0x3e5   : > { %v2814_v55 = vpop.xlane.xlu0 %2813  ;;  %v2817_v39 = vpop.xlane.xlu1 %2816 }
 0x3e6   : > { %v2845_v48 = vmul.f32 0.8, %v2817_v39  ;;  %v2844_v7 = vmul.f32 0.8, %v2814_v55 }
 0x3f6   : > { %v2614_v0 = vpop.xlane.xlu2 %2613  ;;  %v2617_v43 = vpop.xlane.xlu0 %2616 }
 0x3f7   : > { %v2644_v23 = vmul.f32 0.5, %v2614_v0  ;;  %v2645_v5 = vmul.f32 0.5, %v2617_v43 }
 0x3f9   : > { %v2860_v36 = vadd.f32 %v2844_v7, %v2644_v23  ;;  %v2861_v27 = vadd.f32 %v2845_v48, %v2645_v5 }
 0x3fb   : > { %2877 = vst.msk [vmem:[%s4382_s27 + $0x40] sm:$0xff] %vm2868_vm2, %v2860_v36 }
 0x3fc   : > { %2878 = vst.msk [vmem:[%s4382_s27 + $0x48] sm:$0xff] %vm2868_vm2, %v2861_v27 }
 0x3fe   : > { %v2820_v58 = vpop.xlane.xlu2 %2819  ;;  %v2823_v1 = vpop.xlane.xlu0 %2822 }
 0x3ff   : > { %v2846_v2 = vmul.f32 0.8, %v2820_v58  ;;  %v2847_v62 = vmul.f32 0.8, %v2823_v1 }
 0x40e   : > { %v2623_v59 = vpop.xlane.xlu2 %2622  ;;  %v2620_v47 = vpop.xlane.xlu1 %2619 }
 0x40f   : > { %v2647_v24 = vmul.f32 0.5, %v2623_v59  ;;  %v2646_v20 = vmul.f32 0.5, %v2620_v47 }
 0x411   : > { %v2863_v60 = vadd.f32 %v2847_v62, %v2647_v24  ;;  %v2862_v13 = vadd.f32 %v2846_v2, %v2646_v20 }
 0x413   : > { %2880 = vst.msk [vmem:[%s4382_s27 + $0x58] sm:$0xff] %vm2868_vm2, %v2863_v60 }
 0x414   : > { %2879 = vst.msk [vmem:[%s4382_s27 + $0x50] sm:$0xff] %vm2868_vm2, %v2862_v13 }
 0x416   : > { %v2826_v17 = vpop.xlane.xlu1 %2825 }
 0x417   : > { %v2848_v34 = vmul.f32 0.8, %v2826_v17 }
 0x41c   : > { %v2626_v37 = vpop.xlane.xlu0 %2625 }
 0x41d   : > { %v2648_v51 = vmul.f32 0.5, %v2626_v37 }
 0x41e   : > { %v2629_v16 = vpop.xlane.xlu1 %2628 }
 0x41f   : > { %v2864_v6 = vadd.f32 %v2848_v34, %v2648_v51  ;;  %v2649_v10 = vmul.f32 0.5, %v2629_v16 }
 0x421   : > { %2881 = vst.msk [vmem:[%s4382_s27 + $0x60] sm:$0xff] %vm2868_vm2, %v2864_v6 }
 0x426   : > { %v2835_v9 = vpop.xlane.xlu1 %2834 }
 0x427   : > { %v2632_v35 = vpop.xlane.xlu2 %2631  ;;  %v2635_v26 = vpop.xlane.xlu0 %2634  ;;  %v2851_v11 = vmul.f32 0.8, %v2835_v9 }
 0x428   : > { %v2651_v54 = vmul.f32 0.5, %v2635_v26  ;;  %v2650_v21 = vmul.f32 0.5, %v2632_v35 }
 0x42a   : > { %v2867_v28 = vadd.f32 %v2851_v11, %v2651_v54 }
 0x42c   : > { %2884 = vst.msk [vmem:[%s4382_s27 + $0x78] sm:$0xff] %vm2868_vm2, %v2867_v28 }
 0x42f   : > { %v2829_v41 = vpop.xlane.xlu2 %2828  ;;  %v2832_v25 = vpop.xlane.xlu0 %2831 }
 0x430   : > { %v2849_v44 = vmul.f32 0.8, %v2829_v41  ;;  %v2850_v18 = vmul.f32 0.8, %v2832_v25 }
 0x432   : > { %v2865_v32 = vadd.f32 %v2849_v44, %v2649_v10  ;;  %v2866_v30 = vadd.f32 %v2850_v18, %v2650_v21 }
 0x434   : > { %2882 = vst.msk [vmem:[%s4382_s27 + $0x68] sm:$0xff] %vm2868_vm2, %v2865_v32 }
 0x435   : > { %2883 = vst.msk [vmem:[%s4382_s27 + $0x70] sm:$0xff] %vm2868_vm2, %v2866_v30 }
 0x436 PF: > { %s30_s0 = sadd.s32 1, %s3346_s0  }
 0x437   : > { %p27_p4 = scmp.ge.s32.totalorder %s30_s0, 4  }
 0x439   :  { %29 = sbr.rel (!%p27_p4) target bundleno = 5 (0x5), region = 137 }

</bundles_post_ra>
